<compile_context>
chip_gen: v5e
topology: v5e:2x2
jax: 0.10.0
libtpu: 0.0.40
codegen_flags: <defaults>
</compile_context>

<pallas_src>
import functools

import jax
import jax.numpy as jnp
import numpy as np
from jax.experimental import pallas as pl
from jax.experimental.pallas import tpu as pltpu


def _resmlp_kernel(x_ref, lng_ref, lnb_ref, psel_ref, wconv_ref, bconv_ref,
                   a1g_ref, a1b_ref, wcp_ref, bcp_ref,
                   a2g_ref, a2b_ref, w1_ref, b1_ref, w2_ref, b2_ref,
                   a3g_ref, a3b_ref, o_ref):
    f32 = jnp.float32

    # ---- norm_input: LayerNorm over dim_c (eps=1e-6); elementwise math in f32 ----
    x = x_ref[...].astype(f32)                                       # (N, dim_c)
    mean = jnp.mean(x, axis=-1, keepdims=True)
    var = jnp.mean((x - mean) ** 2, axis=-1, keepdims=True)
    xn = (x - mean) * jax.lax.rsqrt(var + 1e-6)
    xn = xn * lng_ref[...].astype(f32) + lnb_ref[...].astype(f32)

    # ---- Conv2d(k=s=t) as a sum of (selection @ xn) @ W_s on the MXU ----
    xn_m = xn.astype(psel_ref.dtype)
    n_off = psel_ref.shape[0]                                        # t*t (static)
    x0 = None
    for s in range(n_off):
        gath = jnp.dot(psel_ref[s], xn_m,
                       preferred_element_type=f32)                   # (N_v, dim_c)
        term = jnp.dot(gath.astype(wconv_ref.dtype), wconv_ref[s],
                       preferred_element_type=f32)                   # (N_v, dim_v)
        x0 = term if x0 is None else x0 + term
    x0 = x0 + bconv_ref[...].astype(f32)                             # pooled tokens

    # ---- affine1 -> cross-patch Linear (token mixing) -> +residual ----
    y = x0 * a1g_ref[...].astype(f32) + a1b_ref[...].astype(f32)
    xp = jnp.dot(wcp_ref[...], y.astype(wcp_ref.dtype),
                 preferred_element_type=f32) + bcp_ref[...].astype(f32)
    x1 = xp + x0

    # ---- affine2 -> channel MLP (fc1 / exact GELU / fc2) -> affine3 -> +residual ----
    z = x1 * a2g_ref[...].astype(f32) + a2b_ref[...].astype(f32)
    h = jnp.dot(z.astype(w1_ref.dtype), w1_ref[...],
                preferred_element_type=f32) + b1_ref[...].astype(f32)
    h = 0.5 * h * (1.0 + jax.lax.erf(h * np.float32(0.7071067811865476)))
    z2 = jnp.dot(h.astype(w2_ref.dtype), w2_ref[...],
                 preferred_element_type=f32) + b2_ref[...].astype(f32)
    z2 = z2 * a3g_ref[...].astype(f32) + a3b_ref[...].astype(f32)

    o_ref[...] = (z2 + x1).astype(o_ref.dtype)                       # lane-dense store


def _build_patch_select(patches_shape, token_pool_size, dtype):
    """0/1 matrices P_s (t*t, N_v, N): P_s[IJ, r]=1 iff token r is the (ki,kj)
    pixel of super-patch IJ.  Built at trace time (static), tiny."""
    Hp, Wp = patches_shape
    t = token_pool_size
    Hv, Wv = Hp // t, Wp // t
    sel = np.zeros((t * t, Hv * Wv, Hp * Wp), dtype=np.float32)
    for ki in range(t):
        for kj in range(t):
            s = ki * t + kj
            for bi in range(Hv):
                for bj in range(Wv):
                    r = (bi * t + ki) * Wp + (bj * t + kj)
                    sel[s, bi * Wv + bj, r] = 1.0
    return jnp.asarray(sel, dtype=dtype)


def resmlp_forward(x, params, *, patches_shape, token_pool_size,
                   use_bf16_mxu=False):
    """x: (B, N, dim_c) with N = patches_shape[0] * patches_shape[1]."""
    B, N, dim_c = x.shape
    Hp, Wp = patches_shape
    t = token_pool_size
    assert N == Hp * Wp and Hp % t == 0 and Wp % t == 0
    Hv, Wv = Hp // t, Wp // t
    N_v = Hv * Wv
    dim_v = params["conv_w"].shape[0]
    hidden = params["fc1_w"].shape[1]

    f32 = jnp.float32
    mxu_dtype = jnp.bfloat16 if use_bf16_mxu else f32
    out_dtype = jnp.bfloat16 if use_bf16_mxu else x.dtype

    x_in = x.astype(mxu_dtype) if use_bf16_mxu else x
    psel = _build_patch_select(patches_shape, t, mxu_dtype)          # (t*t, N_v, N)
    # Conv2d weight (dim_v, dim_c, t, t) -> per-offset matmul rhs (t*t, dim_c, dim_v)
    wconv = jnp.transpose(params["conv_w"], (2, 3, 1, 0)).reshape(
        t * t, dim_c, dim_v).astype(mxu_dtype)
    ln_g = params["ln_g"].reshape(1, dim_c).astype(f32)
    ln_b = params["ln_b"].reshape(1, dim_c).astype(f32)
    bconv = params["conv_b"].reshape(1, dim_v).astype(f32)
    a1g = params["a1_g"].reshape(1, dim_v).astype(f32)
    a1b = params["a1_b"].reshape(1, dim_v).astype(f32)
    wcp = params["cp_w"].astype(mxu_dtype)                           # (N_v, N_v)
    bcp = params["cp_b"].reshape(N_v, 1).astype(f32)
    a2g = params["a2_g"].reshape(1, dim_v).astype(f32)
    a2b = params["a2_b"].reshape(1, dim_v).astype(f32)
    w1 = params["fc1_w"].astype(mxu_dtype)                           # (dim_v, hidden)
    b1 = params["fc1_b"].reshape(1, hidden).astype(f32)
    w2 = params["fc2_w"].astype(mxu_dtype)                           # (hidden, dim_v)
    b2 = params["fc2_b"].reshape(1, dim_v).astype(f32)
    a3g = params["a3_g"].reshape(1, dim_v).astype(f32)
    a3b = params["a3_b"].reshape(1, dim_v).astype(f32)

    def inv(shape):  # grid-invariant operand: DMA'd once, VMEM-resident
        return pl.BlockSpec(shape, lambda b, _n=len(shape): (0,) * _n)

    out = pl.pallas_call(
        _resmlp_kernel,
        out_shape=jax.ShapeDtypeStruct((B, N_v, dim_v), out_dtype),
        grid_spec=pltpu.PrefetchScalarGridSpec(
            num_scalar_prefetch=0,
            grid=(B,),
            in_specs=[
                pl.BlockSpec((None, N, dim_c), lambda b: (b, 0, 0)),  # x (per batch)
                inv((1, dim_c)), inv((1, dim_c)),                     # LN gamma / beta
                inv((t * t, N_v, N)),                                 # patch selection
                inv((t * t, dim_c, dim_v)), inv((1, dim_v)),          # conv W / bias
                inv((1, dim_v)), inv((1, dim_v)),                     # affine1
                inv((N_v, N_v)), inv((N_v, 1)),                       # cross-patch W / b
                inv((1, dim_v)), inv((1, dim_v)),                     # affine2
                inv((dim_v, hidden)), inv((1, hidden)),               # fc1 W / b
                inv((hidden, dim_v)), inv((1, dim_v)),                # fc2 W / b
                inv((1, dim_v)), inv((1, dim_v)),                     # affine3
            ],
            out_specs=pl.BlockSpec((None, N_v, dim_v), lambda b: (b, 0, 0)),
        ),
        compiler_params=pltpu.CompilerParams(
            dimension_semantics=("parallel",)),
    )(x_in, ln_g, ln_b, psel, wconv, bconv, a1g, a1b, wcp, bcp,
      a2g, a2b, w1, b1, w2, b2, a3g, a3b)
    return out


def _reference(x, params, *, patches_shape, token_pool_size):
    """Pure-JAX reference mirroring the PyTorch forward (independent path)."""
    B, N, dim_c = x.shape
    Hp, Wp = patches_shape
    t = token_pool_size
    dim_v = params["conv_w"].shape[0]
    Hv, Wv = Hp // t, Wp // t

    with jax.default_matmul_precision("highest"):
        mean = jnp.mean(x, axis=-1, keepdims=True)
        var = jnp.mean((x - mean) ** 2, axis=-1, keepdims=True)
        xn = (x - mean) / jnp.sqrt(var + 1e-6) * params["ln_g"] + params["ln_b"]

        xc = jnp.transpose(xn, (0, 2, 1)).reshape(B, dim_c, Hp, Wp)
        y = jax.lax.conv_general_dilated(
            xc, params["conv_w"], window_strides=(t, t), padding="VALID",
            dimension_numbers=("NCHW", "OIHW", "NCHW"))
        y = y + params["conv_b"][None, :, None, None]
        y = jnp.transpose(y.reshape(B, dim_v, Hv * Wv), (0, 2, 1))    # (B, N_v, dim_v)

        res1 = y
        z = y * params["a1_g"] + params["a1_b"]
        z = jnp.einsum("nm,bmv->bnv", params["cp_w"], z) + params["cp_b"][None, :, None]
        x1 = z + res1

        res2 = x1
        h = x1 * params["a2_g"] + params["a2_b"]
        h = h @ params["fc1_w"] + params["fc1_b"]
        h = jax.nn.gelu(h, approximate=False)
        h = h @ params["fc2_w"] + params["fc2_b"]
        h = h * params["a3_g"] + params["a3_b"]
        return h + res2


if __name__ == "__main__":
    # Small shapes consistent with the module; dim_v=128 keeps output lane-dense.
    B = 2
    dim_c = 32
    dim_v = 128
    token_pool_size = 2
    patches_shape = (16, 16)
    hidden_dim = 4 * dim_v                                   # module default
    N = patches_shape[0] * patches_shape[1]                  # 256
    N_v = (patches_shape[0] // token_pool_size) * (patches_shape[1] // token_pool_size)  # 64

    key = jax.random.PRNGKey(0)
    ks = jax.random.split(key, 16)
    x = jax.random.normal(ks[0], (B, N, dim_c), dtype=jnp.float32)
    params = {
        "ln_g": 1.0 + 0.05 * jax.random.normal(ks[1], (dim_c,), jnp.float32),
        "ln_b": 0.05 * jax.random.normal(ks[2], (dim_c,), jnp.float32),
        "conv_w": 0.1 * jax.random.normal(
            ks[3], (dim_v, dim_c, token_pool_size, token_pool_size), jnp.float32),
        "conv_b": 0.1 * jax.random.normal(ks[4], (dim_v,), jnp.float32),
        "a1_g": 1.0 + 0.05 * jax.random.normal(ks[5], (dim_v,), jnp.float32),
        "a1_b": 0.05 * jax.random.normal(ks[6], (dim_v,), jnp.float32),
        "cp_w": 0.1 * jax.random.normal(ks[7], (N_v, N_v), jnp.float32),
        "cp_b": 0.1 * jax.random.normal(ks[8], (N_v,), jnp.float32),
        "a2_g": 1.0 + 0.05 * jax.random.normal(ks[9], (dim_v,), jnp.float32),
        "a2_b": 0.05 * jax.random.normal(ks[10], (dim_v,), jnp.float32),
        "fc1_w": 0.1 * jax.random.normal(ks[11], (dim_v, hidden_dim), jnp.float32),
        "fc1_b": 0.1 * jax.random.normal(ks[12], (hidden_dim,), jnp.float32),
        "fc2_w": 0.1 * jax.random.normal(ks[13], (hidden_dim, dim_v), jnp.float32),
        "fc2_b": 0.1 * jax.random.normal(ks[14], (dim_v,), jnp.float32),
        "a3_g": 1.0 + 0.05 * jax.random.normal(ks[15], (dim_v,), jnp.float32),
        "a3_b": jnp.zeros((dim_v,), jnp.float32),
    }

    ref = _reference(x, params, patches_shape=patches_shape,
                     token_pool_size=token_pool_size)

    # f32 path (tight correctness check).
    run_f32 = jax.jit(functools.partial(
        resmlp_forward, patches_shape=patches_shape,
        token_pool_size=token_pool_size, use_bf16_mxu=False))
    out = jax.block_until_ready(run_f32(x, params))
    np.testing.assert_allclose(np.asarray(out), np.asarray(ref),
                               rtol=1e-3, atol=1e-3)
    assert out.shape == (B, N_v, dim_v)

    # bf16-fed MXU path (v5e/v6e/v7x fast path); looser tolerance.
    run_bf16 = jax.jit(functools.partial(
        resmlp_forward, patches_shape=patches_shape,
        token_pool_size=token_pool_size, use_bf16_mxu=True))
    out_b = jax.block_until_ready(run_bf16(x, params))
    assert out_b.shape == (B, N_v, dim_v)
    np.testing.assert_allclose(np.asarray(jnp.asarray(out_b, jnp.float32)),
                               np.asarray(ref), rtol=0.1, atol=0.25)

    print("KERNEL_OK")
</pallas_src>

<mosaic_0001>
module attributes {stable_mosaic.version = 11 : i64} {
  func.func @_resmlp_kernel(%arg0: i32, %arg1: memref<1x256x32xf32, #tpu.memory_space<vmem>>, %arg2: memref<1x32xf32, #tpu.memory_space<vmem>>, %arg3: memref<1x32xf32, #tpu.memory_space<vmem>>, %arg4: memref<4x64x256xf32, #tpu.memory_space<vmem>>, %arg5: memref<4x32x128xf32, #tpu.memory_space<vmem>>, %arg6: memref<1x128xf32, #tpu.memory_space<vmem>>, %arg7: memref<1x128xf32, #tpu.memory_space<vmem>>, %arg8: memref<1x128xf32, #tpu.memory_space<vmem>>, %arg9: memref<64x64xf32, #tpu.memory_space<vmem>>, %arg10: memref<64x1xf32, #tpu.memory_space<vmem>>, %arg11: memref<1x128xf32, #tpu.memory_space<vmem>>, %arg12: memref<1x128xf32, #tpu.memory_space<vmem>>, %arg13: memref<128x512xf32, #tpu.memory_space<vmem>>, %arg14: memref<1x512xf32, #tpu.memory_space<vmem>>, %arg15: memref<512x128xf32, #tpu.memory_space<vmem>>, %arg16: memref<1x128xf32, #tpu.memory_space<vmem>>, %arg17: memref<1x128xf32, #tpu.memory_space<vmem>>, %arg18: memref<1x128xf32, #tpu.memory_space<vmem>>, %arg19: memref<1x64x128xf32, #tpu.memory_space<vmem>>) attributes {dimension_semantics = [#tpu.dimension_semantics<parallel>], iteration_bounds = array<i64: 2>, scalar_prefetch = 0 : i64, scratch_operands = 0 : i64, tpu.core_type = #tpu.core_type<tc>, window_params = [{transform_indices = @transform_0, window_bounds = array<i64: 1, 256, 32>}, {pipeline_mode = #tpu.pipeline_mode<synchronous>, transform_indices = @transform_1, window_bounds = array<i64: 1, 32>}, {pipeline_mode = #tpu.pipeline_mode<synchronous>, transform_indices = @transform_2, window_bounds = array<i64: 1, 32>}, {pipeline_mode = #tpu.pipeline_mode<synchronous>, transform_indices = @transform_3, window_bounds = array<i64: 4, 64, 256>}, {pipeline_mode = #tpu.pipeline_mode<synchronous>, transform_indices = @transform_4, window_bounds = array<i64: 4, 32, 128>}, {pipeline_mode = #tpu.pipeline_mode<synchronous>, transform_indices = @transform_5, window_bounds = array<i64: 1, 128>}, {pipeline_mode = #tpu.pipeline_mode<synchronous>, transform_indices = @transform_6, window_bounds = array<i64: 1, 128>}, {pipeline_mode = #tpu.pipeline_mode<synchronous>, transform_indices = @transform_7, window_bounds = array<i64: 1, 128>}, {pipeline_mode = #tpu.pipeline_mode<synchronous>, transform_indices = @transform_8, window_bounds = array<i64: 64, 64>}, {pipeline_mode = #tpu.pipeline_mode<synchronous>, transform_indices = @transform_9, window_bounds = array<i64: 64, 1>}, {pipeline_mode = #tpu.pipeline_mode<synchronous>, transform_indices = @transform_10, window_bounds = array<i64: 1, 128>}, {pipeline_mode = #tpu.pipeline_mode<synchronous>, transform_indices = @transform_11, window_bounds = array<i64: 1, 128>}, {pipeline_mode = #tpu.pipeline_mode<synchronous>, transform_indices = @transform_12, window_bounds = array<i64: 128, 512>}, {pipeline_mode = #tpu.pipeline_mode<synchronous>, transform_indices = @transform_13, window_bounds = array<i64: 1, 512>}, {pipeline_mode = #tpu.pipeline_mode<synchronous>, transform_indices = @transform_14, window_bounds = array<i64: 512, 128>}, {pipeline_mode = #tpu.pipeline_mode<synchronous>, transform_indices = @transform_15, window_bounds = array<i64: 1, 128>}, {pipeline_mode = #tpu.pipeline_mode<synchronous>, transform_indices = @transform_16, window_bounds = array<i64: 1, 128>}, {pipeline_mode = #tpu.pipeline_mode<synchronous>, transform_indices = @transform_17, window_bounds = array<i64: 1, 128>}, {transform_indices = @transform_18, window_bounds = array<i64: 1, 64, 128>}]} {
    %c0 = arith.constant 0 : index
    %c0_0 = arith.constant 0 : index
    %c0_1 = arith.constant 0 : index
    %0 = vector.load %arg1[%c0, %c0_0, %c0_1] : memref<1x256x32xf32, #tpu.memory_space<vmem>>, vector<1x256x32xf32>
    %1 = vector.shape_cast %0 : vector<1x256x32xf32> to vector<256x32xf32>
    %cst = arith.constant dense<0.000000e+00> : vector<256xf32>
    %2 = vector.multi_reduction <add>, %1, %cst [1] : vector<256x32xf32> to vector<256xf32>
    %3 = vector.shape_cast %2 : vector<256xf32> to vector<256x1xf32>
    %cst_2 = arith.constant 3.200000e+01 : f32
    %4 = vector.broadcast %cst_2 : f32 to vector<256x1xf32>
    %5 = arith.divf %3, %4 : vector<256x1xf32>
    %6 = vector.broadcast %5 : vector<256x1xf32> to vector<256x32xf32>
    %7 = arith.subf %1, %6 : vector<256x32xf32>
    %8 = arith.mulf %7, %7 : vector<256x32xf32>
    %cst_3 = arith.constant dense<0.000000e+00> : vector<256xf32>
    %9 = vector.multi_reduction <add>, %8, %cst_3 [1] : vector<256x32xf32> to vector<256xf32>
    %10 = vector.shape_cast %9 : vector<256xf32> to vector<256x1xf32>
    %cst_4 = arith.constant 3.200000e+01 : f32
    %11 = vector.broadcast %cst_4 : f32 to vector<256x1xf32>
    %12 = arith.divf %10, %11 : vector<256x1xf32>
    %13 = vector.broadcast %5 : vector<256x1xf32> to vector<256x32xf32>
    %14 = arith.subf %1, %13 : vector<256x32xf32>
    %cst_5 = arith.constant 9.99999997E-7 : f32
    %15 = vector.broadcast %cst_5 : f32 to vector<256x1xf32>
    %16 = arith.addf %12, %15 : vector<256x1xf32>
    %17 = math.rsqrt %16 : vector<256x1xf32>
    %18 = vector.broadcast %17 : vector<256x1xf32> to vector<256x32xf32>
    %19 = arith.mulf %14, %18 : vector<256x32xf32>
    %c0_6 = arith.constant 0 : index
    %c0_7 = arith.constant 0 : index
    %20 = vector.load %arg2[%c0_6, %c0_7] : memref<1x32xf32, #tpu.memory_space<vmem>>, vector<1x32xf32>
    %21 = vector.broadcast %20 : vector<1x32xf32> to vector<256x32xf32>
    %22 = arith.mulf %19, %21 : vector<256x32xf32>
    %c0_8 = arith.constant 0 : index
    %c0_9 = arith.constant 0 : index
    %23 = vector.load %arg3[%c0_8, %c0_9] : memref<1x32xf32, #tpu.memory_space<vmem>>, vector<1x32xf32>
    %24 = vector.broadcast %23 : vector<1x32xf32> to vector<256x32xf32>
    %25 = arith.addf %22, %24 : vector<256x32xf32>
    %c0_10 = arith.constant 0 : index
    %c0_11 = arith.constant 0 : index
    %c0_12 = arith.constant 0 : index
    %26 = vector.load %arg4[%c0_10, %c0_11, %c0_12] : memref<4x64x256xf32, #tpu.memory_space<vmem>>, vector<1x64x256xf32>
    %27 = vector.shape_cast %26 : vector<1x64x256xf32> to vector<64x256xf32>
    %cst_13 = arith.constant dense<0.000000e+00> : vector<64x32xf32>
    %28 = tpu.matmul %27, %25, %cst_13 {dimension_numbers = #tpu.dot_dimension_numbers<[1], [0], [0], [1], [0, 0, 1, 1], [], []>} : vector<64x256xf32>, vector<256x32xf32>, vector<64x32xf32> -> vector<64x32xf32>
    %c0_14 = arith.constant 0 : index
    %c0_15 = arith.constant 0 : index
    %c0_16 = arith.constant 0 : index
    %29 = vector.load %arg5[%c0_14, %c0_15, %c0_16] : memref<4x32x128xf32, #tpu.memory_space<vmem>>, vector<1x32x128xf32>
    %30 = vector.shape_cast %29 : vector<1x32x128xf32> to vector<32x128xf32>
    %cst_17 = arith.constant dense<0.000000e+00> : vector<64x128xf32>
    %31 = tpu.matmul %28, %30, %cst_17 {dimension_numbers = #tpu.dot_dimension_numbers<[1], [0], [0], [1], [0, 0, 1, 1], [], []>} : vector<64x32xf32>, vector<32x128xf32>, vector<64x128xf32> -> vector<64x128xf32>
    %c1 = arith.constant 1 : index
    %c0_18 = arith.constant 0 : index
    %c0_19 = arith.constant 0 : index
    %32 = vector.load %arg4[%c1, %c0_18, %c0_19] : memref<4x64x256xf32, #tpu.memory_space<vmem>>, vector<1x64x256xf32>
    %33 = vector.shape_cast %32 : vector<1x64x256xf32> to vector<64x256xf32>
    %cst_20 = arith.constant dense<0.000000e+00> : vector<64x32xf32>
    %34 = tpu.matmul %33, %25, %cst_20 {dimension_numbers = #tpu.dot_dimension_numbers<[1], [0], [0], [1], [0, 0, 1, 1], [], []>} : vector<64x256xf32>, vector<256x32xf32>, vector<64x32xf32> -> vector<64x32xf32>
    %c1_21 = arith.constant 1 : index
    %c0_22 = arith.constant 0 : index
    %c0_23 = arith.constant 0 : index
    %35 = vector.load %arg5[%c1_21, %c0_22, %c0_23] : memref<4x32x128xf32, #tpu.memory_space<vmem>>, vector<1x32x128xf32>
    %36 = vector.shape_cast %35 : vector<1x32x128xf32> to vector<32x128xf32>
    %cst_24 = arith.constant dense<0.000000e+00> : vector<64x128xf32>
    %37 = tpu.matmul %34, %36, %cst_24 {dimension_numbers = #tpu.dot_dimension_numbers<[1], [0], [0], [1], [0, 0, 1, 1], [], []>} : vector<64x32xf32>, vector<32x128xf32>, vector<64x128xf32> -> vector<64x128xf32>
    %38 = arith.addf %31, %37 : vector<64x128xf32>
    %c2 = arith.constant 2 : index
    %c0_25 = arith.constant 0 : index
    %c0_26 = arith.constant 0 : index
    %39 = vector.load %arg4[%c2, %c0_25, %c0_26] : memref<4x64x256xf32, #tpu.memory_space<vmem>>, vector<1x64x256xf32>
    %40 = vector.shape_cast %39 : vector<1x64x256xf32> to vector<64x256xf32>
    %cst_27 = arith.constant dense<0.000000e+00> : vector<64x32xf32>
    %41 = tpu.matmul %40, %25, %cst_27 {dimension_numbers = #tpu.dot_dimension_numbers<[1], [0], [0], [1], [0, 0, 1, 1], [], []>} : vector<64x256xf32>, vector<256x32xf32>, vector<64x32xf32> -> vector<64x32xf32>
    %c2_28 = arith.constant 2 : index
    %c0_29 = arith.constant 0 : index
    %c0_30 = arith.constant 0 : index
    %42 = vector.load %arg5[%c2_28, %c0_29, %c0_30] : memref<4x32x128xf32, #tpu.memory_space<vmem>>, vector<1x32x128xf32>
    %43 = vector.shape_cast %42 : vector<1x32x128xf32> to vector<32x128xf32>
    %cst_31 = arith.constant dense<0.000000e+00> : vector<64x128xf32>
    %44 = tpu.matmul %41, %43, %cst_31 {dimension_numbers = #tpu.dot_dimension_numbers<[1], [0], [0], [1], [0, 0, 1, 1], [], []>} : vector<64x32xf32>, vector<32x128xf32>, vector<64x128xf32> -> vector<64x128xf32>
    %45 = arith.addf %38, %44 : vector<64x128xf32>
    %c3 = arith.constant 3 : index
    %c0_32 = arith.constant 0 : index
    %c0_33 = arith.constant 0 : index
    %46 = vector.load %arg4[%c3, %c0_32, %c0_33] : memref<4x64x256xf32, #tpu.memory_space<vmem>>, vector<1x64x256xf32>
    %47 = vector.shape_cast %46 : vector<1x64x256xf32> to vector<64x256xf32>
    %cst_34 = arith.constant dense<0.000000e+00> : vector<64x32xf32>
    %48 = tpu.matmul %47, %25, %cst_34 {dimension_numbers = #tpu.dot_dimension_numbers<[1], [0], [0], [1], [0, 0, 1, 1], [], []>} : vector<64x256xf32>, vector<256x32xf32>, vector<64x32xf32> -> vector<64x32xf32>
    %c3_35 = arith.constant 3 : index
    %c0_36 = arith.constant 0 : index
    %c0_37 = arith.constant 0 : index
    %49 = vector.load %arg5[%c3_35, %c0_36, %c0_37] : memref<4x32x128xf32, #tpu.memory_space<vmem>>, vector<1x32x128xf32>
    %50 = vector.shape_cast %49 : vector<1x32x128xf32> to vector<32x128xf32>
    %cst_38 = arith.constant dense<0.000000e+00> : vector<64x128xf32>
    %51 = tpu.matmul %48, %50, %cst_38 {dimension_numbers = #tpu.dot_dimension_numbers<[1], [0], [0], [1], [0, 0, 1, 1], [], []>} : vector<64x32xf32>, vector<32x128xf32>, vector<64x128xf32> -> vector<64x128xf32>
    %52 = arith.addf %45, %51 : vector<64x128xf32>
    %c0_39 = arith.constant 0 : index
    %c0_40 = arith.constant 0 : index
    %53 = vector.load %arg6[%c0_39, %c0_40] : memref<1x128xf32, #tpu.memory_space<vmem>>, vector<1x128xf32>
    %54 = vector.broadcast %53 : vector<1x128xf32> to vector<64x128xf32>
    %55 = arith.addf %52, %54 : vector<64x128xf32>
    %c0_41 = arith.constant 0 : index
    %c0_42 = arith.constant 0 : index
    %56 = vector.load %arg7[%c0_41, %c0_42] : memref<1x128xf32, #tpu.memory_space<vmem>>, vector<1x128xf32>
    %57 = vector.broadcast %56 : vector<1x128xf32> to vector<64x128xf32>
    %58 = arith.mulf %55, %57 : vector<64x128xf32>
    %c0_43 = arith.constant 0 : index
    %c0_44 = arith.constant 0 : index
    %59 = vector.load %arg8[%c0_43, %c0_44] : memref<1x128xf32, #tpu.memory_space<vmem>>, vector<1x128xf32>
    %60 = vector.broadcast %59 : vector<1x128xf32> to vector<64x128xf32>
    %61 = arith.addf %58, %60 : vector<64x128xf32>
    %c0_45 = arith.constant 0 : index
    %c0_46 = arith.constant 0 : index
    %62 = vector.load %arg9[%c0_45, %c0_46] : memref<64x64xf32, #tpu.memory_space<vmem>>, vector<64x64xf32>
    %cst_47 = arith.constant dense<0.000000e+00> : vector<64x128xf32>
    %63 = tpu.matmul %62, %61, %cst_47 {dimension_numbers = #tpu.dot_dimension_numbers<[1], [0], [0], [1], [0, 0, 1, 1], [], []>} : vector<64x64xf32>, vector<64x128xf32>, vector<64x128xf32> -> vector<64x128xf32>
    %c0_48 = arith.constant 0 : index
    %c0_49 = arith.constant 0 : index
    %64 = vector.load %arg10[%c0_48, %c0_49] : memref<64x1xf32, #tpu.memory_space<vmem>>, vector<64x1xf32>
    %65 = vector.broadcast %64 : vector<64x1xf32> to vector<64x128xf32>
    %66 = arith.addf %63, %65 : vector<64x128xf32>
    %67 = arith.addf %66, %55 : vector<64x128xf32>
    %c0_50 = arith.constant 0 : index
    %c0_51 = arith.constant 0 : index
    %68 = vector.load %arg11[%c0_50, %c0_51] : memref<1x128xf32, #tpu.memory_space<vmem>>, vector<1x128xf32>
    %69 = vector.broadcast %68 : vector<1x128xf32> to vector<64x128xf32>
    %70 = arith.mulf %67, %69 : vector<64x128xf32>
    %c0_52 = arith.constant 0 : index
    %c0_53 = arith.constant 0 : index
    %71 = vector.load %arg12[%c0_52, %c0_53] : memref<1x128xf32, #tpu.memory_space<vmem>>, vector<1x128xf32>
    %72 = vector.broadcast %71 : vector<1x128xf32> to vector<64x128xf32>
    %73 = arith.addf %70, %72 : vector<64x128xf32>
    %c0_54 = arith.constant 0 : index
    %c0_55 = arith.constant 0 : index
    %74 = vector.load %arg13[%c0_54, %c0_55] : memref<128x512xf32, #tpu.memory_space<vmem>>, vector<128x512xf32>
    %cst_56 = arith.constant dense<0.000000e+00> : vector<64x512xf32>
    %75 = tpu.matmul %73, %74, %cst_56 {dimension_numbers = #tpu.dot_dimension_numbers<[1], [0], [0], [1], [0, 0, 1, 1], [], []>} : vector<64x128xf32>, vector<128x512xf32>, vector<64x512xf32> -> vector<64x512xf32>
    %c0_57 = arith.constant 0 : index
    %c0_58 = arith.constant 0 : index
    %76 = vector.load %arg14[%c0_57, %c0_58] : memref<1x512xf32, #tpu.memory_space<vmem>>, vector<1x512xf32>
    %77 = vector.broadcast %76 : vector<1x512xf32> to vector<64x512xf32>
    %78 = arith.addf %75, %77 : vector<64x512xf32>
    %cst_59 = arith.constant 5.000000e-01 : f32
    %79 = vector.broadcast %cst_59 : f32 to vector<64x512xf32>
    %80 = arith.mulf %79, %78 : vector<64x512xf32>
    %cst_60 = arith.constant 0.707106769 : f32
    %81 = vector.broadcast %cst_60 : f32 to vector<64x512xf32>
    %82 = arith.mulf %78, %81 : vector<64x512xf32>
    %83 = math.erf %82 : vector<64x512xf32>
    %cst_61 = arith.constant 1.000000e+00 : f32
    %84 = vector.broadcast %cst_61 : f32 to vector<64x512xf32>
    %85 = arith.addf %84, %83 : vector<64x512xf32>
    %86 = arith.mulf %80, %85 : vector<64x512xf32>
    %c0_62 = arith.constant 0 : index
    %c0_63 = arith.constant 0 : index
    %87 = vector.load %arg15[%c0_62, %c0_63] : memref<512x128xf32, #tpu.memory_space<vmem>>, vector<512x128xf32>
    %cst_64 = arith.constant dense<0.000000e+00> : vector<64x128xf32>
    %88 = tpu.matmul %86, %87, %cst_64 {dimension_numbers = #tpu.dot_dimension_numbers<[1], [0], [0], [1], [0, 0, 1, 1], [], []>} : vector<64x512xf32>, vector<512x128xf32>, vector<64x128xf32> -> vector<64x128xf32>
    %c0_65 = arith.constant 0 : index
    %c0_66 = arith.constant 0 : index
    %89 = vector.load %arg16[%c0_65, %c0_66] : memref<1x128xf32, #tpu.memory_space<vmem>>, vector<1x128xf32>
    %90 = vector.broadcast %89 : vector<1x128xf32> to vector<64x128xf32>
    %91 = arith.addf %88, %90 : vector<64x128xf32>
    %c0_67 = arith.constant 0 : index
    %c0_68 = arith.constant 0 : index
    %92 = vector.load %arg17[%c0_67, %c0_68] : memref<1x128xf32, #tpu.memory_space<vmem>>, vector<1x128xf32>
    %93 = vector.broadcast %92 : vector<1x128xf32> to vector<64x128xf32>
    %94 = arith.mulf %91, %93 : vector<64x128xf32>
    %c0_69 = arith.constant 0 : index
    %c0_70 = arith.constant 0 : index
    %95 = vector.load %arg18[%c0_69, %c0_70] : memref<1x128xf32, #tpu.memory_space<vmem>>, vector<1x128xf32>
    %96 = vector.broadcast %95 : vector<1x128xf32> to vector<64x128xf32>
    %97 = arith.addf %94, %96 : vector<64x128xf32>
    %98 = arith.addf %97, %67 : vector<64x128xf32>
    %c0_71 = arith.constant 0 : index
    %c0_72 = arith.constant 0 : index
    %c0_73 = arith.constant 0 : index
    %99 = vector.load %arg19[%c0_71, %c0_72, %c0_73] : memref<1x64x128xf32, #tpu.memory_space<vmem>>, vector<1x64x128xf32>
    %100 = vector.shape_cast %99 : vector<1x64x128xf32> to vector<64x128xf32>
    %101 = vector.shape_cast %98 : vector<64x128xf32> to vector<1x64x128xf32>
    tpu.vector_store %arg19[%c0_71, %c0_72, %c0_73], %101 {strides = array<i32>} : memref<1x64x128xf32, #tpu.memory_space<vmem>>, vector<1x64x128xf32>,
    return
  }
  func.func @transform_0(%arg0: i32) -> (i32, i32, i32) {
    %c0_i32 = arith.constant 0 : i32
    %c0_i32_0 = arith.constant 0 : i32
    %c0_i32_1 = arith.constant 0 : i32
    return %arg0, %c0_i32, %c0_i32_0 : i32, i32, i32
  }
  func.func @transform_1(%arg0: i32) -> (i32, i32) {
    %c0_i32 = arith.constant 0 : i32
    %c0_i32_0 = arith.constant 0 : i32
    %c0_i32_1 = arith.constant 0 : i32
    return %c0_i32, %c0_i32_0 : i32, i32
  }
  func.func @transform_2(%arg0: i32) -> (i32, i32) {
    %c0_i32 = arith.constant 0 : i32
    %c0_i32_0 = arith.constant 0 : i32
    %c0_i32_1 = arith.constant 0 : i32
    return %c0_i32, %c0_i32_0 : i32, i32
  }
  func.func @transform_3(%arg0: i32) -> (i32, i32, i32) {
    %c0_i32 = arith.constant 0 : i32
    %c0_i32_0 = arith.constant 0 : i32
    %c0_i32_1 = arith.constant 0 : i32
    %c0_i32_2 = arith.constant 0 : i32
    return %c0_i32, %c0_i32_0, %c0_i32_1 : i32, i32, i32
  }
  func.func @transform_4(%arg0: i32) -> (i32, i32, i32) {
    %c0_i32 = arith.constant 0 : i32
    %c0_i32_0 = arith.constant 0 : i32
    %c0_i32_1 = arith.constant 0 : i32
    %c0_i32_2 = arith.constant 0 : i32
    return %c0_i32, %c0_i32_0, %c0_i32_1 : i32, i32, i32
  }
  func.func @transform_5(%arg0: i32) -> (i32, i32) {
    %c0_i32 = arith.constant 0 : i32
    %c0_i32_0 = arith.constant 0 : i32
    %c0_i32_1 = arith.constant 0 : i32
    return %c0_i32, %c0_i32_0 : i32, i32
  }
  func.func @transform_6(%arg0: i32) -> (i32, i32) {
    %c0_i32 = arith.constant 0 : i32
    %c0_i32_0 = arith.constant 0 : i32
    %c0_i32_1 = arith.constant 0 : i32
    return %c0_i32, %c0_i32_0 : i32, i32
  }
  func.func @transform_7(%arg0: i32) -> (i32, i32) {
    %c0_i32 = arith.constant 0 : i32
    %c0_i32_0 = arith.constant 0 : i32
    %c0_i32_1 = arith.constant 0 : i32
    return %c0_i32, %c0_i32_0 : i32, i32
  }
  func.func @transform_8(%arg0: i32) -> (i32, i32) {
    %c0_i32 = arith.constant 0 : i32
    %c0_i32_0 = arith.constant 0 : i32
    %c0_i32_1 = arith.constant 0 : i32
    return %c0_i32, %c0_i32_0 : i32, i32
  }
  func.func @transform_9(%arg0: i32) -> (i32, i32) {
    %c0_i32 = arith.constant 0 : i32
    %c0_i32_0 = arith.constant 0 : i32
    %c0_i32_1 = arith.constant 0 : i32
    return %c0_i32, %c0_i32_0 : i32, i32
  }
  func.func @transform_10(%arg0: i32) -> (i32, i32) {
    %c0_i32 = arith.constant 0 : i32
    %c0_i32_0 = arith.constant 0 : i32
    %c0_i32_1 = arith.constant 0 : i32
    return %c0_i32, %c0_i32_0 : i32, i32
  }
  func.func @transform_11(%arg0: i32) -> (i32, i32) {
    %c0_i32 = arith.constant 0 : i32
    %c0_i32_0 = arith.constant 0 : i32
    %c0_i32_1 = arith.constant 0 : i32
    return %c0_i32, %c0_i32_0 : i32, i32
  }
  func.func @transform_12(%arg0: i32) -> (i32, i32) {
    %c0_i32 = arith.constant 0 : i32
    %c0_i32_0 = arith.constant 0 : i32
    %c0_i32_1 = arith.constant 0 : i32
    return %c0_i32, %c0_i32_0 : i32, i32
  }
  func.func @transform_13(%arg0: i32) -> (i32, i32) {
    %c0_i32 = arith.constant 0 : i32
    %c0_i32_0 = arith.constant 0 : i32
    %c0_i32_1 = arith.constant 0 : i32
    return %c0_i32, %c0_i32_0 : i32, i32
  }
  func.func @transform_14(%arg0: i32) -> (i32, i32) {
    %c0_i32 = arith.constant 0 : i32
    %c0_i32_0 = arith.constant 0 : i32
    %c0_i32_1 = arith.constant 0 : i32
    return %c0_i32, %c0_i32_0 : i32, i32
  }
  func.func @transform_15(%arg0: i32) -> (i32, i32) {
    %c0_i32 = arith.constant 0 : i32
    %c0_i32_0 = arith.constant 0 : i32
    %c0_i32_1 = arith.constant 0 : i32
    return %c0_i32, %c0_i32_0 : i32, i32
  }
  func.func @transform_16(%arg0: i32) -> (i32, i32) {
    %c0_i32 = arith.constant 0 : i32
    %c0_i32_0 = arith.constant 0 : i32
    %c0_i32_1 = arith.constant 0 : i32
    return %c0_i32, %c0_i32_0 : i32, i32
  }
  func.func @transform_17(%arg0: i32) -> (i32, i32) {
    %c0_i32 = arith.constant 0 : i32
    %c0_i32_0 = arith.constant 0 : i32
    %c0_i32_1 = arith.constant 0 : i32
    return %c0_i32, %c0_i32_0 : i32, i32
  }
  func.func @transform_18(%arg0: i32) -> (i32, i32, i32) {
    %c0_i32 = arith.constant 0 : i32
    %c0_i32_0 = arith.constant 0 : i32
    %c0_i32_1 = arith.constant 0 : i32
    return %arg0, %c0_i32, %c0_i32_0 : i32, i32, i32
  }
}

</mosaic_0001>

<bundles_post_ra>
// kernel: resmlp_forward.1
= control target key start
LH: loop header
LB: loop body
LE: loop exit
PB: predicated region body
PF: predicated region fallthrough
CT: control target
= control target key end

     0   :  { %s8775_s0 = inlined_call_operand.vmem [shape: f32[2,256,32], index: 0, kind: input, shape index: {}]   ;;  %s8776_s1 = inlined_call_operand.vmem [shape: f32[1,32], index: 1, kind: input, shape index: {}]   ;;  %s8777_s2 = inlined_call_operand.vmem [shape: f32[1,32], index: 2, kind: input, shape index: {}]   ;;  %s8778_s3 = inlined_call_operand.hbm [shape: f32[4,64,256], index: 3, kind: input, shape index: {}]   ;;  %s8779_s4 = inlined_call_operand.vmem [shape: f32[4,32,128], index: 4, kind: input, shape index: {}]   ;;  %s8780_s5 = inlined_call_operand.vmem [shape: f32[1,128], index: 5, kind: input, shape index: {}]   ;;  %s8781_s6 = inlined_call_operand.vmem [shape: f32[1,128], index: 6, kind: input, shape index: {}]   ;;  %s8782_s7 = inlined_call_operand.vmem [shape: f32[1,128], index: 7, kind: input, shape index: {}]   ;;  %s8783_s8 = inlined_call_operand.vmem [shape: f32[64,64], index: 8, kind: input, shape index: {}]   ;;  %s8784_s9 = inlined_call_operand.vmem [shape: f32[64,1], index: 9, kind: input, shape index: {}]   ;;  %s8785_s10 = inlined_call_operand.vmem [shape: f32[1,128], index: 10, kind: input, shape index: {}]   ;;  %s8786_s11 = inlined_call_operand.vmem [shape: f32[1,128], index: 11, kind: input, shape index: {}]   ;;  %s8787_s12 = inlined_call_operand.vmem [shape: f32[128,512], index: 12, kind: input, shape index: {}]   ;;  %s8788_s13 = inlined_call_operand.vmem [shape: f32[1,512], index: 13, kind: input, shape index: {}]   ;;  %s8789_s14 = inlined_call_operand.hbm [shape: f32[512,128], index: 14, kind: input, shape index: {}]   ;;  %s8790_s15 = inlined_call_operand.vmem [shape: f32[1,128], index: 15, kind: input, shape index: {}]   ;;  %s8791_s16 = inlined_call_operand.vmem [shape: f32[1,128], index: 16, kind: input, shape index: {}]   ;;  %s8792_s17 = inlined_call_operand.vmem [shape: f32[1,128], index: 17, kind: input, shape index: {}]   ;;  %s8793_s18 = inlined_call_operand.hbm [shape: f32[2,64,128], index: 18, kind: output, shape index: {}]  }
   0x1   :  { %8819 = sst [smem:[#allocation55_spill]] %s8775_s0 }
   0x2   :  { %8820 = sst [smem:[#allocation56_spill]] %s8776_s1 }
   0x3   :  { %8821 = sst [smem:[#allocation57_spill]] %s8777_s2 }
   0x4   :  { %8822 = sst [smem:[#allocation58_spill]] %s8778_s3 }
   0x5   :  { %8823 = sst [smem:[#allocation59_spill]] %s8779_s4 }
   0x6   :  { %8824 = sst [smem:[#allocation60_spill]] %s8780_s5 }
   0x7   :  { %8825 = sst [smem:[#allocation61_spill]] %s8781_s6 }
   0x8   :  { %23 = vsyncpa [#allocation3], 0 }
   0x9   :  { %24 = vsyncpa [#allocation6], 0 }
   0xa   :  { %25 = vsyncpa [#allocation4], 0 }
   0xb   :  { %27 = vsyncpa [#allocation4 + $0x1], 0  ;;  %s4926_s27 = smov 0   ;;  %s4928_s28 = smov 0  }
   0xc   :  { %s4930_s29 = smov 0   ;;  %s4932_s30 = smov 0  }
   0xd LB: > { %8826 = sst [smem:[#allocation11_spill]] %s4807_s27  ;;  %s4947_s0 = sadd.s32 4294967295, %s4819_s30   ;;  %s4819_s30 = sphi %s4932_s30, %s9095_s30   ;;  %s4815_s29 = sphi %s4930_s29, %s9097_s29   ;;  %s4811_s28 = sphi %s4928_s28, %s9099_s28   ;;  %s4807_s27 = sphi %s4926_s27, %s9098_s27  }
   0xe   : > { %8827 = sst [smem:[#allocation12_spill]] %s4815_s29  ;;  %s4322_s19 = sadd.s32 4294967294, %s4819_s30  }
   0xf   : > { %8828 = sst [smem:[#allocation13_spill]] %s4819_s30  ;;  %s4951_s1 = sadd.s32 1, %s4819_s30  }
  0x10   : > { %8829 = sst [smem:[#allocation14_spill]] %s4951_s1  ;;  %s423_s20 = sadd.s32 1, %s4815_s29 }
  0x11   : > { %s420_s21 = ssub.s32 %s4819_s30, %s4951_s1  ;;  %p433_p0 = scmp.ne.s32.totalorder %s4815_s29, %s4811_s28 }
  0x12   : > { %p421_p1 = scmp.eq.s32.totalorder %s420_s21, 0  ;;  %p434_p2 = scmp.eq.s32.totalorder %s4947_s0, 1 }
  0x13   : > { %p439_p3 = scmp.ne.s32.totalorder %s4811_s28, %s4807_s27  ;;  %p440_p4 = scmp.eq.s32.totalorder %s4322_s19, 1 }
  0x14   : > { %s4962_s22 = scalar_select %p421_p1, %s4815_s29, %s423_s20  }
  0x15   : > { %p4964_p5 = por %p434_p2, %p433_p0  ;;  %p4968_p6 = por %p440_p4, %p439_p3 }
  0x16   : > { %8830 = sst [smem:[#allocation15_spill]] %s4962_s22  ;;  %p4323_p7 = scmp.ge.s32.totalorder %s4819_s30, 1 }
  0x17   : > { %s8832_s23 = scalar_select %p4968_p6, 1, 0 }
  0x18   : > { %p447_p8 = scmp.lt.s32.totalorder %s4819_s30, 3  ;;  %p4485_p9 = scmp.eq.s32.totalorder %s4947_s0, 0 }
  0x19   : > { %8833 = sst [smem:[#allocation16_spill]] %s8832_s23  ;;  %s4821_s20 = smov [#allocation2]  }
  0x1a   : > { %p4975_p10 = pnand %p4323_p7, %p447_p8  ;;  %s8835_s3 = sld [smem:[#allocation58_spill]] }
  0x1b   : > { %s466_s21 = sshll.u32 %s4821_s20, 4  ;;  %s508_s1 = sshll.u32 %s8789_s14, 4  ;;  %s467_s21 = int_to_ptr.vmem [resolvable:$true] %s466_s21  ;;  %s509_s1 = int_to_ptr.hbm [resolvable:$true] %s508_s1 }
  0x1c   : > { %p4474_p11 = pneg %p4975_p10  ;;  %s4822_s23 = smov 256  }
  0x1d   : > { %s4823_s27 = smov 16   ;;  %s4824_s30 = smov [#allocation5]  }
  0x1e   : > { %p4475_p12 = pnand %p4485_p9, %p4474_p11  ;;  %s510_s25 = sshll.u32 %s4824_s30, 4  ;;  %s511_s25 = int_to_ptr.vmem [resolvable:$true] %s510_s25 }
  0x1f   : > { %s4825_s26 = smov 128   ;;  %543 = sbr.rel (%p4975_p10) target bundleno = 1729 (0x6c1), region = 92 }
  0x20   : > { %s464_s19 = sshll.u32 %s8835_s3, 4  ;;  %s4826_s3 = smov 8   ;;  %s465_s19 = int_to_ptr.hbm [resolvable:$true] %s464_s19 }
  0x21   : > { %4477 = dma.hbm_to_vmem [thread:$0]  (!%p4475_p12), %s465_s19, 8192, %s467_s21, [#allocation3], %s4822_s23, %s4822_s23, %s4823_s27  }
  0x22   : > { %4480 = dma.hbm_to_vmem [thread:$0]  (!%p4475_p12), %s509_s1, 8192, %s511_s25, [#allocation6], %s4825_s26, %s4825_s26, %s4826_s3  }
  0x24   : > { %4794 = dma.done.wait (%p4485_p9), [#allocation3], 8192  }
  0x25   : > { %4796 = vsyncadd (%p4485_p9), [#allocation3], 4294959104 }
  0x26   : > { %4798 = dma.done.wait (%p4485_p9), [#allocation6], 8192  }
  0x27   : > { %4800 = vsyncadd (%p4485_p9), [#allocation6], 4294959104  ;;  %p603_p13 = scmp.lt.s32.totalorder %s4947_s0, 1  ;;  %s8836_s1 = sld [smem:[#allocation55_spill]]  ;;  %vm640_vm0 = vcmask 261120  }
  0x28   : > { %s8839_s19 = sld [smem:[#allocation56_spill]]  ;;  %s600_s29 = sand.u32 1, %s4811_s28  }
  0x29   : > { %s604_s27 = scalar_select %p603_p13, %s4947_s0, 1 }
  0x2a   : > { %s8842_s25 = sld [smem:[#allocation57_spill]]  ;;  %s4423_s24 = sshll.u32 %s4947_s0, 6 }
  0x2b   : > { %s4422_s3 = sshll.u32 %s604_s27, 8  ;;  %s8897_s4 = sld [smem:[#allocation59_spill]] }
  0x2c   : > { %s8898_s5 = sld [smem:[#allocation60_spill]]  ;;  %s4234_s26 = scalar_lea.hbm %s8793_s18, %s4423_s24 }
  0x2d   : > { %s5004_s22 = scalar_lea.vmem %s8836_s1, %s4422_s3  ;;  %s8899_s6 = sld [smem:[#allocation61_spill]] }
  0x2e   : > { %v5007_v0 = vld [vmem:[%s5004_s22 + $0x78] sm:$0xff]  ;;  %v5010_v1 = vld [vmem:[%s5004_s22 + $0x70] sm:$0xff]  ;;  %v5013_v2 = vld [vmem:[%s5004_s22 + $0x68] sm:$0xff]  ;;  %s4237_s3 = sshll.u32 %s4234_s26, 4  ;;  %s4223_s0 = scalar_lea.sflag [#allocation4], %s600_s29  ;;  %s4238_s3 = int_to_ptr.hbm [resolvable:$true] %s4237_s3 }
  0x2f   : > { %v686_v3 = vsel %vm640_vm0, %v5007_v0, 0.0  ;;  %v683_v4 = vsel %vm640_vm0, %v5010_v1, 0.0  ;;  %v680_v5 = vsel %vm640_vm0, %v5013_v2, 0.0  ;;  %v5022_v6 = vld [vmem:[%s5004_s22 + $0xf8] sm:$0xff]  ;;  %v5025_v7 = vld [vmem:[%s5004_s22 + $0xf0] sm:$0xff]  ;;  %v5028_v8 = vld [vmem:[%s5004_s22 + $0xe8] sm:$0xff] }
  0x30   : > { %687 = vadd.xlane.f32.xlu0 %v686_v3  ;;  %684 = vadd.xlane.f32.xlu1 %v683_v4  ;;  %v734_v9 = vsel %vm640_vm0, %v5022_v6, 0.0  ;;  %v731_v10 = vsel %vm640_vm0, %v5025_v7, 0.0  ;;  %v728_v11 = vsel %vm640_vm0, %v5028_v8, 0.0  ;;  %v5037_v12 = vld [vmem:[%s5004_s22 + $0x60] sm:$0xff]  ;;  %v5043_v14 = vld [vmem:[%s5004_s22 + $0x58] sm:$0xff]  ;;  %v5055_v19 = vld [vmem:[%s5004_s22 + $0x50] sm:$0xff] }
  0x31   : > { %681 = vadd.xlane.f32.xlu2 %v680_v5  ;;  %v5040_v13 = vld [vmem:[%s5004_s22 + $0xe0] sm:$0xff]  ;;  %v677_v15 = vsel %vm640_vm0, %v5037_v12, 0.0  ;;  %v674_v17 = vsel %vm640_vm0, %v5043_v14, 0.0  ;;  %v5052_v18 = vld [vmem:[%s5004_s22 + $0xd8] sm:$0xff]  ;;  %v5058_v20 = vld [vmem:[%s5004_s22 + $0xd0] sm:$0xff]  ;;  %v671_v22 = vsel %vm640_vm0, %v5055_v19, 0.0 }
  0x32   : > { %v725_v16 = vsel %vm640_vm0, %v5040_v13, 0.0  ;;  %v722_v21 = vsel %vm640_vm0, %v5052_v18, 0.0  ;;  %v719_v23 = vsel %vm640_vm0, %v5058_v20, 0.0  ;;  %v5067_v24 = vld [vmem:[%s5004_s22 + $0x48] sm:$0xff]  ;;  %v5073_v26 = vld [vmem:[%s5004_s22 + $0x40] sm:$0xff]  ;;  %v5085_v31 = vld [vmem:[%s5004_s22 + $0x38] sm:$0xff] }
  0x33   : > { %v5070_v25 = vld [vmem:[%s5004_s22 + $0xc8] sm:$0xff]  ;;  %v668_v27 = vsel %vm640_vm0, %v5067_v24, 0.0  ;;  %v665_v29 = vsel %vm640_vm0, %v5073_v26, 0.0  ;;  %v5082_v30 = vld [vmem:[%s5004_s22 + $0xc0] sm:$0xff]  ;;  %v5088_v32 = vld [vmem:[%s5004_s22 + $0xb8] sm:$0xff]  ;;  %v662_v34 = vsel %vm640_vm0, %v5085_v31, 0.0 }
  0x34   : > { %v716_v28 = vsel %vm640_vm0, %v5070_v25, 0.0  ;;  %v713_v33 = vsel %vm640_vm0, %v5082_v30, 0.0  ;;  %v710_v35 = vsel %vm640_vm0, %v5088_v32, 0.0  ;;  %v5097_v36 = vld [vmem:[%s5004_s22 + $0x30] sm:$0xff]  ;;  %v5103_v38 = vld [vmem:[%s5004_s22 + $0x28] sm:$0xff]  ;;  %v5115_v43 = vld [vmem:[%s5004_s22 + $0x20] sm:$0xff] }
  0x35   : > { %v5100_v37 = vld [vmem:[%s5004_s22 + $0xb0] sm:$0xff]  ;;  %v659_v39 = vsel %vm640_vm0, %v5097_v36, 0.0  ;;  %v656_v41 = vsel %vm640_vm0, %v5103_v38, 0.0  ;;  %v5112_v42 = vld [vmem:[%s5004_s22 + $0xa8] sm:$0xff]  ;;  %v5118_v44 = vld [vmem:[%s5004_s22 + $0xa0] sm:$0xff]  ;;  %v653_v46 = vsel %vm640_vm0, %v5115_v43, 0.0 }
  0x36   : > { %v707_v40 = vsel %vm640_vm0, %v5100_v37, 0.0  ;;  %v704_v45 = vsel %vm640_vm0, %v5112_v42, 0.0  ;;  %v701_v47 = vsel %vm640_vm0, %v5118_v44, 0.0  ;;  %v5127_v48 = vld [vmem:[%s5004_s22 + $0x18] sm:$0xff]  ;;  %v5133_v50 = vld [vmem:[%s5004_s22 + $0x10] sm:$0xff]  ;;  %v5145_v55 = vld [vmem:[%s5004_s22 + $0x8] sm:$0xff] }
  0x37   : > { %v5130_v49 = vld [vmem:[%s5004_s22 + $0x98] sm:$0xff]  ;;  %v650_v51 = vsel %vm640_vm0, %v5127_v48, 0.0  ;;  %v647_v53 = vsel %vm640_vm0, %v5133_v50, 0.0  ;;  %v5142_v54 = vld [vmem:[%s5004_s22 + $0x90] sm:$0xff]  ;;  %v5148_v56 = vld [vmem:[%s5004_s22 + $0x88] sm:$0xff]  ;;  %v644_v58 = vsel %vm640_vm0, %v5145_v55, 0.0 }
  0x38   : > { %735 = vadd.xlane.f32.xlu0 %v734_v9  ;;  %732 = vadd.xlane.f32.xlu1 %v731_v10  ;;  %v698_v52 = vsel %vm640_vm0, %v5130_v49, 0.0  ;;  %v695_v57 = vsel %vm640_vm0, %v5142_v54, 0.0  ;;  %v692_v59 = vsel %vm640_vm0, %v5148_v56, 0.0  ;;  %v5157_v60 = vld [vmem:[%s5004_s22] sm:$0xff]  ;;  %v4827_v3 = vmov 32.0   ;;  %s4763_s30 = sshra.s32 %s4238_s3, 4  ;;  %s4764_s30 = int_to_ptr.hbm [resolvable:$true] %s4763_s30 }
  0x39   : > { %729 = vadd.xlane.f32.xlu2 %v728_v11  ;;  %v5160_v61 = vld [vmem:[%s5004_s22 + $0x80] sm:$0xff]  ;;  %v641_v62 = vsel %vm640_vm0, %v5157_v60, 0.0  ;;  %4545 = vrcp.f32 %v4827_v3  ;;  %s4330_s22 = sshll.u32 %s600_s29, 6  ;;  %s4765_s1 = scalar_lea.hbm %s4764_s30, 64 }
  0x3a   : > { %v689_v63 = vsel %vm640_vm0, %v5160_v61, 0.0  ;;  %s8703_s23 = scalar_lea.vmem [#allocation7], %s4330_s22  ;;  %p4766_p0 = scmp.ne.s32.totalorder %s4764_s30, %s4765_s1 }
  0x3b   : > { %s4235_s27 = sshll.u32 %s8703_s23, 4  ;;  %s4769_s20 = scalar_lea.hbm %s8793_s18, 128  ;;  %s4236_s27 = int_to_ptr.vmem [resolvable:$true] %s4235_s27 }
  0x3c   : > { %p4767_p1 = pnand %p4766_p0, %p4964_p5  ;;  %p4770_p3 = scmp.lt.s32.totalorder %s4764_s30, %s8793_s18 }
  0x3d   : > { %p4771_p4 = scmp.lt.s32.totalorder %s4769_s20, %s4765_s1 }
  0x3e   : > { %p4768_p2 = pneg %p4767_p1 }
  0x3f   : > { %v4546_v4 = vpop.eup %4545  ;;  %p4772_p7 = por %p4771_p4, %p4770_p3 }
  0x40   : > { %678 = vadd.xlane.f32.xlu0 %v677_v15  ;;  %726 = vadd.xlane.f32.xlu1 %v725_v16  ;;  %v738_v5 = vmul.f32 32.0, %v4546_v4  ;;  %vm742_vm1 = vweird.f32 %v4546_v4 }
  0x41   : > { %675 = vadd.xlane.f32.xlu2 %v674_v17  ;;  %p4773_p8 = pnand %p4772_p7, %p4768_p2 }
  0x42   : > { %v739_v9 = vsub.f32 1.0, %v738_v5 }
  0x44   : > { %v740_v10 = vmul.f32 %v4546_v4, %v739_v9 }
  0x46   : > { %v741_v11 = vadd.f32 %v4546_v4, %v740_v10 }
  0x48   : > { %723 = vadd.xlane.f32.xlu0 %v722_v21  ;;  %672 = vadd.xlane.f32.xlu1 %v671_v22  ;;  %v5166_v15 = vsel %vm742_vm1, %v4546_v4, %v741_v11 }
  0x49   : > { %720 = vadd.xlane.f32.xlu2 %v719_v23 }
  0x50   : > { %669 = vadd.xlane.f32.xlu0 %v668_v27  ;;  %717 = vadd.xlane.f32.xlu1 %v716_v28 }
  0x51   : > { %666 = vadd.xlane.f32.xlu2 %v665_v29 }
  0x58   : > { %714 = vadd.xlane.f32.xlu0 %v713_v33  ;;  %663 = vadd.xlane.f32.xlu1 %v662_v34 }
  0x59   : > { %711 = vadd.xlane.f32.xlu2 %v710_v35 }
  0x60   : > { %660 = vadd.xlane.f32.xlu0 %v659_v39  ;;  %708 = vadd.xlane.f32.xlu1 %v707_v40 }
  0x61   : > { %657 = vadd.xlane.f32.xlu2 %v656_v41 }
  0x68   : > { %705 = vadd.xlane.f32.xlu0 %v704_v45  ;;  %654 = vadd.xlane.f32.xlu1 %v653_v46 }
  0x69   : > { %702 = vadd.xlane.f32.xlu2 %v701_v47 }
  0x70   : > { %651 = vadd.xlane.f32.xlu0 %v650_v51  ;;  %699 = vadd.xlane.f32.xlu1 %v698_v52 }
  0x71   : > { %648 = vadd.xlane.f32.xlu2 %v647_v53 }
  0x78   : > { %696 = vadd.xlane.f32.xlu0 %v695_v57  ;;  %645 = vadd.xlane.f32.xlu1 %v644_v58 }
  0x79   : > { %693 = vadd.xlane.f32.xlu2 %v692_v59 }
  0x80   : > { %642 = vadd.xlane.f32.xlu0 %v641_v62  ;;  %690 = vadd.xlane.f32.xlu1 %v689_v63 }
  0xa3   : > { %v688_v16 = vpop.xlane.xlu0 %687  ;;  %v685_v17 = vpop.xlane.xlu1 %684 }
  0xa4   : > { %v759_v21 = vmul.f32 %v5166_v15, %v688_v16  ;;  %v758_v22 = vmul.f32 %v5166_v15, %v685_v17  ;;  %v682_v23 = vpop.xlane.xlu2 %681 }
  0xa5   : > { %v757_v46 = vmul.f32 %v5166_v15, %v682_v23 }
  0xa6   : > { %v5171_v27 = vsub.f32 %v5007_v0, %v759_v21  ;;  %v5174_v28 = vsub.f32 %v5010_v1, %v758_v22 }
  0xa7   : > { %v5202_v59 = vsub.f32 %v5013_v2, %v757_v46 }
  0xa8   : > { %v823_v29 = vmul.f32 %v5171_v27, %v5171_v27  ;;  %v822_v33 = vmul.f32 %v5174_v28, %v5174_v28 }
  0xa9   : > { %v821_v10 = vmul.f32 %v5202_v59, %v5202_v59 }
  0xaa   : > { %v885_v34 = vsel %vm640_vm0, %v823_v29, 0.0  ;;  %v882_v35 = vsel %vm640_vm0, %v822_v33, 0.0 }
  0xab   : > { %v736_v39 = vpop.xlane.xlu0 %735  ;;  %v733_v40 = vpop.xlane.xlu1 %732  ;;  %886 = vadd.xlane.f32.xlu2 %v885_v34  ;;  %883 = vadd.xlane.f32.xlu1 %v882_v35 }
  0xac   : > { %v775_v0 = vmul.f32 %v5166_v15, %v736_v39  ;;  %v774_v41 = vmul.f32 %v5166_v15, %v733_v40  ;;  %v730_v1 = vpop.xlane.xlu2 %729 }
  0xad   : > { %v773_v45 = vmul.f32 %v5166_v15, %v730_v1 }
  0xae   : > { %v5187_v47 = vsub.f32 %v5022_v6, %v775_v0  ;;  %v5190_v51 = vsub.f32 %v5025_v7, %v774_v41 }
  0xaf   : > { %v5193_v52 = vsub.f32 %v5028_v8, %v773_v45 }
  0xb0   : > { %v838_v53 = vmul.f32 %v5190_v51, %v5190_v51  ;;  %v839_v57 = vmul.f32 %v5187_v47, %v5187_v47 }
  0xb1   : > { %v837_v58 = vmul.f32 %v5193_v52, %v5193_v52 }
  0xb2   : > { %v930_v6 = vsel %vm640_vm0, %v838_v53, 0.0  ;;  %v933_v7 = vsel %vm640_vm0, %v839_v57, 0.0 }
  0xb3   : > { %v679_v62 = vpop.xlane.xlu0 %678  ;;  %931 = vadd.xlane.f32.xlu2 %v930_v6  ;;  %v927_v8 = vsel %vm640_vm0, %v837_v58, 0.0  ;;  %934 = vadd.xlane.f32.xlu0 %v933_v7  ;;  %v727_v63 = vpop.xlane.xlu1 %726 }
  0xb4   : > { %v756_v3 = vmul.f32 %v5166_v15, %v679_v62  ;;  %v676_v4 = vpop.xlane.xlu2 %675  ;;  %928 = vadd.xlane.f32.xlu1 %v927_v8  ;;  %v772_v5 = vmul.f32 %v5166_v15, %v727_v63 }
  0xb5   : > { %v755_v9 = vmul.f32 %v5166_v15, %v676_v4 }
  0xb6   : > { %v5211_v2 = vsub.f32 %v5037_v12, %v756_v3  ;;  %v5219_v16 = vsub.f32 %v5040_v13, %v772_v5  ;;  %v879_v12 = vsel %vm640_vm0, %v821_v10, 0.0 }
  0xb7   : > { %v5216_v11 = vsub.f32 %v5043_v14, %v755_v9 }
  0xb8   : > { %v820_v17 = vmul.f32 %v5211_v2, %v5211_v2  ;;  %v836_v35 = vmul.f32 %v5219_v16, %v5219_v16 }
  0xb9   : > { %v819_v21 = vmul.f32 %v5216_v11, %v5216_v11 }
  0xba   : > { %v876_v22 = vsel %vm640_vm0, %v820_v17, 0.0  ;;  %v924_v45 = vsel %vm640_vm0, %v836_v35, 0.0 }
  0xbb   : > { %v724_v23 = vpop.xlane.xlu0 %723  ;;  %877 = vadd.xlane.f32.xlu2 %v876_v22  ;;  %v873_v29 = vsel %vm640_vm0, %v819_v21, 0.0  ;;  %880 = vadd.xlane.f32.xlu0 %v879_v12  ;;  %v673_v14 = vpop.xlane.xlu1 %672 }
  0xbc   : > { %v771_v33 = vmul.f32 %v5166_v15, %v724_v23  ;;  %v721_v13 = vpop.xlane.xlu2 %720  ;;  %874 = vadd.xlane.f32.xlu1 %v873_v29  ;;  %v754_v34 = vmul.f32 %v5166_v15, %v673_v14 }
  0xbd   : > { %v770_v39 = vmul.f32 %v5166_v15, %v721_v13 }
  0xbe   : > { %v5234_v40 = vsub.f32 %v5052_v18, %v771_v33  ;;  %v5240_v41 = vsub.f32 %v5055_v19, %v754_v34 }
  0xbf   : > { %v5237_v0 = vsub.f32 %v5058_v20, %v770_v39 }
  0xc0   : > { %v835_v1 = vmul.f32 %v5234_v40, %v5234_v40  ;;  %v818_v7 = vmul.f32 %v5240_v41, %v5240_v41 }
  0xc1   : > { %v834_v46 = vmul.f32 %v5237_v0, %v5237_v0 }
  0xc2   : > { %v921_v53 = vsel %vm640_vm0, %v835_v1, 0.0  ;;  %v870_v5 = vsel %vm640_vm0, %v818_v7, 0.0 }
  0xc3   : > { %v670_v57 = vpop.xlane.xlu0 %669  ;;  %922 = vadd.xlane.f32.xlu2 %v921_v53  ;;  %v918_v18 = vsel %vm640_vm0, %v834_v46, 0.0  ;;  %925 = vadd.xlane.f32.xlu0 %v924_v45  ;;  %v718_v20 = vpop.xlane.xlu1 %717 }
  0xc4   : > { %v753_v58 = vmul.f32 %v5166_v15, %v670_v57  ;;  %v667_v19 = vpop.xlane.xlu2 %666  ;;  %919 = vadd.xlane.f32.xlu1 %v918_v18  ;;  %v769_v6 = vmul.f32 %v5166_v15, %v718_v20 }
  0xc5   : > { %v752_v62 = vmul.f32 %v5166_v15, %v667_v19 }
  0xc6   : > { %v5255_v8 = vsub.f32 %v5067_v24, %v753_v58  ;;  %v5261_v3 = vsub.f32 %v5070_v25, %v769_v6 }
  0xc7   : > { %v5258_v63 = vsub.f32 %v5073_v26, %v752_v62 }
  0xc8   : > { %v817_v4 = vmul.f32 %v5255_v8, %v5255_v8  ;;  %v833_v12 = vmul.f32 %v5261_v3, %v5261_v3 }
  0xc9   : > { %v816_v9 = vmul.f32 %v5258_v63, %v5258_v63 }
  0xca   : > { %v867_v10 = vsel %vm640_vm0, %v817_v4, 0.0  ;;  %v915_v34 = vsel %vm640_vm0, %v833_v12, 0.0 }
  0xcb   : > { %v715_v17 = vpop.xlane.xlu0 %714  ;;  %868 = vadd.xlane.f32.xlu2 %v867_v10  ;;  %v864_v24 = vsel %vm640_vm0, %v816_v9, 0.0  ;;  %871 = vadd.xlane.f32.xlu0 %v870_v5  ;;  %v664_v26 = vpop.xlane.xlu1 %663 }
  0xcc   : > { %v768_v21 = vmul.f32 %v5166_v15, %v715_v17  ;;  %v712_v25 = vpop.xlane.xlu2 %711  ;;  %865 = vadd.xlane.f32.xlu1 %v864_v24  ;;  %v751_v22 = vmul.f32 %v5166_v15, %v664_v26 }
  0xcd   : > { %v767_v23 = vmul.f32 %v5166_v15, %v712_v25 }
  0xce   : > { %v5276_v29 = vsub.f32 %v5082_v30, %v768_v21  ;;  %v5282_v33 = vsub.f32 %v5085_v31, %v751_v22 }
  0xcf   : > { %v5279_v14 = vsub.f32 %v5088_v32, %v767_v23 }
  0xd0   : > { %v832_v13 = vmul.f32 %v5276_v29, %v5276_v29  ;;  %v815_v53 = vmul.f32 %v5282_v33, %v5282_v33 }
  0xd1   : > { %v831_v35 = vmul.f32 %v5279_v14, %v5279_v14 }
  0xd2   : > { %v912_v39 = vsel %vm640_vm0, %v832_v13, 0.0  ;;  %v861_v6 = vsel %vm640_vm0, %v815_v53, 0.0 }
  0xd3   : > { %v661_v1 = vpop.xlane.xlu0 %660  ;;  %913 = vadd.xlane.f32.xlu2 %v912_v39  ;;  %v909_v30 = vsel %vm640_vm0, %v831_v35, 0.0  ;;  %916 = vadd.xlane.f32.xlu0 %v915_v34  ;;  %v709_v32 = vpop.xlane.xlu1 %708 }
  0xd4   : > { %v750_v45 = vmul.f32 %v5166_v15, %v661_v1  ;;  %v658_v31 = vpop.xlane.xlu2 %657  ;;  %910 = vadd.xlane.f32.xlu1 %v909_v30  ;;  %v766_v46 = vmul.f32 %v5166_v15, %v709_v32 }
  0xd5   : > { %v749_v57 = vmul.f32 %v5166_v15, %v658_v31 }
  0xd6   : > { %v5297_v18 = vsub.f32 %v5097_v36, %v750_v45  ;;  %v5303_v58 = vsub.f32 %v5100_v37, %v766_v46 }
  0xd7   : > { %v5300_v20 = vsub.f32 %v5103_v38, %v749_v57 }
  0xd8   : > { %v814_v19 = vmul.f32 %v5297_v18, %v5297_v18  ;;  %v830_v10 = vmul.f32 %v5303_v58, %v5303_v58 }
  0xd9   : > { %v813_v7 = vmul.f32 %v5300_v20, %v5300_v20 }
  0xda   : > { %v858_v62 = vsel %vm640_vm0, %v814_v19, 0.0  ;;  %v906_v22 = vsel %vm640_vm0, %v830_v10, 0.0 }
  0xdb   : > { %v706_v4 = vpop.xlane.xlu0 %705  ;;  %859 = vadd.xlane.f32.xlu2 %v858_v62  ;;  %v855_v36 = vsel %vm640_vm0, %v813_v7, 0.0  ;;  %862 = vadd.xlane.f32.xlu0 %v861_v6  ;;  %v655_v38 = vpop.xlane.xlu1 %654 }
  0xdc   : > { %v765_v5 = vmul.f32 %v5166_v15, %v706_v4  ;;  %v703_v37 = vpop.xlane.xlu2 %702  ;;  %856 = vadd.xlane.f32.xlu1 %v855_v36  ;;  %v748_v9 = vmul.f32 %v5166_v15, %v655_v38 }
  0xdd   : > { %v764_v17 = vmul.f32 %v5166_v15, %v703_v37 }
  0xde   : > { %v5318_v24 = vsub.f32 %v5112_v42, %v765_v5  ;;  %v5324_v21 = vsub.f32 %v5115_v43, %v748_v9 }
  0xdf   : > { %v5321_v26 = vsub.f32 %v5118_v44, %v764_v17 }
  0xe0   : > { %v829_v25 = vmul.f32 %v5318_v24, %v5318_v24  ;;  %v812_v39 = vmul.f32 %v5324_v21, %v5324_v21 }
  0xe1   : > { %v828_v12 = vmul.f32 %v5321_v26, %v5321_v26 }
  0xe2   : > { %v903_v23 = vsel %vm640_vm0, %v829_v25, 0.0  ;;  %v852_v46 = vsel %vm640_vm0, %v812_v39, 0.0 }
  0xe3   : > { %v652_v13 = vpop.xlane.xlu0 %651  ;;  %904 = vadd.xlane.f32.xlu2 %v903_v23  ;;  %v900_v42 = vsel %vm640_vm0, %v828_v12, 0.0  ;;  %907 = vadd.xlane.f32.xlu0 %v906_v22  ;;  %v700_v44 = vpop.xlane.xlu1 %699 }
  0xe4   : > { %v747_v34 = vmul.f32 %v5166_v15, %v652_v13  ;;  %v649_v43 = vpop.xlane.xlu2 %648  ;;  %901 = vadd.xlane.f32.xlu1 %v900_v42  ;;  %v763_v35 = vmul.f32 %v5166_v15, %v700_v44 }
  0xe5   : > { %v746_v1 = vmul.f32 %v5166_v15, %v649_v43 }
  0xe6   : > { %v5339_v30 = vsub.f32 %v5127_v48, %v747_v34  ;;  %v5345_v45 = vsub.f32 %v5130_v49, %v763_v35 }
  0xe7   : > { %v5342_v32 = vsub.f32 %v5133_v50, %v746_v1 }
  0xe8   : > { %v811_v31 = vmul.f32 %v5339_v30, %v5339_v30  ;;  %v827_v62 = vmul.f32 %v5345_v45, %v5345_v45 }
  0xe9   : > { %v810_v53 = vmul.f32 %v5342_v32, %v5342_v32 }
  0xea   : > { %v849_v57 = vsel %vm640_vm0, %v811_v31, 0.0  ;;  %v897_v9 = vsel %vm640_vm0, %v827_v62, 0.0 }
  0xeb   : > { %v697_v19 = vpop.xlane.xlu0 %696  ;;  %850 = vadd.xlane.f32.xlu2 %v849_v57  ;;  %v846_v48 = vsel %vm640_vm0, %v810_v53, 0.0  ;;  %853 = vadd.xlane.f32.xlu0 %v852_v46  ;;  %v646_v50 = vpop.xlane.xlu1 %645 }
  0xec   : > { %v762_v6 = vmul.f32 %v5166_v15, %v697_v19  ;;  %v694_v49 = vpop.xlane.xlu2 %693  ;;  %847 = vadd.xlane.f32.xlu1 %v846_v48  ;;  %v745_v7 = vmul.f32 %v5166_v15, %v646_v50 }
  0xed   : > { %v761_v4 = vmul.f32 %v5166_v15, %v694_v49 }
  0xee   : > { %v5360_v36 = vsub.f32 %v5142_v54, %v762_v6  ;;  %v5368_v37 = vsub.f32 %v5145_v55, %v745_v7 }
  0xef   : > { %v5363_v38 = vsub.f32 %v5148_v56, %v761_v4 }
  0xf0   : > { %v826_v5 = vmul.f32 %v5360_v36, %v5360_v36  ;;  %8837 = vst [vmem:[#allocation17_spill] sm:$0xff] %v5368_v37  ;;  %v809_v55 = vmul.f32 %v5368_v37, %v5368_v37 }
  0xf1   : > { %v825_v10 = vmul.f32 %v5363_v38, %v5363_v38 }
  0xf2   : > { %v894_v17 = vsel %vm640_vm0, %v826_v5, 0.0  ;;  %v843_v42 = vsel %vm640_vm0, %v809_v55, 0.0 }
  0xf3   : > { %895 = vadd.xlane.f32.xlu2 %v894_v17  ;;  %v891_v54 = vsel %vm640_vm0, %v825_v10, 0.0  ;;  %898 = vadd.xlane.f32.xlu0 %v897_v9  ;;  %v643_v25 = vpop.xlane.xlu0 %642  ;;  %v691_v56 = vpop.xlane.xlu1 %690 }
  0xf4   : > { %892 = vadd.xlane.f32.xlu1 %v891_v54  ;;  %v744_v22 = vmul.f32 %v5166_v15, %v643_v25  ;;  %v760_v12 = vmul.f32 %v5166_v15, %v691_v56 }
  0xf6   : > { %v5380_v23 = vsub.f32 %v5157_v60, %v744_v22  ;;  %v5383_v13 = vsub.f32 %v5160_v61, %v760_v12 }
  0xf8   : > { %8838 = vst [vmem:[#allocation18_spill] sm:$0xff] %v5383_v13  ;;  %v808_v44 = vmul.f32 %v5380_v23, %v5380_v23  ;;  %v824_v43 = vmul.f32 %v5383_v13, %v5383_v13 }
  0xfa   : > { %v840_v34 = vsel %vm640_vm0, %v808_v44, 0.0  ;;  %v888_v35 = vsel %vm640_vm0, %v824_v43, 0.0 }
  0xfb   : > { %844 = vadd.xlane.f32.xlu0 %v843_v42  ;;  %841 = vadd.xlane.f32.xlu2 %v840_v34 }
 0x103   : > { %889 = vadd.xlane.f32.xlu0 %v888_v35 }
 0x11e   : > { %v887_v60 = vpop.xlane.xlu2 %886  ;;  %v884_v39 = vpop.xlane.xlu1 %883 }
 0x11f   : > { %v951_v61 = vmul.f32 %v887_v60, %v5166_v15  ;;  %v950_v1 = vmul.f32 %v884_v39, %v5166_v15 }
 0x121   : > { %v983_v31 = vadd.f32 1e-06, %v951_v61  ;;  %v982_v46 = vadd.f32 1e-06, %v950_v1 }
 0x123   : > { %4547 = vrsqrt.f32 %v983_v31  ;;  %vm1156_vm3 = vweird.f32 %v983_v31  ;;  %vm1146_vm4 = vweird.f32 %v982_v46 }
 0x124   : > { %4549 = vrsqrt.f32 %v982_v46 }
 0x126   : > { %v932_v53 = vpop.xlane.xlu2 %931  ;;  %v935_v57 = vpop.xlane.xlu0 %934 }
 0x127   : > { %v966_v19 = vmul.f32 %v932_v53, %v5166_v15  ;;  %v929_v48 = vpop.xlane.xlu1 %928  ;;  %v967_v50 = vmul.f32 %v935_v57, %v5166_v15 }
 0x128   : > { %v965_v6 = vmul.f32 %v929_v48, %v5166_v15 }
 0x129   : > { %v4548_v49 = vpop.eup %4547  ;;  %v5397_v7 = vadd.f32 1e-06, %v966_v19  ;;  %v5399_v62 = vadd.f32 1e-06, %v967_v50 }
 0x12a   : > { %v4550_v4 = vpop.eup %4549  ;;  %v1151_v5 = vmul.f32 %v4548_v49, %v983_v31  ;;  %v5401_v9 = vadd.f32 1e-06, %v965_v6  ;;  %vm1157_vm2 = vweird.f32 %v4548_v49  ;;  %v5429_v6 = vld [vmem:[%s8839_s19] ss:$0 sm:$0xff] }
 0x12b   : > { %v1141_v10 = vmul.f32 %v4550_v4, %v982_v46  ;;  %4551 = vrsqrt.f32 %v5397_v7  ;;  %vm1147_vm5 = vweird.f32 %v4550_v4  ;;  %vm1158_vm6 = vmor %vm1156_vm3, %vm1157_vm2  ;;  %vm1306_vm8 = vweird.f32 %v5397_v7 }
 0x12c   : > { %v1152_v17 = vmul.f32 %v4548_v49, %v1151_v5  ;;  %4553 = vrsqrt.f32 %v5401_v9  ;;  %vm5436_vm7 = vmor %vm1146_vm4, %vm1147_vm5  ;;  %vm1296_vm9 = vweird.f32 %v5401_v9  ;;  %vm1316_vm11 = vweird.f32 %v5399_v62 }
 0x12d   : > { %v1142_v54 = vmul.f32 %v4550_v4, %v1141_v10  ;;  %4555 = vrsqrt.f32 %v5399_v62 }
 0x12e   : > { %v1153_v25 = vmul.f32 0.5, %v1152_v17  ;;  %v878_v56 = vpop.xlane.xlu2 %877  ;;  %v881_v22 = vpop.xlane.xlu0 %880 }
 0x12f   : > { %v1143_v12 = vmul.f32 0.5, %v1142_v54  ;;  %v948_v55 = vmul.f32 %v878_v56, %v5166_v15  ;;  %v875_v42 = vpop.xlane.xlu1 %874  ;;  %v949_v44 = vmul.f32 %v881_v22, %v5166_v15 }
 0x130   : > { %v1154_v34 = vsub.f32 1.5, %v1153_v25  ;;  %v947_v43 = vmul.f32 %v875_v42, %v5166_v15 }
 0x131   : > { %v5409_v35 = vpop.eup %4551  ;;  %v1144_v60 = vsub.f32 1.5, %v1143_v12  ;;  %v5411_v39 = vadd.f32 1e-06, %v948_v55  ;;  %v5424_v50 = vadd.f32 1e-06, %v949_v44 }
 0x132   : > { %v5413_v61 = vpop.eup %4553  ;;  %v1155_v1 = vmul.f32 %v4548_v49, %v1154_v34  ;;  %v1301_v53 = vmul.f32 %v5409_v35, %v5397_v7  ;;  %v5417_v57 = vadd.f32 1e-06, %v947_v43  ;;  %v5451_v34 = vld [vmem:[%s8842_s25] ss:$0 sm:$0xff]  ;;  %vm1307_vm10 = vweird.f32 %v5409_v35 }
 0x133   : > { %v5419_v19 = vpop.eup %4555  ;;  %v1145_v48 = vmul.f32 %v4550_v4, %v1144_v60  ;;  %v1291_v31 = vmul.f32 %v5413_v61, %v5401_v9  ;;  %4557 = vrsqrt.f32 %v5411_v39  ;;  %vm1297_vm13 = vweird.f32 %v5413_v61  ;;  %vm5493_vm14 = vmor %vm1306_vm8, %vm1307_vm10 }
 0x134   : > { %v1159_v5 = vsel %vm1158_vm6, %v4548_v49, %v1155_v1  ;;  %v1302_v10 = vmul.f32 %v5409_v35, %v1301_v53  ;;  %v1311_v17 = vmul.f32 %v5419_v19, %v5399_v62  ;;  %4559 = vrsqrt.f32 %v5417_v57  ;;  %vm5528_vm3 = vmor %vm1296_vm9, %vm1297_vm13 }
 0x135   : > { %v1335_v54 = vmul.f32 %v1159_v5, %v5171_v27  ;;  %v1149_v49 = vsel %vm5436_vm7, %v4550_v4, %v1145_v48  ;;  %v1292_v42 = vmul.f32 %v5413_v61, %v1291_v31  ;;  %4561 = vrsqrt.f32 %v5424_v50 }
 0x136   : > { %v1303_v56 = vmul.f32 0.5, %v1302_v10  ;;  %v1312_v22 = vmul.f32 %v5419_v19, %v1311_v17  ;;  %v923_v12 = vpop.xlane.xlu2 %922  ;;  %v926_v55 = vpop.xlane.xlu0 %925  ;;  %v1334_v48 = vmul.f32 %v1149_v49, %v5174_v28  ;;  %vm1317_vm12 = vweird.f32 %v5419_v19 }
 0x137   : > { %v920_v27 = vpop.xlane.xlu1 %919  ;;  %v1371_v46 = vmul.f32 %v5429_v6, %v1335_v54  ;;  %v963_v4 = vmul.f32 %v923_v12, %v5166_v15  ;;  %v964_v53 = vmul.f32 %v926_v55, %v5166_v15  ;;  %v1293_v10 = vmul.f32 0.5, %v1292_v42  ;;  %vm5504_vm1 = vmor %vm1316_vm11, %vm1317_vm12 }
 0x138   : > { %v1313_v44 = vmul.f32 0.5, %v1312_v22  ;;  %v1304_v60 = vsub.f32 1.5, %v1303_v56  ;;  %v962_v1 = vmul.f32 %v920_v27, %v5166_v15  ;;  %v1370_v27 = vmul.f32 %v5429_v6, %v1334_v48 }
 0x139   : > { %v5453_v43 = vpop.eup %4557  ;;  %v5464_v17 = vadd.f32 1e-06, %v963_v4  ;;  %v5473_v56 = vadd.f32 %v5451_v34, %v1371_v46  ;;  %v5481_v42 = vadd.f32 1e-06, %v964_v53  ;;  %v1294_v4 = vsub.f32 1.5, %v1293_v10 }
 0x13a   : > { %v1314_v31 = vsub.f32 1.5, %v1313_v44  ;;  %v1121_v5 = vmul.f32 %v5453_v43, %v5411_v39  ;;  %v5466_v54 = vpop.eup %4559  ;;  %v5470_v28 = vadd.f32 1e-06, %v962_v1  ;;  %v1305_v12 = vmul.f32 %v5409_v35, %v1304_v60 }
 0x13b   : > { %8843 = vst [vmem:[#allocation19_spill] sm:$0xff] %v5473_v56  ;;  %v5475_v22 = vpop.eup %4561  ;;  %v1111_v49 = vmul.f32 %v5466_v54, %v5417_v57  ;;  %1440 = vmatpush.msra.mxu0 %v5473_v56  ;;  %1543 = vmatpush.msra.mxu2 %v5473_v56  ;;  %vm1126_vm15 = vweird.f32 %v5411_v39  ;;  %4563 = vrsqrt.f32 %v5464_v17  ;;  %vm1127_vm2 = vweird.f32 %v5453_v43 }
 0x13c   : > { %v1122_v25 = vmul.f32 %v5453_v43, %v1121_v5  ;;  %v1315_v55 = vmul.f32 %v5419_v19, %v1314_v31  ;;  %v1131_v46 = vmul.f32 %v5475_v22, %v5424_v50  ;;  %4565 = vrsqrt.f32 %v5470_v28  ;;  %vm5540_vm5 = vmor %vm1126_vm15, %vm1127_vm2 }
 0x13d   : > { %v1112_v1 = vmul.f32 %v5466_v54, %v1111_v49  ;;  %4567 = vrsqrt.f32 %v5481_v42  ;;  %v1295_v37 = vmul.f32 %v5413_v61, %v1294_v4  ;;  %vm1116_vm4 = vweird.f32 %v5417_v57 }
 0x13e   : > { %v1123_v44 = vmul.f32 0.5, %v1122_v25  ;;  %v869_v53 = vpop.xlane.xlu2 %868  ;;  %v1132_v31 = vmul.f32 %v5475_v22, %v1131_v46  ;;  %v872_v10 = vpop.xlane.xlu0 %871  ;;  %v1309_v25 = vsel %vm5493_vm14, %v5409_v35, %v1305_v12  ;;  %v1319_v62 = vsel %vm5504_vm1, %v5419_v19, %v1315_v55 }
 0x13f   : > { %v866_v5 = vpop.xlane.xlu1 %865  ;;  %v1113_v49 = vmul.f32 0.5, %v1112_v1  ;;  %v5520_v46 = vadd.f32 %v5451_v34, %v1370_v27  ;;  %v945_v13 = vmul.f32 %v869_v53, %v5166_v15  ;;  %v946_v12 = vmul.f32 %v872_v10, %v5166_v15 }
 0x140   : > { %v1124_v7 = vsub.f32 1.5, %v1123_v44  ;;  %v1133_v56 = vmul.f32 0.5, %v1132_v31  ;;  %v944_v19 = vmul.f32 %v866_v5, %v5166_v15  ;;  %v1351_v55 = vmul.f32 %v1319_v62, %v5187_v47 }
 0x141   : > { %v1114_v9 = vsub.f32 1.5, %v1113_v49  ;;  %1441 = vmatpush.msra.mxu0 %v5520_v46  ;;  %1544 = vmatpush.msra.mxu2 %v5520_v46  ;;  %v5546_v4 = vadd.f32 1e-06, %v945_v13  ;;  %v5548_v1 = vpop.eup %4563  ;;  %v1350_v47 = vmul.f32 %v1309_v25, %v5190_v51  ;;  %vm1117_vm6 = vweird.f32 %v5466_v54 }
 0x142   : > { %v1125_v44 = vmul.f32 %v5453_v43, %v1124_v7  ;;  %v1134_v60 = vsub.f32 1.5, %v1133_v56  ;;  %vm1137_vm7 = vweird.f32 %v5475_v22  ;;  %v5556_v53 = vpop.eup %4565  ;;  %v1271_v13 = vmul.f32 %v5548_v1, %v5464_v17  ;;  %vm5577_vm9 = vmor %vm1116_vm4, %vm1117_vm6 }
 0x143   : > { %4569 = vrsqrt.f32 %v5546_v4  ;;  %v5562_v48 = vadd.f32 1e-06, %v944_v19  ;;  %v5564_v51 = vpop.eup %4567  ;;  %vm1136_vm8 = vweird.f32 %v5424_v50  ;;  %v1261_v7 = vmul.f32 %v5556_v53, %v5470_v28 }
 0x144   : > { %v1129_v39 = vsel %vm5540_vm5, %v5453_v43, %v1125_v44  ;;  %v1135_v56 = vmul.f32 %v5475_v22, %v1134_v60  ;;  %v1299_v43 = vsel %vm5528_vm3, %v5413_v61, %v1295_v37  ;;  %v5572_v31 = vadd.f32 1e-06, %v946_v12  ;;  %vm5588_vm10 = vmor %vm1136_vm8, %vm1137_vm7 }
 0x145   : > { %v1115_v5 = vmul.f32 %v5466_v54, %v1114_v9  ;;  %v1272_v25 = vmul.f32 %v5548_v1, %v1271_v13  ;;  %v1281_v37 = vmul.f32 %v5564_v51, %v5481_v42  ;;  %v1387_v61 = vmul.f32 %v5429_v6, %v1351_v55 }
 0x146   : > { %v1332_v50 = vmul.f32 %v1129_v39, %v5211_v2  ;;  %v1262_v57 = vmul.f32 %v5556_v53, %v1261_v7  ;;  %v1139_v49 = vsel %vm5588_vm10, %v5475_v22, %v1135_v56  ;;  %4571 = vrsqrt.f32 %v5562_v48  ;;  %v914_v19 = vpop.xlane.xlu2 %913  ;;  %v917_v27 = vpop.xlane.xlu0 %916 }
 0x147   : > { %v1282_v44 = vmul.f32 %v5564_v51, %v1281_v37  ;;  %v1386_v35 = vmul.f32 %v5429_v6, %v1350_v47  ;;  %v1349_v2 = vmul.f32 %v1299_v43, %v5193_v52  ;;  %v1273_v12 = vmul.f32 0.5, %v1272_v25  ;;  %v911_v55 = vpop.xlane.xlu1 %910 }
 0x148   : > { %vm1276_vm11 = vweird.f32 %v5464_v17  ;;  %4573 = vrsqrt.f32 %v5572_v31  ;;  %v1119_v22 = vsel %vm5577_vm9, %v5466_v54, %v1115_v5  ;;  %v1263_v60 = vmul.f32 0.5, %v1262_v57 }
 0x149   : > { %v5602_v9 = vpop.eup %4569  ;;  %vm1266_vm12 = vweird.f32 %v5470_v28  ;;  %v5609_v47 = vadd.f32 %v5451_v34, %v1387_v61  ;;  %v5612_v52 = vmul.f32 %v5429_v6, %v1332_v50  ;;  %v1333_v39 = vmul.f32 %v1139_v49, %v5202_v59 }
 0x14a   : > { %vm1277_vm13 = vweird.f32 %v5548_v1  ;;  %v1091_v56 = vmul.f32 %v5602_v9, %v5546_v4  ;;  %v1283_v13 = vmul.f32 0.5, %v1282_v44  ;;  %v5621_v54 = vadd.f32 %v5451_v34, %v1386_v35 }
 0x14b   : > { %1481 = vmatpush.msra.mxu1 %v5609_v47  ;;  %1584 = vmatpush.msra.mxu3 %v5609_v47  ;;  %v960_v43 = vmul.f32 %v914_v19, %v5166_v15  ;;  %v959_v7 = vmul.f32 %v911_v55, %v5166_v15  ;;  %v1331_v5 = vmul.f32 %v1119_v22, %v5216_v11  ;;  %v1274_v59 = vsub.f32 1.5, %v1273_v12  ;;  %vm5671_vm5 = vmor %vm1276_vm11, %vm1277_vm13 }
 0x14c   : > { %vm1267_vm14 = vweird.f32 %v5556_v53  ;;  %v1092_v10 = vmul.f32 %v5602_v9, %v1091_v56  ;;  %v5628_v25 = vpop.eup %4571  ;;  %v1264_v37 = vsub.f32 1.5, %v1263_v60  ;;  %vm1286_vm15 = vweird.f32 %v5481_v42 }
 0x14d   : > { %vm1287_vm1 = vweird.f32 %v5564_v51  ;;  %vm1096_vm2 = vweird.f32 %v5546_v4  ;;  %1482 = vmatpush.msra.mxu1 %v5621_v54  ;;  %1585 = vmatpush.msra.mxu3 %v5621_v54  ;;  %v5635_v61 = vadd.f32 1e-06, %v960_v43  ;;  %v1081_v62 = vmul.f32 %v5628_v25, %v5562_v48  ;;  %vm5659_vm4 = vmor %vm1266_vm12, %vm1267_vm14 }
 0x14e   : > { %v5637_v11 = vpop.eup %4573  ;;  %v1093_v50 = vmul.f32 0.5, %v1092_v10  ;;  %v5641_v57 = vadd.f32 1e-06, %v959_v7  ;;  %v961_v49 = vmul.f32 %v917_v27, %v5166_v15  ;;  %v1369_v44 = vmul.f32 %v5429_v6, %v1333_v39  ;;  %v860_v39 = vpop.xlane.xlu2 %859  ;;  %vm5706_vm8 = vmor %vm1286_vm15, %vm1287_vm1 }
 0x14f   : > { %v1284_v35 = vsub.f32 1.5, %v1283_v13  ;;  %v1101_v19 = vmul.f32 %v5637_v11, %v5572_v31  ;;  %v1385_v12 = vmul.f32 %v5429_v6, %v1349_v2  ;;  %v1367_v55 = vmul.f32 %v5429_v6, %v1331_v5  ;;  %v863_v10 = vpop.xlane.xlu0 %862 }
 0x150   : > { %v1275_v22 = vmul.f32 %v5548_v1, %v1274_v59  ;;  %v1094_v60 = vsub.f32 1.5, %v1093_v50  ;;  %v1082_v56 = vmul.f32 %v5628_v25, %v1081_v62  ;;  %v1265_v43 = vmul.f32 %v5556_v53, %v1264_v37  ;;  %v857_v59 = vpop.xlane.xlu1 %856 }
 0x151   : > { %vm1097_vm3 = vweird.f32 %v5602_v9  ;;  %v1102_v27 = vmul.f32 %v5637_v11, %v1101_v19  ;;  %4575 = vrsqrt.f32 %v5635_v61  ;;  %v5665_v5 = vadd.f32 1e-06, %v961_v49 }
 0x152   : > { %v1095_v13 = vmul.f32 %v5602_v9, %v1094_v60  ;;  %v1083_v7 = vmul.f32 0.5, %v1082_v56  ;;  %4577 = vrsqrt.f32 %v5641_v57  ;;  %v1285_v28 = vmul.f32 %v5564_v51, %v1284_v35  ;;  %vm5694_vm7 = vmor %vm1096_vm2, %vm1097_vm3 }
 0x153   : > { %v1103_v50 = vmul.f32 0.5, %v1102_v27  ;;  %v5677_v62 = vadd.f32 %v5451_v34, %v1385_v12  ;;  %v5680_v19 = vadd.f32 %v5451_v34, %v1369_v44  ;;  %v1279_v49 = vsel %vm5671_vm5, %v5548_v1, %v1275_v22 }
 0x154   : > { %v1084_v60 = vsub.f32 1.5, %v1083_v7  ;;  %vm1086_vm6 = vweird.f32 %v5562_v48  ;;  %4579 = vrsqrt.f32 %v5665_v5  ;;  %v1269_v17 = vsel %vm5659_vm4, %v5556_v53, %v1265_v43 }
 0x155   : > { %v1104_v35 = vsub.f32 1.5, %v1103_v50  ;;  %1483 = vmatpush.msra.mxu1 %v5677_v62  ;;  %1586 = vmatpush.msra.mxu3 %v5677_v62  ;;  %v942_v1 = vmul.f32 %v860_v39, %v5166_v15  ;;  %v941_v12 = vmul.f32 %v857_v59, %v5166_v15  ;;  %v1099_v4 = vsel %vm5694_vm7, %v5602_v9, %v1095_v13 }
 0x156   : > { %vm1087_vm9 = vweird.f32 %v5628_v25  ;;  %1442 = vmatpush.msra.mxu0 %v5680_v19  ;;  %1545 = vmatpush.msra.mxu2 %v5680_v19  ;;  %v5718_v22 = vadd.f32 %v5451_v34, %v5612_v52  ;;  %v943_v42 = vmul.f32 %v863_v10, %v5166_v15  ;;  %v1289_v43 = vsel %vm5706_vm8, %v5564_v51, %v1285_v28 }
 0x157   : > { %v5721_v56 = vpop.eup %4575  ;;  %v1085_v9 = vmul.f32 %v5628_v25, %v1084_v60  ;;  %vm1107_vm10 = vweird.f32 %v5637_v11  ;;  %v5728_v27 = vadd.f32 1e-06, %v942_v1  ;;  %v1105_v2 = vmul.f32 %v5637_v11, %v1104_v35  ;;  %vm5747_vm11 = vmor %vm1086_vm6, %vm1087_vm9  ;;  %v908_v35 = vpop.xlane.xlu0 %907 }
 0x158   : > { %v5730_v39 = vpop.eup %4577  ;;  %v1241_v52 = vmul.f32 %v5721_v56, %v5635_v61  ;;  %1443 = vmatpush.msra.mxu0 %v5718_v22  ;;  %1546 = vmatpush.msra.mxu2 %v5718_v22  ;;  %v5737_v13 = vadd.f32 1e-06, %v941_v12  ;;  %v5740_v51 = vadd.f32 %v5451_v34, %v1367_v55  ;;  %v1329_v7 = vmul.f32 %v1099_v4, %v5255_v8  ;;  %v902_v44 = vpop.xlane.xlu1 %901 }
 0x159   : > { %vm1106_vm12 = vweird.f32 %v5572_v31  ;;  %v1231_v10 = vmul.f32 %v5730_v39, %v5641_v57  ;;  %v5754_v37 = vadd.f32 1e-06, %v943_v42  ;;  %v1347_v55 = vmul.f32 %v1279_v49, %v5234_v40  ;;  %v905_v49 = vpop.xlane.xlu2 %904 }
 0x15a   : > { %v5756_v28 = vpop.eup %4579  ;;  %v1348_v8 = vmul.f32 %v1289_v43, %v5219_v16  ;;  %v1242_v50 = vmul.f32 %v5721_v56, %v1241_v52  ;;  %4581 = vrsqrt.f32 %v5728_v27  ;;  %1444 = vmatpush.msra.mxu0 %v5740_v51  ;;  %1547 = vmatpush.msra.mxu2 %v5740_v51  ;;  %v5765_v48 = vmul.f32 %v1269_v17, %v5237_v0  ;;  %vm5769_vm13 = vmor %vm1106_vm12, %vm1107_vm10 }
 0x15b   : > { %vm1246_vm14 = vweird.f32 %v5635_v61  ;;  %v1232_v16 = vmul.f32 %v5730_v39, %v1231_v10  ;;  %v1251_v40 = vmul.f32 %v5756_v28, %v5665_v5  ;;  %v1089_v60 = vsel %vm5747_vm11, %v5628_v25, %v1085_v9 }
 0x15c   : > { %v1109_v0 = vsel %vm5769_vm13, %v5637_v11, %v1105_v2  ;;  %v1243_v17 = vmul.f32 0.5, %v1242_v50  ;;  %vm1236_vm15 = vweird.f32 %v5641_v57  ;;  %4583 = vrsqrt.f32 %v5737_v13 }
 0x15d   : > { %v5786_v1 = vmul.f32 %v5429_v6, %v1329_v7  ;;  %v1233_v12 = vmul.f32 0.5, %v1232_v16  ;;  %v1252_v53 = vmul.f32 %v5756_v28, %v1251_v40  ;;  %4585 = vrsqrt.f32 %v5754_v37 }
 0x15e   : > { %v1244_v25 = vsub.f32 1.5, %v1243_v17  ;;  %v1384_v4 = vmul.f32 %v5429_v6, %v1348_v8  ;;  %v1383_v11 = vmul.f32 %v5429_v6, %v1347_v55  ;;  %v957_v42 = vmul.f32 %v905_v49, %v5166_v15 }
 0x15f   : > { %v1328_v43 = vmul.f32 %v1089_v60, %v5258_v63  ;;  %v1330_v9 = vmul.f32 %v1109_v0, %v5240_v41  ;;  %v1253_v2 = vmul.f32 0.5, %v1252_v53  ;;  %v956_v52 = vmul.f32 %v902_v44, %v5166_v15 }
 0x160   : > { %v5796_v7 = vpop.eup %4581  ;;  %vm1247_vm1 = vweird.f32 %v5721_v56  ;;  %vm1237_vm2 = vweird.f32 %v5730_v39  ;;  %v5801_v59 = vadd.f32 %v5451_v34, %v1384_v4  ;;  %v5803_v10 = vadd.f32 1e-06, %v957_v42 }
 0x161   : > { %v5806_v55 = vmul.f32 %v5721_v56, %v1244_v25  ;;  %v1234_v63 = vsub.f32 1.5, %v1233_v12  ;;  %vm1256_vm3 = vweird.f32 %v5665_v5  ;;  %v1061_v41 = vmul.f32 %v5796_v7, %v5728_v27  ;;  %vm5842_vm7 = vmor %vm1246_vm14, %vm1247_vm1  ;;  %v851_v4 = vpop.xlane.xlu2 %850 }
 0x162   : > { %vm1066_vm4 = vweird.f32 %v5728_v27  ;;  %v5812_v8 = vpop.eup %4583  ;;  %v1254_v50 = vsub.f32 1.5, %v1253_v2  ;;  %1484 = vmatpush.msra.mxu1 %v5801_v59  ;;  %1587 = vmatpush.msra.mxu3 %v5801_v59  ;;  %v5817_v31 = vadd.f32 %v5451_v34, %v1383_v11  ;;  %4587 = vrsqrt.f32 %v5803_v10  ;;  %vm5860_vm9 = vmor %vm1236_vm15, %vm1237_vm2 }
 0x163   : > { %v5820_v16 = vadd.f32 1e-06, %v956_v52  ;;  %v5822_v40 = vpop.eup %4585  ;;  %v5825_v49 = vmul.f32 %v5429_v6, %v1328_v43  ;;  %v1366_v60 = vmul.f32 %v5429_v6, %v1330_v9  ;;  %v1062_v0 = vmul.f32 %v5796_v7, %v1061_v41  ;;  %v854_v9 = vpop.xlane.xlu0 %853 }
 0x164   : > { %v958_v17 = vmul.f32 %v908_v35, %v5166_v15  ;;  %vm1257_vm5 = vweird.f32 %v5756_v28  ;;  %v1051_v44 = vmul.f32 %v5812_v8, %v5737_v13  ;;  %vm1056_vm6 = vweird.f32 %v5737_v13  ;;  %1485 = vmatpush.msra.mxu1 %v5817_v31  ;;  %1588 = vmatpush.msra.mxu3 %v5817_v31 }
 0x165   : > { %v1071_v12 = vmul.f32 %v5822_v40, %v5754_v37  ;;  %v1235_v53 = vmul.f32 %v5730_v39, %v1234_v63  ;;  %v1063_v25 = vmul.f32 0.5, %v1062_v0  ;;  %vm1067_vm8 = vweird.f32 %v5796_v7  ;;  %vm5892_vm11 = vmor %vm1256_vm3, %vm1257_vm5 }
 0x166   : > { %4589 = vrsqrt.f32 %v5820_v16  ;;  %v1249_v11 = vsel %vm5842_vm7, %v5721_v56, %v5806_v55  ;;  %v1255_v42 = vmul.f32 %v5756_v28, %v1254_v50  ;;  %v1052_v61 = vmul.f32 %v5812_v8, %v1051_v44  ;;  %v848_v44 = vpop.xlane.xlu1 %847  ;;  %vm5923_vm14 = vmor %vm1066_vm4, %vm1067_vm8 }
 0x167   : > { %v1072_v43 = vmul.f32 %v5822_v40, %v1071_v12  ;;  %v1064_v52 = vsub.f32 1.5, %v1063_v25  ;;  %v5864_v63 = vadd.f32 1e-06, %v958_v17  ;;  %v1382_v56 = vmul.f32 %v5429_v6, %v5765_v48 }
 0x168   : > { %v5869_v55 = vadd.f32 %v5451_v34, %v1366_v60  ;;  %v5871_v41 = vpop.eup %4587  ;;  %v1053_v50 = vmul.f32 0.5, %v1052_v61  ;;  %vm1057_vm10 = vweird.f32 %v5812_v8  ;;  %v939_v57 = vmul.f32 %v851_v4, %v5166_v15 }
 0x169   : > { %v1073_v0 = vmul.f32 0.5, %v1072_v43  ;;  %v1065_v12 = vmul.f32 %v5796_v7, %v1064_v52  ;;  %v1211_v17 = vmul.f32 %v5871_v41, %v5803_v10  ;;  %4591 = vrsqrt.f32 %v5864_v63  ;;  %vm5905_vm12 = vmor %vm1056_vm6, %vm1057_vm10 }
 0x16a   : > { %1445 = vmatpush.msra.mxu0 %v5869_v55  ;;  %1548 = vmatpush.msra.mxu2 %v5869_v55  ;;  %v5883_v48 = vadd.f32 %v5451_v34, %v5786_v1  ;;  %v1239_v60 = vsel %vm5860_vm9, %v5730_v39, %v1235_v53  ;;  %v1054_v25 = vsub.f32 1.5, %v1053_v50  ;;  %v5897_v61 = vadd.f32 %v5451_v34, %v1382_v56 }
 0x16b   : > { %v1074_v4 = vsub.f32 1.5, %v1073_v0  ;;  %vm1077_vm13 = vweird.f32 %v5822_v40  ;;  %v1212_v5 = vmul.f32 %v5871_v41, %v1211_v17  ;;  %v5913_v1 = vadd.f32 1e-06, %v939_v57 }
 0x16c   : > { %v5899_v43 = vpop.eup %4589  ;;  %1446 = vmatpush.msra.mxu0 %v5883_v48  ;;  %1549 = vmatpush.msra.mxu2 %v5883_v48  ;;  %v938_v53 = vmul.f32 %v848_v44, %v5166_v15  ;;  %v1259_v13 = vsel %vm5892_vm11, %v5756_v28, %v1255_v42  ;;  %v1055_v52 = vmul.f32 %v5812_v8, %v1054_v25  ;;  %vm1076_vm15 = vweird.f32 %v5754_v37 }
 0x16d   : > { %v1075_v56 = vmul.f32 %v5822_v40, %v1074_v4  ;;  %v1201_v50 = vmul.f32 %v5899_v43, %v5820_v16  ;;  %1486 = vmatpush.msra.mxu1 %v5897_v61  ;;  %v1069_v28 = vsel %vm5923_vm14, %v5796_v7, %v1065_v12  ;;  %v1213_v27 = vmul.f32 0.5, %v1212_v5  ;;  %1589 = vmatpush.msra.mxu3 %v5897_v61  ;;  %vm5944_vm1 = vmor %vm1076_vm15, %vm1077_vm13  ;;  %v899_v4 = vpop.xlane.xlu0 %898 }
 0x16e   : > { %4593 = vrsqrt.f32 %v5913_v1  ;;  %v1344_v42 = vmul.f32 %v1249_v11, %v5276_v29  ;;  %v1059_v0 = vsel %vm5905_vm12, %v5812_v8, %v1055_v52  ;;  %vm1216_vm2 = vweird.f32 %v5803_v10 }
 0x16f   : > { %v1202_v37 = vmul.f32 %v5899_v43, %v1201_v50  ;;  %v5950_v7 = vpop.eup %4591  ;;  %v1343_v44 = vmul.f32 %v1239_v60, %v5279_v14  ;;  %v1345_v29 = vmul.f32 %v1259_v13, %v5261_v3  ;;  %v1079_v8 = vsel %vm5944_vm1, %v5822_v40, %v1075_v56  ;;  %v896_v3 = vpop.xlane.xlu2 %895 }
 0x170   : > { %v5957_v11 = vadd.f32 1e-06, %v938_v53  ;;  %v1326_v12 = vmul.f32 %v1069_v28, %v5297_v18  ;;  %v1214_v17 = vsub.f32 1.5, %v1213_v27  ;;  %v1221_v35 = vmul.f32 %v5950_v7, %v5864_v63  ;;  %v893_v56 = vpop.xlane.xlu1 %892 }
 0x171   : > { %v940_v25 = vmul.f32 %v854_v9, %v5166_v15  ;;  %v1325_v39 = vmul.f32 %v1059_v0, %v5300_v20  ;;  %vm1217_vm3 = vweird.f32 %v5871_v41  ;;  %vm1206_vm4 = vweird.f32 %v5820_v16 }
 0x172   : > { %vm1226_vm5 = vweird.f32 %v5864_v63  ;;  %4595 = vrsqrt.f32 %v5957_v11  ;;  %v1327_v14 = vmul.f32 %v1079_v8, %v5282_v33  ;;  %v1203_v18 = vmul.f32 0.5, %v1202_v37  ;;  %vm6004_vm9 = vmor %vm1216_vm2, %vm1217_vm3 }
 0x173   : > { %v1222_v40 = vmul.f32 %v5950_v7, %v1221_v35  ;;  %v5970_v60 = vadd.f32 1e-06, %v940_v25  ;;  %vm1207_vm6 = vweird.f32 %v5899_v43  ;;  %v5977_v20 = vadd.f32 %v5451_v34, %v5825_v49 }
 0x174   : > { %v5972_v9 = vpop.eup %4593  ;;  %v1381_v5 = vmul.f32 %v5429_v6, %v1345_v29  ;;  %v1380_v53 = vmul.f32 %v5429_v6, %v1344_v42  ;;  %v1362_v13 = vmul.f32 %v5429_v6, %v1326_v12  ;;  %v1215_v33 = vmul.f32 %v5871_v41, %v1214_v17  ;;  %vm6055_vm13 = vmor %vm1206_vm4, %vm1207_vm6 }
 0x175   : > { %v1223_v2 = vmul.f32 0.5, %v1222_v40  ;;  %v1031_v52 = vmul.f32 %v5972_v9, %v5913_v1  ;;  %v5986_v50 = vmul.f32 %v5429_v6, %v1325_v39  ;;  %vm1227_vm7 = vweird.f32 %v5950_v7  ;;  %1447 = vmatpush.msra.mxu0 %v5977_v20  ;;  %1550 = vmatpush.msra.mxu2 %v5977_v20 }
 0x176   : > { %vm1036_vm8 = vweird.f32 %v5913_v1  ;;  %4597 = vrsqrt.f32 %v5970_v60  ;;  %v5994_v49 = vadd.f32 %v5451_v34, %v1381_v5  ;;  %v1363_v28 = vmul.f32 %v5429_v6, %v1327_v14  ;;  %vm6026_vm11 = vmor %vm1226_vm5, %vm1227_vm7 }
 0x177   : > { %v1204_v27 = vsub.f32 1.5, %v1203_v18  ;;  %v1224_v42 = vsub.f32 1.5, %v1223_v2  ;;  %v1032_v0 = vmul.f32 %v5972_v9, %v1031_v52  ;;  %vm1026_vm10 = vweird.f32 %v5957_v11 }
 0x178   : > { %v5998_v57 = vpop.eup %4595  ;;  %1487 = vmatpush.msra.mxu1 %v5994_v49  ;;  %1590 = vmatpush.msra.mxu3 %v5994_v49  ;;  %v6012_v29 = vadd.f32 %v5451_v34, %v1380_v53  ;;  %v954_v8 = vmul.f32 %v896_v3, %v5166_v15  ;;  %v953_v12 = vmul.f32 %v893_v56, %v5166_v15  ;;  %vm1037_vm12 = vweird.f32 %v5972_v9 }
 0x179   : > { %v1219_v10 = vsel %vm6004_vm9, %v5871_v41, %v1215_v33  ;;  %v1225_v17 = vmul.f32 %v5950_v7, %v1224_v42  ;;  %v1033_v35 = vmul.f32 0.5, %v1032_v0  ;;  %v1021_v25 = vmul.f32 %v5998_v57, %v5957_v11  ;;  %v845_v33 = vpop.xlane.xlu0 %844  ;;  %vm6095_vm2 = vmor %vm1036_vm8, %vm1037_vm12 }
 0x17a   : > { %1488 = vmatpush.msra.mxu1 %v6012_v29  ;;  %1591 = vmatpush.msra.mxu3 %v6012_v29  ;;  %v6032_v3 = vadd.f32 1e-06, %v954_v8  ;;  %v6034_v41 = vadd.f32 1e-06, %v953_v12  ;;  %v955_v14 = vmul.f32 %v899_v4, %v5166_v15  ;;  %v1379_v18 = vmul.f32 %v5429_v6, %v1343_v44  ;;  %v842_v44 = vpop.xlane.xlu2 %841 }
 0x17b   : > { %v1229_v63 = vsel %vm6026_vm11, %v5950_v7, %v1225_v17  ;;  %v1034_v40 = vsub.f32 1.5, %v1033_v35  ;;  %v1022_v5 = vmul.f32 %v5998_v57, %v1021_v25  ;;  %v6043_v53 = vadd.f32 %v5451_v34, %v1363_v28 }
 0x17c   : > { %v6045_v2 = vpop.eup %4597  ;;  %v1341_v52 = vmul.f32 %v1219_v10, %v5318_v24  ;;  %v1205_v56 = vmul.f32 %v5899_v43, %v1204_v27  ;;  %4599 = vrsqrt.f32 %v6032_v3  ;;  %v1342_v4 = vmul.f32 %v1229_v63, %v5303_v58 }
 0x17d   : > { %v1023_v28 = vmul.f32 0.5, %v1022_v5  ;;  %vm1027_vm14 = vweird.f32 %v5998_v57  ;;  %v1041_v24 = vmul.f32 %v6045_v2, %v5970_v60  ;;  %1448 = vmatpush.msra.mxu0 %v6043_v53  ;;  %1551 = vmatpush.msra.mxu2 %v6043_v53  ;;  %v1035_v27 = vmul.f32 %v5972_v9, %v1034_v40 }
 0x17e   : > { %4601 = vrsqrt.f32 %v6034_v41  ;;  %v6067_v16 = vadd.f32 1e-06, %v955_v14  ;;  %v6070_v42 = vadd.f32 %v5451_v34, %v1379_v18  ;;  %v6074_v37 = vadd.f32 %v5451_v34, %v1362_v13  ;;  %vm6082_vm15 = vmor %vm1026_vm10, %vm1027_vm14 }
 0x17f   : > { %v1024_v58 = vsub.f32 1.5, %v1023_v28  ;;  %v1042_v0 = vmul.f32 %v6045_v2, %v1041_v24  ;;  %v936_v8 = vmul.f32 %v842_v44, %v5166_v15  ;;  %v1209_v12 = vsel %vm6055_vm13, %v5899_v43, %v1205_v56 }
 0x180   : > { %vm1046_vm1 = vweird.f32 %v5970_v60  ;;  %4603 = vrsqrt.f32 %v6067_v16  ;;  %1489 = vmatpush.msra.mxu1 %v6070_v42  ;;  %1592 = vmatpush.msra.mxu3 %v6070_v42  ;;  %v937_v13 = vmul.f32 %v845_v33, %v5166_v15  ;;  %v6106_v25 = vadd.f32 %v5451_v34, %v5986_v50 }
 0x181   : > { %v1025_v11 = vmul.f32 %v5998_v57, %v1024_v58  ;;  %v1043_v17 = vmul.f32 0.5, %v1042_v0  ;;  %1449 = vmatpush.msra.mxu0 %v6074_v37  ;;  %1552 = vmatpush.msra.mxu2 %v6074_v37  ;;  %v6102_v35 = vadd.f32 1e-06, %v936_v8  ;;  %v1039_v1 = vsel %vm6095_vm2, %v5972_v9, %v1035_v27  ;;  %v890_v7 = vpop.xlane.xlu0 %889 }
 0x182   : > { %v6108_v39 = vpop.eup %4599  ;;  %v6113_v14 = vadd.f32 1e-06, %v937_v13  ;;  %v1378_v18 = vmul.f32 %v5429_v6, %v1342_v4  ;;  %v1377_v63 = vmul.f32 %v5429_v6, %v1341_v52  ;;  %vm1047_vm3 = vweird.f32 %v6045_v2 }
 0x183   : > { %v1029_v40 = vsel %vm6082_vm15, %v5998_v57, %v1025_v11  ;;  %v1044_v5 = vsub.f32 1.5, %v1043_v17  ;;  %v1181_v50 = vmul.f32 %v6108_v39, %v6032_v3  ;;  %1450 = vmatpush.msra.mxu0 %v6106_v25  ;;  %1553 = vmatpush.msra.mxu2 %v6106_v25  ;;  %v1340_v33 = vmul.f32 %v1209_v12, %v5321_v26  ;;  %vm1048_vm6 = vmor %vm1046_vm1, %vm1047_vm3 }
 0x184   : > { %v6125_v9 = vpop.eup %4601  ;;  %vm1186_vm4 = vweird.f32 %v6032_v3  ;;  %vm1176_vm5 = vweird.f32 %v6034_v41  ;;  %4605 = vrsqrt.f32 %v6102_v35  ;;  %v1323_v57 = vmul.f32 %v1039_v1, %v5339_v30 }
 0x185   : > { %v1045_v52 = vmul.f32 %v6045_v2, %v1044_v5  ;;  %v1182_v56 = vmul.f32 %v6108_v39, %v1181_v50  ;;  %v1171_v44 = vmul.f32 %v6125_v9, %v6034_v41  ;;  %v1322_v26 = vmul.f32 %v1029_v40, %v5342_v32 }
 0x186   : > { %v6136_v4 = vpop.eup %4603  ;;  %4607 = vrsqrt.f32 %v6113_v14  ;;  %v6145_v30 = vadd.f32 %v5451_v34, %v1378_v18  ;;  %v6148_v28 = vadd.f32 %v5451_v34, %v1377_v63  ;;  %vm1187_vm7 = vweird.f32 %v6108_v39 }
 0x187   : > { %v1049_v24 = vsel %vm1048_vm6, %v6045_v2, %v1045_v52  ;;  %v1183_v27 = vmul.f32 0.5, %v1182_v56  ;;  %v1172_v58 = vmul.f32 %v6125_v9, %v1171_v44  ;;  %v1191_v32 = vmul.f32 %v6136_v4, %v6067_v16  ;;  %vm6178_vm9 = vmor %vm1186_vm4, %vm1187_vm7 }
 0x188   : > { %v1324_v0 = vmul.f32 %v1049_v24, %v5324_v21  ;;  %1490 = vmatpush.msra.mxu1 %v6145_v30  ;;  %1593 = vmatpush.msra.mxu3 %v6145_v30  ;;  %v952_v60 = vmul.f32 %v890_v7, %v5166_v15  ;;  %v1376_v8 = vmul.f32 %v5429_v6, %v1340_v33  ;;  %vm1177_vm8 = vweird.f32 %v6125_v9 }
 0x189   : > { %v1184_v12 = vsub.f32 1.5, %v1183_v27  ;;  %v1173_v2 = vmul.f32 0.5, %v1172_v58  ;;  %v1192_v10 = vmul.f32 %v6136_v4, %v1191_v32  ;;  %v1359_v21 = vmul.f32 %v5429_v6, %v1323_v57  ;;  %vm6189_vm10 = vmor %vm1176_vm5, %vm1177_vm8 }
 0x18a   : > { %v6162_v13 = vpop.eup %4605  ;;  %v1360_v43 = vmul.f32 %v5429_v6, %v1324_v0  ;;  %1491 = vmatpush.msra.mxu1 %v6148_v28  ;;  %1594 = vmatpush.msra.mxu3 %v6148_v28  ;;  %v6168_v11 = vadd.f32 1e-06, %v952_v60  ;;  %v6171_v15 = vadd.f32 %v5451_v34, %v1376_v8  ;;  %v1358_v50 = vmul.f32 %v5429_v6, %v1322_v26 }
 0x18b   : > { %v1185_v17 = vmul.f32 %v6108_v39, %v1184_v12  ;;  %v1174_v18 = vsub.f32 1.5, %v1173_v2  ;;  %v1193_v63 = vmul.f32 0.5, %v1192_v10  ;;  %v1001_v40 = vmul.f32 %v6162_v13, %v6102_v35 }
 0x18c   : > { %v4608_v5 = vpop.eup %4607  ;;  %vm1197_vm11 = vweird.f32 %v6136_v4  ;;  %4609 = vrsqrt.f32 %v6168_v11  ;;  %1492 = vmatpush.msra.mxu1 %v6171_v15  ;;  %1595 = vmatpush.msra.mxu3 %v6171_v15  ;;  %v6198_v3 = vadd.f32 %v5451_v34, %v1360_v43  ;;  %v6209_v44 = vadd.f32 %v5451_v34, %v1359_v21 }
 0x18d   : > { %v1189_v6 = vsel %vm6178_vm9, %v6108_v39, %v1185_v17  ;;  %v1175_v41 = vmul.f32 %v6125_v9, %v1174_v18  ;;  %v1194_v57 = vsub.f32 1.5, %v1193_v63  ;;  %v1002_v52 = vmul.f32 %v6162_v13, %v1001_v40 }
 0x18e   : > { %v1011_v56 = vmul.f32 %v4608_v5, %v6113_v14  ;;  %1451 = vmatpush.msra.mxu0 %v6198_v3  ;;  %1554 = vmatpush.msra.mxu2 %v6198_v3  ;;  %vm1196_vm12 = vweird.f32 %v6067_v16  ;;  %v1338_v24 = vmul.f32 %v1189_v6, %v5360_v36  ;;  %v6222_v58 = vadd.f32 %v5451_v34, %v1358_v50 }
 0x18f   : > { %v1179_v7 = vsel %vm6189_vm10, %v6125_v9, %v1175_v41  ;;  %v1195_v39 = vmul.f32 %v6136_v4, %v1194_v57  ;;  %v1003_v26 = vmul.f32 0.5, %v1002_v52  ;;  %vm1198_vm13 = vmor %vm1196_vm12, %vm1197_vm11  ;;  %vm1006_vm14 = vweird.f32 %v6102_v35  ;;  %v4675_v35 = vld [vmem:[%s8839_s19] ss:$0 sm:$0xff]  ;;  %v8895_v52 = vld [vmem:[#allocation18_spill] sm:$0xff] }
 0x190   : > { %v1012_v27 = vmul.f32 %v4608_v5, %v1011_v56  ;;  %1452 = vmatpush.msra.mxu0 %v6209_v44  ;;  %1555 = vmatpush.msra.mxu2 %v6209_v44  ;;  %vm1007_vm15 = vweird.f32 %v6162_v13  ;;  %v1337_v36 = vmul.f32 %v1179_v7, %v5363_v38  ;;  %vm1017_vm2 = vweird.f32 %v4608_v5 }
 0x191   : > { %v1199_v9 = vsel %vm1198_vm13, %v6136_v4, %v1195_v39  ;;  %v1004_v32 = vsub.f32 1.5, %v1003_v26  ;;  %vm1008_vm1 = vmor %vm1006_vm14, %vm1007_vm15  ;;  %v1374_v38 = vmul.f32 %v4675_v35, %v1338_v24  ;;  %vm1016_vm3 = vweird.f32 %v6113_v14  ;;  %v8894_v14 = vld [vmem:[#allocation17_spill] sm:$0xff] }
 0x192   : > { %v4610_v16 = vpop.eup %4609  ;;  %v1339_v0 = vmul.f32 %v1199_v9, %v5345_v45  ;;  %v1013_v60 = vmul.f32 0.5, %v1012_v27  ;;  %1453 = vmatpush.msra.mxu0 %v6222_v58  ;;  %1556 = vmatpush.msra.mxu2 %v6222_v58  ;;  %v1373_v17 = vmul.f32 %v4675_v35, %v1337_v36  ;;  %vm1018_vm4 = vmor %vm1016_vm3, %vm1017_vm2  ;;  %vm1166_vm6 = vweird.f32 %v6168_v11  ;;  %v1424_v39 = vld [vmem:[#allocation2] sm:$0xff]  ;;  %v1425_v9 = vld [vmem:[#allocation2 + $0x8] sm:$0xff] }
 0x193   : > { %v1005_v8 = vmul.f32 %v6162_v13, %v1004_v32  ;;  %v1161_v12 = vmul.f32 %v4610_v16, %v6168_v11  ;;  %vm1167_vm5 = vweird.f32 %v4610_v16  ;;  %v1527_v24 = vld [vmem:[#allocation2 + $0x80] sm:$0xff]  ;;  %v8896_v11 = vld [vmem:[#allocation19_spill] sm:$0xff]  ;;  %v1528_v32 = vld [vmem:[#allocation2 + $0x88] sm:$0xff] }
 0x194   : > { %v1014_v4 = vsub.f32 1.5, %v1013_v60  ;;  %v1375_v2 = vmul.f32 %v4675_v35, %v1339_v0  ;;  %vm1168_vm7 = vmor %vm1166_vm6, %vm1167_vm5  ;;  %v1524_v36 = vld [vmem:[%s8897_s4 + $0x10] sm:$0xff]  ;;  %v1523_v60 = vld [vmem:[%s8897_s4 + $0x8] sm:$0xff] }
 0x195   : > { %v1009_v45 = vsel %vm1008_vm1, %v6162_v13, %v1005_v8  ;;  %v1162_v10 = vmul.f32 %v4610_v16, %v1161_v12  ;;  %v4676_v13 = vld [vmem:[%s8842_s25] ss:$0 sm:$0xff]  ;;  %v1426_v0 = vld [vmem:[#allocation2 + $0x10] sm:$0xff]  ;;  %v1427_v12 = vld [vmem:[#allocation2 + $0x18] sm:$0xff] }
 0x196   : > { %v1015_v21 = vmul.f32 %v4608_v5, %v1014_v4  ;;  %v6239_v43 = vadd.f32 %v5451_v34, %v1375_v2  ;;  %v1320_v1 = vmul.f32 %v1009_v45, %v5380_v23  ;;  %v6247_v40 = vadd.f32 %v4676_v13, %v1374_v38  ;;  %v1522_v8 = vld [vmem:[%s8897_s4] sm:$0xff]  ;;  %v1529_v4 = vld [vmem:[#allocation2 + $0x90] sm:$0xff]  ;;  %v1429_v38 = vld [vmem:[#allocation2 + $0x28] sm:$0xff] }
 0x197   : > { %v1163_v18 = vmul.f32 0.5, %v1162_v10  ;;  %v6252_v23 = vadd.f32 %v4676_v13, %v1373_v17  ;;  %v1428_v2 = vld [vmem:[#allocation2 + $0x20] sm:$0xff]  ;;  %v1532_v10 = vld [vmem:[#allocation2 + $0xa8] sm:$0xff]  ;;  %v1431_v17 = vld [vmem:[#allocation2 + $0x38] sm:$0xff] }
 0x198   : > { %v1019_v63 = vsel %vm1018_vm4, %v4608_v5, %v1015_v21  ;;  %1493 = vmatpush.msra.mxu1 %v6239_v43  ;;  %1596 = vmatpush.msra.mxu3 %v6239_v43  ;;  %v1356_v5 = vmul.f32 %v4675_v35, %v1320_v1  ;;  %v1531_v45 = vld [vmem:[#allocation2 + $0xa0] sm:$0xff]  ;;  %v1430_v21 = vld [vmem:[#allocation2 + $0x30] sm:$0xff] }
 0x199   : > { %v1321_v50 = vmul.f32 %v1019_v63, %v8894_v14  ;;  %v1164_v34 = vsub.f32 1.5, %v1163_v18  ;;  %v1533_v1 = vld [vmem:[#allocation2 + $0xb0] sm:$0xff]  ;;  %v1534_v18 = vld [vmem:[#allocation2 + $0xb8] sm:$0xff]  ;;  %v1432_v63 = vld [vmem:[#allocation2 + $0x40] sm:$0xff] }
 0x19a   : > { %1494 = vmatpush.msra.mxu1 %v6247_v40  ;;  %1597 = vmatpush.msra.mxu3 %v6247_v40  ;;  %v6262_v7 = vadd.f32 %v4676_v13, %v1356_v5  ;;  %v1535_v14 = vld [vmem:[#allocation2 + $0xc0] sm:$0xff]  ;;  %v1774_v5 = vld [vmem:[#allocation2 + $0x168] sm:$0xff] }
 0x19b   : > { %v1357_v33 = vmul.f32 %v4675_v35, %v1321_v50  ;;  %v1165_v6 = vmul.f32 %v4610_v16, %v1164_v34  ;;  %v1538_v50 = vld [vmem:[#allocation2 + $0xd8] sm:$0xff] }
 0x19c   : > { %1495 = vmatpush.msra.mxu1 %v6252_v23  ;;  %1598 = vmatpush.msra.mxu3 %v6252_v23  ;;  %v1772_v34 = vld [vmem:[#allocation2 + $0x158] sm:$0xff] }
 0x19d   : > { %v1169_v41 = vsel %vm1168_vm7, %v4610_v16, %v1165_v6  ;;  %v6257_v57 = vadd.f32 %v4676_v13, %v1357_v33  ;;  %v1525_v16 = vld [vmem:[%s8897_s4 + $0x18] sm:$0xff]  ;;  %v1775_v6 = vld [vmem:[#allocation2 + $0x170] sm:$0xff] }
 0x19e   : > { %v1336_v56 = vmul.f32 %v1169_v41, %v8895_v52 }
 0x19f   : > { %1454 = vmatpush.msra.mxu0 %v6257_v57  ;;  %1557 = vmatpush.msra.mxu2 %v6257_v57 }
 0x1a0   : > { %v1372_v26 = vmul.f32 %v4675_v35, %v1336_v56  ;;  %v1530_v35 = vld [vmem:[#allocation2 + $0x98] sm:$0xff] }
 0x1a1   : > { %1455 = vmatpush.msra.mxu0 %v6262_v7  ;;  %1558 = vmatpush.msra.mxu2 %v6262_v7 }
 0x1a2   : > { %v6267_v27 = vadd.f32 %v4676_v13, %v1372_v26  ;;  %1456 = vmatmul.f32.vlgmr.msra.gmra.mxu0 %v1424_v39  ;;  %1559 = vmatmul.f32.vlgmr.msra.gmra.mxu2 %v1527_v24  ;;  %v1433_v13 = vld [vmem:[#allocation2 + $0x48] sm:$0xff] }
 0x1a3   : > { %1777 = vmatpush.msrb.mxu2 %v8896_v11 }
 0x1a4   : > { %1496 = vmatpush.msra.mxu1 %v6267_v27  ;;  %1599 = vmatpush.msra.mxu3 %v6267_v27 }
 0x1a5   : > { %1778 = vmatpush.msrb.mxu2 %v5520_v46  ;;  %1497 = vmatmul.f32.vlgmr.msra.gmra.mxu1 %v1425_v9 }
 0x1a6   : > { %1600 = vmatmul.f32.vlgmr.msra.gmra.mxu3 %v1528_v32  ;;  %1731 = vmatpush.msrb.mxu1 %v1525_v16 }
 0x1a7   : > { %1779 = vmatpush.msrb.mxu2 %v5680_v19  ;;  %1818 = vmatpush.msrb.mxu3 %v5609_v47 }
 0x1a8   : > { %1732 = vmatpush.msrb.mxu1 %v1524_v36 }
 0x1a9   : > { %1780 = vmatpush.msrb.mxu2 %v5718_v22  ;;  %1819 = vmatpush.msrb.mxu3 %v5621_v54 }
 0x1aa   : > { %1459 = vmatmul.f32.gmra.mxu0 %v1426_v0  ;;  %1733 = vmatpush.msrb.mxu1 %v1523_v60 }
 0x1ab   : > { %1781 = vmatpush.msrb.mxu2 %v5740_v51  ;;  %1820 = vmatpush.msrb.mxu3 %v5677_v62 }
 0x1ac   : > { %1734 = vmatpush.msrb.mxu1 %v1522_v8  ;;  %1562 = vmatmul.f32.gmra.mxu2 %v1529_v4 }
 0x1ad   : > { %1782 = vmatpush.msrb.mxu2 %v5869_v55  ;;  %1821 = vmatpush.msrb.mxu3 %v5801_v59 }
 0x1ae   : > { %1954 = vmatpush.msra.mxu1 %v8896_v11  ;;  %1603 = vmatmul.f32.gmra.mxu3 %v1530_v35 }
 0x1af   : > { %1783 = vmatpush.msrb.mxu2 %v5883_v48  ;;  %1500 = vmatmul.f32.gmra.mxu1 %v1427_v12 }
 0x1b0   : > { %1822 = vmatpush.msrb.mxu3 %v5817_v31  ;;  %1955 = vmatpush.msra.mxu1 %v5520_v46 }
 0x1b1   : > { %1784 = vmatpush.msrb.mxu2 %v5977_v20 }
 0x1b2   : > { %1462 = vmatmul.f32.gmra.mxu0 %v1428_v2  ;;  %1823 = vmatpush.msrb.mxu3 %v5897_v61 }
 0x1b3   : > { %1785 = vmatpush.msrb.mxu2 %v6043_v53  ;;  %1956 = vmatpush.msra.mxu1 %v5680_v19 }
 0x1b4   : > { %1824 = vmatpush.msrb.mxu3 %v5994_v49  ;;  %1565 = vmatmul.f32.gmra.mxu2 %v1531_v45 }
 0x1b5   : > { %1786 = vmatpush.msrb.mxu2 %v6074_v37  ;;  %1957 = vmatpush.msra.mxu1 %v5718_v22 }
 0x1b6   : > { %1825 = vmatpush.msrb.mxu3 %v6012_v29 }
 0x1b7   : > { %1787 = vmatpush.msrb.mxu2 %v6106_v25  ;;  %1958 = vmatpush.msra.mxu1 %v5740_v51 }
 0x1b8   : > { %1503 = vmatmul.f32.gmra.mxu1 %v1429_v38  ;;  %1606 = vmatmul.f32.gmra.mxu3 %v1532_v10 }
 0x1b9   : > { %1788 = vmatpush.msrb.mxu2 %v6198_v3  ;;  %1826 = vmatpush.msrb.mxu3 %v6070_v42 }
 0x1ba   : > { %1959 = vmatpush.msra.mxu1 %v5869_v55  ;;  %1465 = vmatmul.f32.gmra.mxu0 %v1430_v21  ;;  %v1939_v21 = vld [vmem:[#allocation2 + $0x188] sm:$0xff] }
 0x1bb   : > { %1789 = vmatpush.msrb.mxu2 %v6209_v44  ;;  %1827 = vmatpush.msrb.mxu3 %v6145_v30 }
 0x1bc   : > { %1960 = vmatpush.msra.mxu1 %v5883_v48  ;;  %1568 = vmatmul.f32.gmra.mxu2 %v1533_v1 }
 0x1bd   : > { %1790 = vmatpush.msrb.mxu2 %v6222_v58  ;;  %1828 = vmatpush.msrb.mxu3 %v6148_v28 }
 0x1be   : > { %1961 = vmatpush.msra.mxu1 %v5977_v20 }
 0x1bf   : > { %1791 = vmatpush.msrb.mxu2 %v6257_v57  ;;  %1829 = vmatpush.msrb.mxu3 %v6171_v15 }
 0x1c0   : > { %1962 = vmatpush.msra.mxu1 %v6043_v53  ;;  %1609 = vmatmul.f32.gmra.mxu3 %v1534_v18 }
 0x1c1   : > { %1506 = vmatmul.f32.gmra.mxu1 %v1431_v17  ;;  %1792 = vmatpush.msrb.mxu2 %v6262_v7 }
 0x1c2   : > { %1830 = vmatpush.msrb.mxu3 %v6239_v43  ;;  %1963 = vmatpush.msra.mxu1 %v6074_v37 }
 0x1c3   : > { %1995 = vmatpush.msra.mxu2 %v5609_v47  ;;  %1468 = vmatmul.f32.gmra.mxu0 %v1432_v63  ;;  %v1536_v47 = vld [vmem:[#allocation2 + $0xc8] sm:$0xff] }
 0x1c4   : > { %1831 = vmatpush.msrb.mxu3 %v6247_v40  ;;  %1964 = vmatpush.msra.mxu1 %v6106_v25 }
 0x1c5   : > { %1996 = vmatpush.msra.mxu2 %v5621_v54  ;;  %v1434_v54 = vld [vmem:[#allocation2 + $0x50] sm:$0xff] }
 0x1c6   : > { %1832 = vmatpush.msrb.mxu3 %v6252_v23  ;;  %1965 = vmatpush.msra.mxu1 %v6198_v3 }
 0x1c7   : > { %1997 = vmatpush.msra.mxu2 %v5677_v62  ;;  %v1435_v62 = vld [vmem:[#allocation2 + $0x58] sm:$0xff] }
 0x1c8   : > { %1833 = vmatpush.msrb.mxu3 %v6267_v27  ;;  %1966 = vmatpush.msra.mxu1 %v6209_v44 }
 0x1c9   : > { %1998 = vmatpush.msra.mxu2 %v5801_v59  ;;  %1509 = vmatmul.f32.gmra.mxu1 %v1433_v13  ;;  %v1537_v59 = vld [vmem:[#allocation2 + $0xd0] sm:$0xff]  ;;  %v4356_v13 = vld [vmem:[%s8897_s4 + $0x58] sm:$0xff] }
 0x1ca   : > { %4424 = vmatpush.msra.mxu3 %v8896_v11  ;;  %1571 = vmatmul.f32.gmra.mxu2 %v1535_v14  ;;  %v4355_v14 = vld [vmem:[%s8897_s4 + $0x50] sm:$0xff] }
 0x1cb   : > { %1612 = vmatmul.f32.gmra.mxu3 %v1536_v47  ;;  %1967 = vmatpush.msra.mxu1 %v6222_v58  ;;  %v1941_v47 = vld [vmem:[#allocation2 + $0x198] sm:$0xff] }
 0x1cc   : > { %4425 = vmatpush.msra.mxu3 %v5520_v46  ;;  %1999 = vmatpush.msra.mxu2 %v5817_v31  ;;  %v1436_v46 = vld [vmem:[#allocation2 + $0x60] sm:$0xff]  ;;  %v1438_v31 = vld [vmem:[#allocation2 + $0x70] sm:$0xff] }
 0x1cd   : > { %1968 = vmatpush.msra.mxu1 %v6257_v57  ;;  %1471 = vmatmul.f32.gmra.mxu0 %v1434_v54 }
 0x1ce   : > { %4426 = vmatpush.msra.mxu3 %v5680_v19  ;;  %2000 = vmatpush.msra.mxu2 %v5897_v61  ;;  %v1437_v19 = vld [vmem:[#allocation2 + $0x68] sm:$0xff]  ;;  %v1542_v61 = vld [vmem:[#allocation2 + $0xf8] sm:$0xff] }
 0x1cf   : > { %1969 = vmatpush.msra.mxu1 %v6262_v7 }
 0x1d0   : > { %4427 = vmatpush.msra.mxu3 %v5718_v22  ;;  %2001 = vmatpush.msra.mxu2 %v5994_v49  ;;  %v1539_v22 = vld [vmem:[#allocation2 + $0xe0] sm:$0xff]  ;;  %v1762_v49 = vld [vmem:[#allocation2 + $0x108] sm:$0xff] }
 0x1d1   : > { %1512 = vmatmul.f32.gmra.mxu1 %v1435_v62 }
 0x1d2   : > { %4428 = vmatpush.msra.mxu3 %v5740_v51  ;;  %2002 = vmatpush.msra.mxu2 %v6012_v29  ;;  %v1540_v51 = vld [vmem:[#allocation2 + $0xe8] sm:$0xff]  ;;  %v1763_v29 = vld [vmem:[#allocation2 + $0x110] sm:$0xff] }
 0x1d3   : > { %1574 = vmatmul.f32.gmra.mxu2 %v1537_v59  ;;  %1615 = vmatmul.f32.gmra.mxu3 %v1538_v50 }
 0x1d4   : > { %2003 = vmatpush.msra.mxu2 %v6070_v42  ;;  %4429 = vmatpush.msra.mxu3 %v5869_v55  ;;  %v1439_v55 = vld [vmem:[#allocation2 + $0x78] sm:$0xff]  ;;  %v1765_v42 = vld [vmem:[#allocation2 + $0x120] sm:$0xff] }
 0x1d5   : > { %1474 = vmatmul.f32.gmra.mxu0 %v1436_v46 }
 0x1d6   : > { %2004 = vmatpush.msra.mxu2 %v6145_v30  ;;  %4430 = vmatpush.msra.mxu3 %v5883_v48  ;;  %v1541_v48 = vld [vmem:[#allocation2 + $0xf0] sm:$0xff]  ;;  %v1768_v30 = vld [vmem:[#allocation2 + $0x138] sm:$0xff] }
 0x1d8   : > { %2005 = vmatpush.msra.mxu2 %v6148_v28  ;;  %4431 = vmatpush.msra.mxu3 %v5977_v20  ;;  %v1761_v20 = vld [vmem:[#allocation2 + $0x100] sm:$0xff]  ;;  %v4336_v28 = vld [vmem:[%s8897_s4 + $0x38] sm:$0xff] }
 0x1d9   : > { %1515 = vmatmul.f32.gmra.mxu1 %v1437_v19  ;;  %1666 = vmatpush.msrb.mxu0 %v4336_v28  ;;  %v4354_v19 = vld [vmem:[%s8897_s4 + $0x48] sm:$0xff] }
 0x1da   : > { %2006 = vmatpush.msra.mxu2 %v6171_v15  ;;  %4432 = vmatpush.msra.mxu3 %v6043_v53  ;;  %v1764_v53 = vld [vmem:[#allocation2 + $0x118] sm:$0xff]  ;;  %v4335_v15 = vld [vmem:[%s8897_s4 + $0x30] sm:$0xff] }
 0x1db   : > { %1577 = vmatmul.f32.gmra.mxu2 %v1539_v22  ;;  %1618 = vmatmul.f32.gmra.mxu3 %v1540_v51  ;;  %v4353_v22 = vld [vmem:[%s8897_s4 + $0x40] sm:$0xff] }
 0x1dc   : > { %4433 = vmatpush.msra.mxu3 %v6074_v37  ;;  %2007 = vmatpush.msra.mxu2 %v6239_v43  ;;  %v1766_v37 = vld [vmem:[#allocation2 + $0x128] sm:$0xff]  ;;  %v4333_v43 = vld [vmem:[%s8897_s4 + $0x20] sm:$0xff] }
 0x1dd   : > { %1477 = vmatmul.f32.gmra.mxu0 %v1438_v31  ;;  %v1943_v31 = vld [vmem:[#allocation2 + $0x1a8] sm:$0xff] }
 0x1de   : > { %4434 = vmatpush.msra.mxu3 %v6106_v25  ;;  %2008 = vmatpush.msra.mxu2 %v6247_v40  ;;  %v1767_v25 = vld [vmem:[#allocation2 + $0x130] sm:$0xff] }
 0x1df   : > { %1667 = vmatpush.msrb.mxu0 %v4335_v15  ;;  %v1771_v40 = vld [vmem:[#allocation2 + $0x150] sm:$0xff]  ;;  %v1947_v15 = vld [vmem:[#allocation2 + $0x1c8] sm:$0xff] }
 0x1e0   : > { %4435 = vmatpush.msra.mxu3 %v6198_v3  ;;  %2009 = vmatpush.msra.mxu2 %v6252_v23  ;;  %v1769_v3 = vld [vmem:[#allocation2 + $0x140] sm:$0xff] }
 0x1e1   : > { %1518 = vmatmul.f32.gmra.mxu1 %v1439_v55  ;;  %v1773_v23 = vld [vmem:[#allocation2 + $0x160] sm:$0xff] }
 0x1e2   : > { %4436 = vmatpush.msra.mxu3 %v6209_v44  ;;  %2010 = vmatpush.msra.mxu2 %v6267_v27  ;;  %v4334_v44 = vld [vmem:[%s8897_s4 + $0x28] sm:$0xff] }
 0x1e3   : > { %1580 = vmatmul.f32.gmra.mxu2 %v1541_v48  ;;  %1621 = vmatmul.f32.gmra.mxu3 %v1542_v61 }
 0x1e4   : > { %4437 = vmatpush.msra.mxu3 %v6222_v58  ;;  %v1770_v58 = vld [vmem:[#allocation2 + $0x148] sm:$0xff]  ;;  %1668 = vmatpush.msrb.mxu0 %v4334_v44 }
 0x1e6   : > { %4438 = vmatpush.msra.mxu3 %v6257_v57  ;;  %1669 = vmatpush.msrb.mxu0 %v4333_v43  ;;  %v1776_v57 = vld [vmem:[#allocation2 + $0x178] sm:$0xff]  ;;  %v1938_v43 = vld [vmem:[#allocation2 + $0x180] sm:$0xff] }
 0x1e8   : > { %4439 = vmatpush.msra.mxu3 %v6262_v7  ;;  %1900 = vmatpush.msra.mxu0 %v4356_v13 }
 0x1ea   : > { %1901 = vmatpush.msra.mxu0 %v4355_v14 }
 0x1eb   : > { %1793 = vmatmul.f32.vlgmr.msrb.gmra.mxu2 %v1761_v20  ;;  %1834 = vmatmul.f32.vlgmr.msrb.gmra.mxu3 %v1762_v49 }
 0x1ec   : > { %1902 = vmatpush.msra.mxu0 %v4354_v19 }
 0x1ee   : > { %1903 = vmatpush.msra.mxu0 %v4353_v22 }
 0x1f3   : > { %1796 = vmatmul.f32.gmra.mxu2 %v1763_v29  ;;  %1837 = vmatmul.f32.gmra.mxu3 %v1764_v53  ;;  %v1945_v29 = vld [vmem:[#allocation2 + $0x1b8] sm:$0xff] }
 0x1fb   : > { %1799 = vmatmul.f32.gmra.mxu2 %v1765_v42  ;;  %1840 = vmatmul.f32.gmra.mxu3 %v1766_v37 }
 0x203   : > { %1802 = vmatmul.f32.gmra.mxu2 %v1767_v25  ;;  %1843 = vmatmul.f32.gmra.mxu3 %v1768_v30 }
 0x20b   : > { %1805 = vmatmul.f32.gmra.mxu2 %v1769_v3  ;;  %1846 = vmatmul.f32.gmra.mxu3 %v1770_v58 }
 0x213   : > { %1808 = vmatmul.f32.gmra.mxu2 %v1771_v40  ;;  %1849 = vmatmul.f32.gmra.mxu3 %v1772_v34  ;;  %v1949_v40 = vld [vmem:[#allocation2 + $0x1d8] sm:$0xff] }
 0x21b   : > { %1811 = vmatmul.f32.gmra.mxu2 %v1773_v23  ;;  %1852 = vmatmul.f32.gmra.mxu3 %v1774_v5 }
 0x21f   : > { %v1457_v33 = vpop.f32.mrf.mxu0 }
 0x222   : > { %v1498_v41 = vpop.f32.mrf.mxu1 }
 0x223   : > { %v1499_v52 = vadd.f32 %v1498_v41, %v1457_v33  ;;  %1814 = vmatmul.f32.gmra.mxu2 %v1775_v6  ;;  %1855 = vmatmul.f32.gmra.mxu3 %v1776_v57  ;;  %v1940_v33 = vld [vmem:[#allocation2 + $0x190] sm:$0xff]  ;;  %v1950_v6 = vld [vmem:[#allocation2 + $0x1e0] sm:$0xff]  ;;  %v1951_v41 = vld [vmem:[#allocation2 + $0x1e8] sm:$0xff] }
 0x225   : > { %4345 = vmatmul.msk.f32.vlgmr.msrb.gmra.mxu1 %vm640_vm0, %v1499_v52  ;;  %v1560_v56 = vpop.f32.mrf.mxu2 }
 0x227   : > { %v1460_v7 = vpop.f32.mrf.mxu0 }
 0x229   : > { %v1601_v39 = vpop.f32.mrf.mxu3 }
 0x22a   : > { %v1602_v26 = vadd.f32 %v1601_v39, %v1560_v56  ;;  %v1952_v39 = vld [vmem:[#allocation2 + $0x1f0] sm:$0xff] }
 0x22b   : > { %2011 = vmatmul.f32.vlgmr.msra.gmra.mxu2 %v1939_v21  ;;  %1988 = vmatmul.f32.vlgmr.msra.gmra.mxu3 %v1950_v6 }
 0x22c   : > { %v1501_v24 = vpop.f32.mrf.mxu1  ;;  %4337 = vmatmul.msk.f32.vlgmr.msrb.gmra.mxu0 %vm640_vm0, %v1602_v26  ;;  %v1953_v26 = vld [vmem:[#allocation2 + $0x1f8] sm:$0xff] }
 0x22d   : > { %v1502_v11 = vadd.f32 %v1501_v24, %v1460_v7  ;;  %v1942_v7 = vld [vmem:[#allocation2 + $0x1a0] sm:$0xff] }
 0x22f   : > { %4346 = vmatmul.msk.f32.gmra.mxu1 %vm640_vm0, %v1502_v11  ;;  %v1463_v27 = vpop.f32.mrf.mxu0  ;;  %v1563_v9 = vpop.f32.mrf.mxu2 }
 0x231   : > { %v1604_v32 = vpop.f32.mrf.mxu3 }
 0x232   : > { %v1605_v16 = vadd.f32 %v1604_v32, %v1563_v9  ;;  %v1944_v9 = vld [vmem:[#allocation2 + $0x1b0] sm:$0xff] }
 0x233   : > { %2014 = vmatmul.f32.gmra.mxu2 %v1941_v47  ;;  %1991 = vmatmul.f32.gmra.mxu3 %v1952_v39 }
 0x234   : > { %4338 = vmatmul.msk.f32.gmra.mxu0 %vm640_vm0, %v1605_v16 }
 0x235   : > { %v1504_v36 = vpop.f32.mrf.mxu1 }
 0x236   : > { %v1505_v0 = vadd.f32 %v1504_v36, %v1463_v27 }
 0x237   : > { %v1466_v60 = vpop.f32.mrf.mxu0  ;;  %v1566_v8 = vpop.f32.mrf.mxu2 }
 0x238   : > { %4347 = vmatmul.msk.f32.gmra.mxu1 %vm640_vm0, %v1505_v0  ;;  %v1946_v0 = vld [vmem:[#allocation2 + $0x1c0] sm:$0xff] }
 0x23b   : > { %v1607_v12 = vpop.f32.mrf.mxu3  ;;  %2017 = vmatmul.f32.gmra.mxu2 %v1943_v31 }
 0x23c   : > { %v1608_v4 = vadd.f32 %v1607_v12, %v1566_v8 }
 0x23e   : > { %v1507_v35 = vpop.f32.mrf.mxu1  ;;  %4339 = vmatmul.msk.f32.gmra.mxu0 %vm640_vm0, %v1608_v4  ;;  %v1948_v4 = vld [vmem:[#allocation2 + $0x1d0] sm:$0xff] }
 0x23f   : > { %v1508_v2 = vadd.f32 %v1507_v35, %v1466_v60  ;;  %v1569_v45 = vpop.f32.mrf.mxu2 }
 0x240   : > { %v1469_v38 = vpop.f32.mrf.mxu0 }
 0x241   : > { %4348 = vmatmul.msk.f32.gmra.mxu1 %vm640_vm0, %v1508_v2 }
 0x243   : > { %v1610_v10 = vpop.f32.mrf.mxu3  ;;  %2020 = vmatmul.f32.gmra.mxu2 %v1945_v29 }
 0x244   : > { %v1611_v17 = vadd.f32 %v1610_v10, %v1569_v45 }
 0x246   : > { %v1510_v1 = vpop.f32.mrf.mxu1  ;;  %4340 = vmatmul.msk.f32.gmra.mxu0 %vm640_vm0, %v1611_v17 }
 0x247   : > { %v1511_v18 = vadd.f32 %v1510_v1, %v1469_v38 }
 0x249   : > { %4349 = vmatmul.msk.f32.gmra.mxu1 %vm640_vm0, %v1511_v18 }
 0x24a   : > { %v1472_v63 = vpop.f32.mrf.mxu0 }
 0x24b   : > { %2023 = vmatmul.f32.gmra.mxu2 %v1947_v15 }
 0x24d   : > { %v1572_v54 = vpop.f32.mrf.mxu2 }
 0x24e   : > { %v1613_v62 = vpop.f32.mrf.mxu3  ;;  %v1513_v50 = vpop.f32.mrf.mxu1 }
 0x24f   : > { %v1614_v59 = vadd.f32 %v1613_v62, %v1572_v54  ;;  %v1514_v46 = vadd.f32 %v1513_v50, %v1472_v63  ;;  %v4368_v54 = vld [vmem:[%s8897_s4 + $0x78] sm:$0xff]  ;;  %v4366_v50 = vld [vmem:[%s8897_s4 + $0x68] sm:$0xff] }
 0x250   : > { %2077 = vmatpush.msrb.mxu3 %v4368_v54 }
 0x251   : > { %4341 = vmatmul.msk.f32.gmra.mxu0 %vm640_vm0, %v1614_v59  ;;  %4350 = vmatmul.msk.f32.gmra.mxu1 %vm640_vm0, %v1514_v46  ;;  %v4367_v59 = vld [vmem:[%s8897_s4 + $0x70] sm:$0xff]  ;;  %v4365_v46 = vld [vmem:[%s8897_s4 + $0x60] sm:$0xff] }
 0x252   : > { %v1475_v51 = vpop.f32.mrf.mxu0  ;;  %2078 = vmatpush.msrb.mxu3 %v4367_v59 }
 0x253   : > { %2026 = vmatmul.f32.gmra.mxu2 %v1949_v40 }
 0x254   : > { %2079 = vmatpush.msrb.mxu3 %v4366_v50 }
 0x256   : > { %v1575_v55 = vpop.f32.mrf.mxu2  ;;  %v1616_v48 = vpop.f32.mrf.mxu3  ;;  %2080 = vmatpush.msrb.mxu3 %v4365_v46 }
 0x257   : > { %v1617_v61 = vadd.f32 %v1616_v48, %v1575_v55  ;;  %v1516_v20 = vpop.f32.mrf.mxu1 }
 0x258   : > { %v1517_v49 = vadd.f32 %v1516_v20, %v1475_v51 }
 0x259   : > { %4342 = vmatmul.msk.f32.gmra.mxu0 %vm640_vm0, %v1617_v61 }
 0x25a   : > { %4351 = vmatmul.msk.f32.gmra.mxu1 %vm640_vm0, %v1517_v49  ;;  %v1478_v53 = vpop.f32.mrf.mxu0 }
 0x25b   : > { %2029 = vmatmul.f32.gmra.mxu2 %v1951_v41 }
 0x25e   : > { %v1578_v42 = vpop.f32.mrf.mxu2  ;;  %v1619_v37 = vpop.f32.mrf.mxu3 }
 0x25f   : > { %v1620_v25 = vadd.f32 %v1619_v37, %v1578_v42  ;;  %v1519_v30 = vpop.f32.mrf.mxu1 }
 0x260   : > { %v1520_v28 = vadd.f32 %v1519_v30, %v1478_v53 }
 0x261   : > { %4343 = vmatmul.msk.f32.gmra.mxu0 %vm640_vm0, %v1620_v25 }
 0x262   : > { %4352 = vmatmul.msk.f32.gmra.mxu1 %vm640_vm0, %v1520_v28 }
 0x263   : > { %2032 = vmatmul.f32.gmra.mxu2 %v1953_v26 }
 0x266   : > { %v1581_v3 = vpop.f32.mrf.mxu2  ;;  %v1622_v44 = vpop.f32.mrf.mxu3 }
 0x267   : > { %v1623_v58 = vadd.f32 %v1622_v44, %v1581_v3 }
 0x269   : > { %4344 = vmatmul.msk.f32.gmra.mxu0 %vm640_vm0, %v1623_v58 }
 0x26a   : > { %1970 = vmatmul.f32.vlgmr.msra.gmra.mxu1 %v1938_v43 }
 0x26e   : > { %v1794_v34 = vpop.f32.mrf.mxu2  ;;  %v1835_v23 = vpop.f32.mrf.mxu3 }
 0x26f   : > { %v1836_v5 = vadd.f32 %v1835_v23, %v1794_v34 }
 0x271   : > { %4357 = vmatmul.msk.f32.vlgmr.msra.gmra.mxu0 %vm640_vm0, %v1836_v5 }
 0x272   : > { %1973 = vmatmul.f32.gmra.mxu1 %v1940_v33 }
 0x276   : > { %v1797_v57 = vpop.f32.mrf.mxu2  ;;  %v1838_v52 = vpop.f32.mrf.mxu3 }
 0x277   : > { %v1839_v56 = vadd.f32 %v1838_v52, %v1797_v57 }
 0x279   : > { %4358 = vmatmul.msk.f32.gmra.mxu0 %vm640_vm0, %v1839_v56 }
 0x27a   : > { %1976 = vmatmul.f32.gmra.mxu1 %v1942_v7 }
 0x27e   : > { %v1800_v24 = vpop.f32.mrf.mxu2  ;;  %v1841_v11 = vpop.f32.mrf.mxu3 }
 0x27f   : > { %v1842_v27 = vadd.f32 %v1841_v11, %v1800_v24 }
 0x281   : > { %4359 = vmatmul.msk.f32.gmra.mxu0 %vm640_vm0, %v1842_v27 }
 0x282   : > { %1979 = vmatmul.f32.gmra.mxu1 %v1944_v9 }
 0x286   : > { %v1803_v32 = vpop.f32.mrf.mxu2  ;;  %v1844_v16 = vpop.f32.mrf.mxu3 }
 0x287   : > { %v1845_v36 = vadd.f32 %v1844_v16, %v1803_v32 }
 0x289   : > { %4360 = vmatmul.msk.f32.gmra.mxu0 %vm640_vm0, %v1845_v36 }
 0x28a   : > { %1982 = vmatmul.f32.gmra.mxu1 %v1946_v0 }
 0x28e   : > { %v1806_v60 = vpop.f32.mrf.mxu2  ;;  %v1847_v8 = vpop.f32.mrf.mxu3 }
 0x28f   : > { %v1848_v12 = vadd.f32 %v1847_v8, %v1806_v60 }
 0x291   : > { %4361 = vmatmul.msk.f32.gmra.mxu0 %vm640_vm0, %v1848_v12 }
 0x292   : > { %1985 = vmatmul.f32.gmra.mxu1 %v1948_v4 }
 0x296   : > { %v1809_v35 = vpop.f32.mrf.mxu2  ;;  %v1850_v2 = vpop.f32.mrf.mxu3 }
 0x297   : > { %v1851_v38 = vadd.f32 %v1850_v2, %v1809_v35 }
 0x299   : > { %4362 = vmatmul.msk.f32.gmra.mxu0 %vm640_vm0, %v1851_v38  ;;  %v4828_v38 = vmov 0  }
 0x29a   : > { %4532 = vset.pattern.permute.xlu1 %v4828_v38  ;;  %4534 = vset.pattern.permute.xlu0 %v4828_v38 }
 0x29b   : > { %4533 = vset.pattern.permute.xlu2 %v4828_v38  ;;  %v2150_v38 = vld [vmem:[%s8783_s8] sm:$0xff] }
 0x29e   : > { %v1812_v45 = vpop.f32.mrf.mxu2  ;;  %v1853_v10 = vpop.f32.mrf.mxu3 }
 0x29f   : > { %v1854_v21 = vadd.f32 %v1853_v10, %v1812_v45  ;;  %v2158_v45 = vld [vmem:[%s8784_s9] sm:$0xff] }
 0x2a0   : > { %2168 = vperm.xlu1 %4532, %v2158_v45   ;;  %v2154_v45 = vld [vmem:[%s8783_s8 + $0x20] sm:$0xff] }
 0x2a1   : > { %4363 = vmatmul.msk.f32.gmra.mxu0 %vm640_vm0, %v1854_v21 }
 0x2a2   : > { %v6408_v17 = vpop.f32.mrf.mxu1 }
 0x2a6   : > { %v1815_v1 = vpop.f32.mrf.mxu2  ;;  %v1856_v18 = vpop.f32.mrf.mxu3 }
 0x2a7   : > { %v1857_v63 = vadd.f32 %v1856_v18, %v1815_v1 }
 0x2a9   : > { %4364 = vmatmul.msk.f32.gmra.mxu0 %vm640_vm0, %v1857_v63  ;;  %v6441_v58 = vpop.f32.mrf.mxu0 }
 0x2ac   : > { %v6412_v13 = vpop.f32.mrf.mxu1 }
 0x2ae   : > { %v2012_v22 = vpop.f32.mrf.mxu2  ;;  %v1989_v34 = vpop.f32.mrf.mxu3 }
 0x2b1   : > { %v1674_v5 = vpop.f32.mrf.mxu0 }
 0x2b5   : > { %v6414_v14 = vpop.f32.mrf.mxu1 }
 0x2b6   : > { %v2015_v55 = vpop.f32.mrf.mxu2  ;;  %v1992_v6 = vpop.f32.mrf.mxu3 }
 0x2bb   : > { %v1677_v52 = vpop.f32.mrf.mxu0 }
 0x2be   : > { %v6416_v47 = vpop.f32.mrf.mxu1  ;;  %v2018_v20 = vpop.f32.mrf.mxu2 }
 0x2c3   : > { %v1680_v56 = vpop.f32.mrf.mxu0 }
 0x2c6   : > { %v6421_v62 = vpop.f32.mrf.mxu1  ;;  %v2021_v53 = vpop.f32.mrf.mxu2 }
 0x2ce   : > { %v6432_v19 = vpop.f32.mrf.mxu1  ;;  %v2024_v25 = vpop.f32.mrf.mxu2 }
 0x2cf   : > { %v1683_v7 = vpop.f32.mrf.mxu0 }
 0x2d0   : > { %v1749_v54 = vadd.f32 %v6421_v62, %v1683_v7  ;;  %v1743_v62 = vadd.f32 %v6414_v14, %v1677_v52  ;;  %v1737_v14 = vadd.f32 %v6408_v17, %v6441_v58 }
 0x2d6   : > { %v2027_v3 = vpop.f32.mrf.mxu2 }
 0x2d7   : > { %v1754_v51 = vpop.f32.mrf.mxu1  ;;  %v1686_v39 = vpop.f32.mrf.mxu0 }
 0x2d8   : > { %v1752_v1 = vadd.f32 %v6432_v19, %v1686_v39  ;;  %v4537_v19 = vld [vmem:[%s8898_s5] ss:$0 sm:$0xff] }
 0x2de   : > { %v2030_v23 = vpop.f32.mrf.mxu2 }
 0x2df   : > { %v6434_v31 = vpop.f32.mrf.mxu1  ;;  %v2031_v33 = vadd.f32 %v2030_v23, %v1989_v34  ;;  %v1689_v26 = vpop.f32.mrf.mxu0  ;;  %v2164_v23 = vld [vmem:[%s8784_s9 + $0x30] sm:$0xff] }
 0x2e0   : > { %v1755_v21 = vadd.f32 %v1754_v51, %v1689_v26 }
 0x2e6   : > { %v2033_v41 = vpop.f32.mrf.mxu2 }
 0x2e7   : > { %v1971_v48 = vpop.f32.mrf.mxu1  ;;  %v2034_v57 = vadd.f32 %v2033_v41, %v1992_v6  ;;  %v1692_v24 = vpop.f32.mrf.mxu0 }
 0x2e8   : > { %v2013_v61 = vadd.f32 %v2012_v22, %v1971_v48  ;;  %v1758_v59 = vadd.f32 %v6434_v31, %v1692_v24  ;;  %v2162_v22 = vld [vmem:[%s8784_s9 + $0x20] sm:$0xff] }
 0x2e9   : > { %2188 = vperm.xlu1 %4532, %v2162_v22   ;;  %v2354_v22 = vld [vmem:[%s8787_s12 + $0x190] sm:$0xff] }
 0x2ea   : > { %4369 = vmatmul.msk.f32.vlgmr.msrb.gmra.mxu3 %vm640_vm0, %v2013_v61 }
 0x2ef   : > { %v1974_v49 = vpop.f32.mrf.mxu1  ;;  %v1905_v11 = vpop.f32.mrf.mxu0 }
 0x2f0   : > { %v2016_v29 = vadd.f32 %v2015_v55, %v1974_v49  ;;  %v1746_v55 = vadd.f32 %v6416_v47, %v1680_v56  ;;  %v4538_v47 = vld [vmem:[%s8899_s6] ss:$0 sm:$0xff]  ;;  %v1929_v34 = vadd.f32 %v1905_v11, %v1737_v14  ;;  %v2347_v14 = vld [vmem:[%s8787_s12 + $0x158] sm:$0xff] }
 0x2f1   : > { %2198 = vperm.xlu1 %4532, %v2164_v23   ;;  %v2153_v23 = vld [vmem:[%s8783_s8 + $0x18] sm:$0xff] }
 0x2f2   : > { %4370 = vmatmul.msk.f32.gmra.mxu3 %vm640_vm0, %v2016_v29 }
 0x2f7   : > { %v1977_v42 = vpop.f32.mrf.mxu1  ;;  %v1908_v27 = vpop.f32.mrf.mxu0 }
 0x2f8   : > { %v2019_v37 = vadd.f32 %v2018_v20, %v1977_v42  ;;  %v1740_v42 = vadd.f32 %v6412_v13, %v1674_v5 }
 0x2fa   : > { %4371 = vmatmul.msk.f32.gmra.mxu3 %vm640_vm0, %v2019_v37 }
 0x2ff   : > { %v1980_v30 = vpop.f32.mrf.mxu1  ;;  %v1911_v32 = vpop.f32.mrf.mxu0 }
 0x300   : > { %v2022_v28 = vadd.f32 %v2021_v53, %v1980_v30  ;;  %v1931_v37 = vadd.f32 %v1911_v32, %v1743_v62  ;;  %v2155_v62 = vld [vmem:[%s8783_s8 + $0x28] sm:$0xff] }
 0x302   : > { %4372 = vmatmul.msk.f32.gmra.mxu3 %vm640_vm0, %v2022_v28 }
 0x307   : > { %v1983_v15 = vpop.f32.mrf.mxu1  ;;  %v1914_v36 = vpop.f32.mrf.mxu0 }
 0x308   : > { %v2025_v44 = vadd.f32 %v2024_v25, %v1983_v15  ;;  %v1932_v31 = vadd.f32 %v1914_v36, %v1746_v55  ;;  %v1930_v15 = vadd.f32 %v1908_v27, %v1740_v42  ;;  %v2159_v27 = vld [vmem:[%s8784_s9 + $0x8] sm:$0xff]  ;;  %v2359_v55 = vld [vmem:[%s8787_s12 + $0x1b8] sm:$0xff] }
 0x309   : > { %2173 = vperm.xlu2 %4533, %v2159_v27   ;;  %v2351_v42 = vld [vmem:[%s8787_s12 + $0x178] sm:$0xff]  ;;  %v2329_v27 = vld [vmem:[%s8787_s12 + $0xc8] sm:$0xff] }
 0x30a   : > { %4373 = vmatmul.msk.f32.gmra.mxu3 %vm640_vm0, %v2025_v44 }
 0x30f   : > { %v1986_v43 = vpop.f32.mrf.mxu1  ;;  %v1917_v60 = vpop.f32.mrf.mxu0 }
 0x310   : > { %v2028_v40 = vadd.f32 %v2027_v3, %v1986_v43  ;;  %v1933_v48 = vadd.f32 %v1917_v60, %v1749_v54  ;;  %v2365_v60 = vld [vmem:[%s8787_s12 + $0x1e8] sm:$0xff]  ;;  %v2358_v54 = vld [vmem:[%s8787_s12 + $0x1b0] sm:$0xff] }
 0x311   : > { %2419 = vmatpush.msrb.mxu2 %v2365_v60  ;;  %v2327_v60 = vld [vmem:[%s8787_s12 + $0xb8] sm:$0xff] }
 0x312   : > { %4374 = vmatmul.msk.f32.gmra.mxu3 %vm640_vm0, %v2028_v40  ;;  %v4539_v40 = vld [vmem:[%s8782_s7] ss:$0 sm:$0xff] }
 0x317   : > { %v1920_v12 = vpop.f32.mrf.mxu0 }
 0x318   : > { %v1934_v50 = vadd.f32 %v1920_v12, %v1752_v1  ;;  %v2367_v1 = vld [vmem:[%s8787_s12 + $0x1f8] sm:$0xff] }
 0x31a   : > { %4375 = vmatmul.msk.f32.gmra.mxu3 %vm640_vm0, %v2031_v33 }
 0x31f   : > { %v1923_v2 = vpop.f32.mrf.mxu0 }
 0x320   : > { %v1935_v18 = vadd.f32 %v1923_v2, %v1755_v21  ;;  %v2364_v21 = vld [vmem:[%s8787_s12 + $0x1e0] sm:$0xff] }
 0x322   : > { %4376 = vmatmul.msk.f32.gmra.mxu3 %vm640_vm0, %v2034_v57  ;;  %vm2206_vm0 = vcmask 523264  }
 0x327   : > { %v1926_v63 = vpop.f32.mrf.mxu0 }
 0x328   : > { %v1936_v61 = vadd.f32 %v1926_v63, %v1758_v59  ;;  %v2360_v63 = vld [vmem:[%s8787_s12 + $0x1c0] sm:$0xff]  ;;  %v2363_v59 = vld [vmem:[%s8787_s12 + $0x1d8] sm:$0xff] }
 0x36d   : > { %v2082_v9 = vpop.f32.mrf.mxu3 }
 0x36e   : > { %v2106_v6 = vadd.f32 %v2082_v9, %v1929_v34  ;;  %v2165_v34 = vld [vmem:[%s8784_s9 + $0x38] sm:$0xff] }
 0x370   : > { %v6491_v26 = vadd.f32 %v4537_v19, %v2106_v6  ;;  %v2338_v6 = vld [vmem:[%s8787_s12 + $0x110] sm:$0xff] }
 0x372   : > { %v2130_v36 = vmul.f32 %v4538_v47, %v6491_v26 }
 0x374   : > { %v2142_v2 = vadd.f32 %v4539_v40, %v2130_v36  ;;  %v2325_v36 = vld [vmem:[%s8787_s12 + $0xa8] sm:$0xff] }
 0x375   : > { %v2085_v16 = vpop.f32.mrf.mxu3 }
 0x376   : > { %v2107_v5 = vadd.f32 %v2085_v16, %v1930_v15  ;;  %v2160_v16 = vld [vmem:[%s8784_s9 + $0x10] sm:$0xff] }
 0x377   : > { %2178 = vperm.xlu0 %4534, %v2160_v16   ;;  %v2342_v15 = vld [vmem:[%s8787_s12 + $0x130] sm:$0xff]  ;;  %v2324_v16 = vld [vmem:[%s8787_s12 + $0xa0] sm:$0xff] }
 0x378   : > { %v6488_v56 = vadd.f32 %v4537_v19, %v2107_v5  ;;  %v2157_v5 = vld [vmem:[%s8783_s8 + $0x38] sm:$0xff] }
 0x37a   : > { %v2131_v9 = vmul.f32 %v4538_v47, %v6488_v56 }
 0x37c   : > { %v2143_v12 = vadd.f32 %v4539_v40, %v2131_v9  ;;  %v2330_v9 = vld [vmem:[%s8787_s12 + $0xd0] sm:$0xff] }
 0x37d   : > { %v2088_v0 = vpop.f32.mrf.mxu3 }
 0x37e   : > { %v2108_v3 = vadd.f32 %v2088_v0, %v1931_v37  ;;  %v2346_v37 = vld [vmem:[%s8787_s12 + $0x150] sm:$0xff] }
 0x380   : > { %v6485_v41 = vadd.f32 %v4537_v19, %v2108_v3  ;;  %v2340_v3 = vld [vmem:[%s8787_s12 + $0x120] sm:$0xff] }
 0x382   : > { %v2132_v24 = vmul.f32 %v4538_v47, %v6485_v41 }
 0x384   : > { %v2144_v0 = vadd.f32 %v4539_v40, %v2132_v24  ;;  %v2335_v24 = vld [vmem:[%s8787_s12 + $0xf8] sm:$0xff] }
 0x385   : > { %v2091_v8 = vpop.f32.mrf.mxu3 }
 0x386   : > { %v2109_v25 = vadd.f32 %v2091_v8, %v1932_v31  ;;  %v2366_v8 = vld [vmem:[%s8787_s12 + $0x1f0] sm:$0xff]  ;;  %v2355_v31 = vld [vmem:[%s8787_s12 + $0x198] sm:$0xff] }
 0x387   : > { %2460 = vmatpush.msra.mxu3 %v2366_v8  ;;  %v2320_v8 = vld [vmem:[%s8787_s12 + $0x80] sm:$0xff] }
 0x388   : > { %v6482_v33 = vadd.f32 %v4537_v19, %v2109_v25  ;;  %v2341_v25 = vld [vmem:[%s8787_s12 + $0x128] sm:$0xff] }
 0x38a   : > { %v2133_v7 = vmul.f32 %v4538_v47, %v6482_v33 }
 0x38c   : > { %v2145_v32 = vadd.f32 %v4539_v40, %v2133_v7  ;;  %v2333_v7 = vld [vmem:[%s8787_s12 + $0xe8] sm:$0xff] }
 0x38d   : > { %v2094_v4 = vpop.f32.mrf.mxu3 }
 0x38e   : > { %v2110_v49 = vadd.f32 %v2094_v4, %v1933_v48  ;;  %v2361_v4 = vld [vmem:[%s8787_s12 + $0x1c8] sm:$0xff] }
 0x38f   : > { %2420 = vmatpush.msrb.mxu2 %v2361_v4  ;;  %v2349_v48 = vld [vmem:[%s8787_s12 + $0x168] sm:$0xff]  ;;  %v2322_v4 = vld [vmem:[%s8787_s12 + $0x90] sm:$0xff] }
 0x390   : > { %v6472_v44 = vadd.f32 %v4537_v19, %v2110_v49  ;;  %v2348_v49 = vld [vmem:[%s8787_s12 + $0x160] sm:$0xff] }
 0x392   : > { %v2134_v57 = vmul.f32 %v4538_v47, %v6472_v44 }
 0x394   : > { %v2146_v11 = vadd.f32 %v4539_v40, %v2134_v57  ;;  %v2339_v57 = vld [vmem:[%s8787_s12 + $0x118] sm:$0xff] }
 0x395   : > { %v2097_v35 = vpop.f32.mrf.mxu3 }
 0x396   : > { %v2111_v51 = vadd.f32 %v2097_v35, %v1934_v50  ;;  %v2362_v35 = vld [vmem:[%s8787_s12 + $0x1d0] sm:$0xff]  ;;  %v2353_v50 = vld [vmem:[%s8787_s12 + $0x188] sm:$0xff] }
 0x397   : > { %2461 = vmatpush.msra.mxu3 %v2362_v35  ;;  %v2323_v35 = vld [vmem:[%s8787_s12 + $0x98] sm:$0xff] }
 0x398   : > { %v6466_v30 = vadd.f32 %v4537_v19, %v2111_v51  ;;  %v2151_v51 = vld [vmem:[%s8783_s8 + $0x8] sm:$0xff] }
 0x399   : > { %2462 = vmatpush.msra.mxu3 %v2358_v54  ;;  %v2308_v54 = vld [vmem:[%s8787_s12 + $0x20] sm:$0xff] }
 0x39a   : > { %v2135_v17 = vmul.f32 %v4538_v47, %v6466_v30 }
 0x39b   : > { %2463 = vmatpush.msra.mxu3 %v2354_v22  ;;  %v2304_v22 = vld [vmem:[%s8787_s12] sm:$0xff] }
 0x39c   : > { %v2147_v39 = vadd.f32 %v4539_v40, %v2135_v17  ;;  %v2336_v17 = vld [vmem:[%s8787_s12 + $0x100] sm:$0xff] }
 0x39d   : > { %v2100_v10 = vpop.f32.mrf.mxu3 }
 0x39e   : > { %v2112_v46 = vadd.f32 %v2100_v10, %v1935_v18  ;;  %v2161_v10 = vld [vmem:[%s8784_s9 + $0x18] sm:$0xff]  ;;  %v2357_v18 = vld [vmem:[%s8787_s12 + $0x1a8] sm:$0xff] }
 0x39f   : > { %2183 = vperm.xlu2 %4533, %v2161_v10   ;;  %2421 = vmatpush.msrb.mxu2 %v2357_v18  ;;  %v2319_v10 = vld [vmem:[%s8787_s12 + $0x78] sm:$0xff]  ;;  %v2314_v18 = vld [vmem:[%s8787_s12 + $0x50] sm:$0xff] }
 0x3a0   : > { %v6460_v29 = vadd.f32 %v4537_v19, %v2112_v46  ;;  %v2356_v46 = vld [vmem:[%s8787_s12 + $0x1a0] sm:$0xff] }
 0x3a1   : > { %2422 = vmatpush.msrb.mxu2 %v2353_v50  ;;  %v2310_v50 = vld [vmem:[%s8787_s12 + $0x30] sm:$0xff] }
 0x3a2   : > { %v2136_v43 = vmul.f32 %v4538_v47, %v6460_v29 }
 0x3a3   : > { %2423 = vmatpush.msrb.mxu2 %v2349_v48  ;;  %v2306_v48 = vld [vmem:[%s8787_s12 + $0x10] sm:$0xff] }
 0x3a4   : > { %v2148_v52 = vadd.f32 %v4539_v40, %v2136_v43  ;;  %v2343_v43 = vld [vmem:[%s8787_s12 + $0x138] sm:$0xff] }
 0x3a5   : > { %v2103_v20 = vpop.f32.mrf.mxu3 }
 0x3a6   : > { %v2113_v53 = vadd.f32 %v2103_v20, %v1936_v61  ;;  %v2352_v61 = vld [vmem:[%s8787_s12 + $0x180] sm:$0xff]  ;;  %v2163_v20 = vld [vmem:[%s8784_s9 + $0x28] sm:$0xff] }
 0x3a7   : > { %2193 = vperm.xlu2 %4533, %v2163_v20   ;;  %v6738_v20 = vld [vmem:[%s8785_s10] ss:$0 sm:$0xff] }
 0x3a8   : > { %v6468_v28 = vadd.f32 %v4537_v19, %v2113_v53  ;;  %v2350_v19 = vld [vmem:[%s8787_s12 + $0x170] sm:$0xff]  ;;  %v2345_v53 = vld [vmem:[%s8787_s12 + $0x148] sm:$0xff] }
 0x3a9   : > { %2464 = vmatpush.msra.mxu3 %v2350_v19  ;;  %2424 = vmatpush.msrb.mxu2 %v2345_v53  ;;  %v2169_v19 = vpop.permute.xlu1 %2168 }
 0x3aa   : > { %v2137_v13 = vmul.f32 %v4538_v47, %v6468_v28  ;;  %v2344_v47 = vld [vmem:[%s8787_s12 + $0x140] sm:$0xff] }
 0x3ab   : > { %2465 = vmatpush.msra.mxu3 %v2346_v37  ;;  %2425 = vmatpush.msrb.mxu2 %v2341_v25  ;;  %v2174_v37 = vpop.permute.xlu2 %2173 }
 0x3ac   : > { %v2149_v58 = vadd.f32 %v4539_v40, %v2137_v13  ;;  %v2152_v13 = vld [vmem:[%s8783_s8 + $0x10] sm:$0xff] }
 0x3ad   : > { %v2156_v40 = vld [vmem:[%s8783_s8 + $0x30] sm:$0xff]  ;;  %2466 = vmatpush.msra.mxu3 %v2342_v15 }
 0x3ae   : > { %2239 = vmatpush.msrb.mxu0 %v2149_v58  ;;  %4440 = vmatpush.msrb.mxu1 %v2149_v58  ;;  %v2337_v58 = vld [vmem:[%s8787_s12 + $0x108] sm:$0xff] }
 0x3af   : > { %2203 = vperm.xlu2 %4533, %v2165_v34   ;;  %2426 = vmatpush.msrb.mxu2 %v2337_v58 }
 0x3b0   : > { %2240 = vmatpush.msrb.mxu0 %v2148_v52  ;;  %4441 = vmatpush.msrb.mxu1 %v2148_v52  ;;  %v2332_v52 = vld [vmem:[%s8787_s12 + $0xe0] sm:$0xff] }
 0x3b1   : > { %2467 = vmatpush.msra.mxu3 %v2338_v6  ;;  %2427 = vmatpush.msrb.mxu2 %v2333_v7  ;;  %v2189_v6 = vpop.permute.xlu1 %2188 }
 0x3b2   : > { %2241 = vmatpush.msrb.mxu0 %v2147_v39  ;;  %4442 = vmatpush.msrb.mxu1 %v2147_v39  ;;  %v2334_v39 = vld [vmem:[%s8787_s12 + $0xf0] sm:$0xff] }
 0x3b3   : > { %2468 = vmatpush.msra.mxu3 %v2334_v39  ;;  %2428 = vmatpush.msrb.mxu2 %v2329_v27 }
 0x3b4   : > { %2242 = vmatpush.msrb.mxu0 %v2146_v11  ;;  %4443 = vmatpush.msrb.mxu1 %v2146_v11  ;;  %v2328_v11 = vld [vmem:[%s8787_s12 + $0xc0] sm:$0xff] }
 0x3b5   : > { %2469 = vmatpush.msra.mxu3 %v2330_v9  ;;  %2429 = vmatpush.msrb.mxu2 %v2325_v36 }
 0x3b6   : > { %2243 = vmatpush.msrb.mxu0 %v2145_v32  ;;  %4444 = vmatpush.msrb.mxu1 %v2145_v32  ;;  %v2331_v32 = vld [vmem:[%s8787_s12 + $0xd8] sm:$0xff] }
 0x3b8   : > { %2244 = vmatpush.msrb.mxu0 %v2144_v0  ;;  %4445 = vmatpush.msrb.mxu1 %v2144_v0  ;;  %v2326_v0 = vld [vmem:[%s8787_s12 + $0xb0] sm:$0xff] }
 0x3b9   : > { %2470 = vmatpush.msra.mxu3 %v2326_v0 }
 0x3ba   : > { %2245 = vmatpush.msrb.mxu0 %v2143_v12  ;;  %4446 = vmatpush.msrb.mxu1 %v2143_v12  ;;  %v2321_v12 = vld [vmem:[%s8787_s12 + $0x88] sm:$0xff] }
 0x3bb   : > { %2430 = vmatpush.msrb.mxu2 %v2321_v12  ;;  %2471 = vmatpush.msra.mxu3 %v2322_v4 }
 0x3bc   : > { %2246 = vmatpush.msrb.mxu0 %v2142_v2  ;;  %4447 = vmatpush.msrb.mxu1 %v2142_v2  ;;  %v2316_v2 = vld [vmem:[%s8787_s12 + $0x60] sm:$0xff] }
 0x3bd   : > { %4377 = vmatmul.msk.f32.vlgmr.msrb.gmra.mxu0 %vm2206_vm0, %v2150_v38  ;;  %4381 = vmatmul.msk.f32.vlgmr.msrb.gmra.mxu1 %vm2206_vm0, %v2154_v45  ;;  %v2317_v38 = vld [vmem:[%s8787_s12 + $0x68] sm:$0xff]  ;;  %v2318_v45 = vld [vmem:[%s8787_s12 + $0x70] sm:$0xff] }
 0x3be   : > { %2378 = vmatpush.msra.mxu1 %v2364_v21  ;;  %2501 = vmatpush.msra.mxu0 %v2367_v1  ;;  %v2312_v21 = vld [vmem:[%s8787_s12 + $0x40] sm:$0xff]  ;;  %v2313_v1 = vld [vmem:[%s8787_s12 + $0x48] sm:$0xff] }
 0x3bf   : > { %2431 = vmatpush.msrb.mxu2 %v2317_v38  ;;  %2472 = vmatpush.msra.mxu3 %v2318_v45 }
 0x3c0   : > { %2379 = vmatpush.msra.mxu1 %v2360_v63  ;;  %2502 = vmatpush.msra.mxu0 %v2363_v59  ;;  %v2315_v63 = vld [vmem:[%s8787_s12 + $0x58] sm:$0xff]  ;;  %v2309_v59 = vld [vmem:[%s8787_s12 + $0x28] sm:$0xff] }
 0x3c1   : > { %2432 = vmatpush.msrb.mxu2 %v2313_v1  ;;  %2473 = vmatpush.msra.mxu3 %v2314_v18 }
 0x3c2   : > { %2380 = vmatpush.msra.mxu1 %v2356_v46  ;;  %2503 = vmatpush.msra.mxu0 %v2359_v55  ;;  %v2311_v46 = vld [vmem:[%s8787_s12 + $0x38] sm:$0xff]  ;;  %v2305_v55 = vld [vmem:[%s8787_s12 + $0x8] sm:$0xff] }
 0x3c3   : > { %2433 = vmatpush.msrb.mxu2 %v2309_v59  ;;  %2474 = vmatpush.msra.mxu3 %v2310_v50 }
 0x3c4   : > { %2381 = vmatpush.msra.mxu1 %v2352_v61  ;;  %2504 = vmatpush.msra.mxu0 %v2355_v31  ;;  %v2307_v61 = vld [vmem:[%s8787_s12 + $0x18] sm:$0xff] }
 0x3c5   : > { %4378 = vmatmul.msk.f32.gmra.mxu0 %vm2206_vm0, %v2151_v51  ;;  %4382 = vmatmul.msk.f32.gmra.mxu1 %vm2206_vm0, %v2155_v62 }
 0x3c6   : > { %2382 = vmatpush.msra.mxu1 %v2348_v49  ;;  %2505 = vmatpush.msra.mxu0 %v2351_v42  ;;  %v6746_v49 = vld [vmem:[%s8786_s11] ss:$0 sm:$0xff] }
 0x3c7   : > { %2434 = vmatpush.msrb.mxu2 %v2305_v55  ;;  %2475 = vmatpush.msra.mxu3 %v2306_v48 }
 0x3c8   : > { %2383 = vmatpush.msra.mxu1 %v2344_v47  ;;  %2506 = vmatpush.msra.mxu0 %v2347_v14 }
 0x3ca   : > { %2384 = vmatpush.msra.mxu1 %v2340_v3  ;;  %2507 = vmatpush.msra.mxu0 %v2343_v43 }
 0x3cc   : > { %2385 = vmatpush.msra.mxu1 %v2336_v17  ;;  %2508 = vmatpush.msra.mxu0 %v2339_v57 }
 0x3cd   : > { %4379 = vmatmul.msk.f32.gmra.mxu0 %vm2206_vm0, %v2152_v13  ;;  %4383 = vmatmul.msk.f32.gmra.mxu1 %vm2206_vm0, %v2156_v40 }
 0x3ce   : > { %2386 = vmatpush.msra.mxu1 %v2332_v52  ;;  %2509 = vmatpush.msra.mxu0 %v2335_v24 }
 0x3d0   : > { %2387 = vmatpush.msra.mxu1 %v2328_v11  ;;  %2510 = vmatpush.msra.mxu0 %v2331_v32 }
 0x3d2   : > { %2388 = vmatpush.msra.mxu1 %v2324_v16  ;;  %2511 = vmatpush.msra.mxu0 %v2327_v60 }
 0x3d4   : > { %2389 = vmatpush.msra.mxu1 %v2320_v8  ;;  %2512 = vmatpush.msra.mxu0 %v2323_v35 }
 0x3d5   : > { %4380 = vmatmul.msk.f32.gmra.mxu0 %vm2206_vm0, %v2153_v23  ;;  %4384 = vmatmul.msk.f32.gmra.mxu1 %vm2206_vm0, %v2157_v5 }
 0x3d6   : > { %2390 = vmatpush.msra.mxu1 %v2316_v2  ;;  %2513 = vmatpush.msra.mxu0 %v2319_v10  ;;  %v2368_v10 = vld [vmem:[%s8788_s13] sm:$0xf] }
 0x3d7   : > { %v6809_v50 = vperm.slane %v2368_v10, 1 }
 0x3d8   : > { %2391 = vmatpush.msra.mxu1 %v2312_v21  ;;  %2514 = vmatpush.msra.mxu0 %v2315_v63  ;;  %v6796_v21 = vperm.slane %v2368_v10, 0 }
 0x3da   : > { %2392 = vmatpush.msra.mxu1 %v2308_v54  ;;  %2515 = vmatpush.msra.mxu0 %v2311_v46 }
 0x3dc   : > { %2393 = vmatpush.msra.mxu1 %v2304_v22  ;;  %2516 = vmatpush.msra.mxu0 %v2307_v61 }
 0x3e9   : > { %v2179_v15 = vpop.permute.xlu0 %2178 }
 0x3f9   : > { %v2184_v5 = vpop.permute.xlu2 %2183 }
 0x401   : > { %v2194_v11 = vpop.permute.xlu2 %2193 }
 0x409   : > { %v2204_v4 = vpop.permute.xlu2 %2203 }
 0x43a   : > { %v2248_v51 = vpop.f32.mrf.mxu0  ;;  %v2260_v40 = vpop.f32.mrf.mxu1 }
 0x43b   : > { %v2249_v62 = vadd.f32 %v2248_v51, %v2169_v19  ;;  %v2261_v57 = vadd.f32 %v2260_v40, %v2189_v6 }
 0x43d   : > { %v6741_v31 = vadd.f32 %v2249_v62, %v6491_v26  ;;  %v6769_v39 = vadd.f32 %v2261_v57, %v6472_v44  ;;  %v2199_v44 = vpop.permute.xlu1 %2198 }
 0x43f   : > { %8900 = vst [vmem:[#allocation17_spill] sm:$0xff] %v6741_v31  ;;  %v2284_v53 = vmul.f32 %v6738_v20, %v6741_v31  ;;  %v2288_v27 = vmul.f32 %v6738_v20, %v6769_v39 }
 0x440   : > { %8904 = vst [vmem:[#allocation21_spill] sm:$0xff] %v6769_v39  ;;  %v3961_v39 = vld [vmem:[#allocation5 + $0x58] sm:$0xff] }
 0x441   : > { %v2296_v42 = vadd.f32 %v6746_v49, %v2284_v53  ;;  %v2300_v32 = vadd.f32 %v6746_v49, %v2288_v27 }
 0x442   : > { %v2251_v47 = vpop.f32.mrf.mxu0  ;;  %v2263_v7 = vpop.f32.mrf.mxu1 }
 0x443   : > { %v2252_v25 = vadd.f32 %v2251_v47, %v2174_v37  ;;  %2394 = vmatmul.f32.vlgmr.msra.gmra.mxu1 %v2296_v42  ;;  %2435 = vmatmul.f32.vlgmr.msrb.gmra.mxu2 %v2296_v42  ;;  %v2264_v9 = vadd.f32 %v2263_v7, %v2194_v11 }
 0x444   : > { %2476 = vmatmul.f32.vlgmr.msra.gmra.mxu3 %v2296_v42  ;;  %2517 = vmatmul.f32.vlgmr.msra.gmra.mxu0 %v2296_v42 }
 0x445   : > { %v6752_v26 = vadd.f32 %v2252_v25, %v6488_v56  ;;  %v6776_v16 = vadd.f32 %v2264_v9, %v6466_v30 }
 0x447   : > { %8901 = vst [vmem:[#allocation18_spill] sm:$0xff] %v6752_v26  ;;  %v2285_v14 = vmul.f32 %v6738_v20, %v6752_v26  ;;  %v2289_v36 = vmul.f32 %v6738_v20, %v6776_v16 }
 0x448   : > { %8905 = vst [vmem:[#allocation22_spill] sm:$0xff] %v6776_v16 }
 0x449   : > { %v2297_v3 = vadd.f32 %v6746_v49, %v2285_v14  ;;  %v2301_v60 = vadd.f32 %v6746_v49, %v2289_v36 }
 0x44a   : > { %v2254_v43 = vpop.f32.mrf.mxu0 }
 0x44b   : > { %v2255_v13 = vadd.f32 %v2254_v43, %v2179_v15  ;;  %2397 = vmatmul.f32.gmra.mxu1 %v2297_v3  ;;  %2438 = vmatmul.f32.gmra.mxu2 %v2297_v3 }
 0x44c   : > { %2479 = vmatmul.f32.gmra.mxu3 %v2297_v3  ;;  %2520 = vmatmul.f32.gmra.mxu0 %v2297_v3 }
 0x44d   : > { %v6758_v34 = vadd.f32 %v2255_v13, %v6485_v41 }
 0x44f   : > { %8902 = vst [vmem:[#allocation19_spill] sm:$0xff] %v6758_v34  ;;  %v2286_v56 = vmul.f32 %v6738_v20, %v6758_v34  ;;  %v3996_v34 = vld [vmem:[#allocation5 + $0x170] sm:$0xff] }
 0x451   : > { %v2298_v23 = vadd.f32 %v6746_v49, %v2286_v56 }
 0x452   : > { %v2257_v17 = vpop.f32.mrf.mxu0 }
 0x453   : > { %v2258_v58 = vadd.f32 %v2257_v17, %v2184_v5  ;;  %2400 = vmatmul.f32.gmra.mxu1 %v2298_v23  ;;  %2441 = vmatmul.f32.gmra.mxu2 %v2298_v23 }
 0x454   : > { %2482 = vmatmul.f32.gmra.mxu3 %v2298_v23  ;;  %2523 = vmatmul.f32.gmra.mxu0 %v2298_v23 }
 0x455   : > { %v6764_v52 = vadd.f32 %v2258_v58, %v6482_v33  ;;  %v2266_v33 = vpop.f32.mrf.mxu1 }
 0x456   : > { %v2267_v0 = vadd.f32 %v2266_v33, %v2199_v44 }
 0x457   : > { %8903 = vst [vmem:[#allocation20_spill] sm:$0xff] %v6764_v52  ;;  %v2287_v41 = vmul.f32 %v6738_v20, %v6764_v52  ;;  %v3980_v52 = vld [vmem:[#allocation5 + $0xf0] sm:$0xff] }
 0x458   : > { %v6782_v8 = vadd.f32 %v2267_v0, %v6460_v29 }
 0x459   : > { %v2299_v24 = vadd.f32 %v6746_v49, %v2287_v41 }
 0x45a   : > { %8906 = vst [vmem:[#allocation23_spill] sm:$0xff] %v6782_v8  ;;  %v2290_v30 = vmul.f32 %v6738_v20, %v6782_v8 }
 0x45b   : > { %2403 = vmatmul.f32.gmra.mxu1 %v2299_v24  ;;  %2444 = vmatmul.f32.gmra.mxu2 %v2299_v24 }
 0x45c   : > { %2485 = vmatmul.f32.gmra.mxu3 %v2299_v24  ;;  %2526 = vmatmul.f32.gmra.mxu0 %v2299_v24  ;;  %v2302_v2 = vadd.f32 %v6746_v49, %v2290_v30 }
 0x45d   : > { %v2269_v12 = vpop.f32.mrf.mxu1 }
 0x45e   : > { %v2270_v35 = vadd.f32 %v2269_v12, %v2204_v4 }
 0x460   : > { %v6788_v38 = vadd.f32 %v2270_v35, %v6468_v28  ;;  %v6798_v28 = vperm.slane %v2368_v10, 3 }
 0x462   : > { %8907 = vst [vmem:[#allocation24_spill] sm:$0xff] %v6788_v38  ;;  %v2291_v29 = vmul.f32 %v6738_v20, %v6788_v38  ;;  %v6826_v20 = vperm.slane %v2368_v10, 2 }
 0x463   : > { %2406 = vmatmul.f32.gmra.mxu1 %v2300_v32  ;;  %2447 = vmatmul.f32.gmra.mxu2 %v2300_v32 }
 0x464   : > { %2488 = vmatmul.f32.gmra.mxu3 %v2300_v32  ;;  %2529 = vmatmul.f32.gmra.mxu0 %v2300_v32  ;;  %v2303_v45 = vadd.f32 %v6746_v49, %v2291_v29 }
 0x46b   : > { %2409 = vmatmul.f32.gmra.mxu1 %v2301_v60  ;;  %2450 = vmatmul.f32.gmra.mxu2 %v2301_v60 }
 0x46c   : > { %2491 = vmatmul.f32.gmra.mxu3 %v2301_v60  ;;  %2532 = vmatmul.f32.gmra.mxu0 %v2301_v60 }
 0x473   : > { %2412 = vmatmul.f32.gmra.mxu1 %v2302_v2  ;;  %2453 = vmatmul.f32.gmra.mxu2 %v2302_v2 }
 0x474   : > { %2494 = vmatmul.f32.gmra.mxu3 %v2302_v2  ;;  %2535 = vmatmul.f32.gmra.mxu0 %v2302_v2 }
 0x47b   : > { %2415 = vmatmul.f32.gmra.mxu1 %v2303_v45  ;;  %2456 = vmatmul.f32.gmra.mxu2 %v2303_v45 }
 0x47c   : > { %2497 = vmatmul.f32.gmra.mxu3 %v2303_v45  ;;  %2538 = vmatmul.f32.gmra.mxu0 %v2303_v45 }
 0x4c0   : > { %v2395_v1 = vpop.f32.mrf.mxu1 }
 0x4c1   : > { %v6801_v18 = vadd.f32 %v2395_v1, %v6796_v21  ;;  %v2518_v63 = vpop.f32.mrf.mxu0 }
 0x4c2   : > { %v6804_v54 = vadd.f32 %v2518_v63, %v6798_v28 }
 0x4c3   : > { %v6807_v59 = vmul.f32 0.70710677, %v6801_v18 }
 0x4c4   : > { %v6812_v46 = vmul.f32 0.70710677, %v6804_v54 }
 0x4c5   : > { %v2606_v22 = vmul.f32 %v6807_v59, %v6807_v59 }
 0x4c6   : > { %v2726_v55 = vmul.f32 %v6812_v46, %v6812_v46  ;;  %v2436_v48 = vpop.f32.mrf.mxu2 }
 0x4c7   : > { %v6818_v61 = vmin.f32 %v2606_v22, 16.0  ;;  %v6821_v19 = vadd.f32 %v2436_v48, %v6809_v50  ;;  %v2477_v42 = vpop.f32.mrf.mxu3 }
 0x4c8   : > { %v6823_v51 = vmin.f32 %v2726_v55, 16.0  ;;  %v6835_v25 = vadd.f32 %v2477_v42, %v6826_v20  ;;  %v2398_v27 = vpop.f32.mrf.mxu1 }
 0x4c9   : > { %v2619_v62 = vmul.f32 3.8918573e-05, %v6818_v61  ;;  %v6830_v53 = vmul.f32 0.70710677, %v6821_v19  ;;  %v2608_v17 = vmul.f32 2.1237322e-06, %v6818_v61  ;;  %v6856_v36 = vadd.f32 %v2398_v27, %v6796_v21  ;;  %v2521_v55 = vpop.f32.mrf.mxu0 }
 0x4ca   : > { %v2739_v49 = vmul.f32 3.8918573e-05, %v6823_v51  ;;  %v6841_v43 = vmul.f32 0.70710677, %v6835_v25  ;;  %v2728_v57 = vmul.f32 2.1237322e-06, %v6823_v51 }
 0x4cb   : > { %v2620_v37 = vadd.f32 0.001143296, %v2619_v62  ;;  %v2646_v47 = vmul.f32 %v6830_v53, %v6830_v53  ;;  %v2609_v24 = vadd.f32 0.00028619796, %v2608_v17  ;;  %v6864_v29 = vmul.f32 0.70710677, %v6856_v36 }
 0x4cc   : > { %v2740_v14 = vadd.f32 0.001143296, %v2739_v49  ;;  %v2686_v23 = vmul.f32 %v6841_v43, %v6841_v43  ;;  %v2729_v33 = vadd.f32 0.00028619796, %v2728_v57 }
 0x4cd   : > { %v2621_v15 = vmul.f32 %v2620_v37, %v6818_v61  ;;  %v6838_v3 = vmin.f32 %v2646_v47, 16.0  ;;  %v2610_v0 = vmul.f32 %v2609_v24, %v6818_v61  ;;  %v2766_v49 = vmul.f32 %v6864_v29, %v6864_v29 }
 0x4ce   : > { %v2741_v13 = vmul.f32 %v2740_v14, %v6823_v51  ;;  %v6850_v7 = vmin.f32 %v2686_v23, 16.0  ;;  %v2730_v4 = vmul.f32 %v2729_v33, %v6823_v51  ;;  %v6873_v14 = vadd.f32 %v2521_v55, %v6798_v28 }
 0x4cf   : > { %v2622_v40 = vadd.f32 0.014752088, %v2621_v15  ;;  %v2659_v56 = vmul.f32 3.8918573e-05, %v6838_v3  ;;  %v2648_v2 = vmul.f32 2.1237322e-06, %v6838_v3 }
 0x4d0   : > { %v2742_v5 = vadd.f32 0.014752088, %v2741_v13  ;;  %v2699_v32 = vmul.f32 3.8918573e-05, %v6850_v7  ;;  %v2611_v45 = vadd.f32 0.0036580483, %v2610_v0 }
 0x4d1   : > { %v2623_v58 = vmul.f32 %v2622_v40, %v6818_v61  ;;  %v2660_v6 = vadd.f32 0.001143296, %v2659_v56  ;;  %v2731_v63 = vadd.f32 0.0036580483, %v2730_v4  ;;  %v2649_v62 = vadd.f32 0.00028619796, %v2648_v2 }
 0x4d2   : > { %v2743_v41 = vmul.f32 %v2742_v5, %v6823_v51  ;;  %v2700_v30 = vadd.f32 0.001143296, %v2699_v32  ;;  %v2612_v42 = vmul.f32 %v2611_v45, %v6818_v61  ;;  %v6878_v23 = vmin.f32 %v2766_v49, 16.0 }
 0x4d3   : > { %v2624_v11 = vadd.f32 0.112945676, %v2623_v58  ;;  %v2661_v9 = vmul.f32 %v2660_v6, %v6838_v3  ;;  %v2732_v15 = vmul.f32 %v2731_v63, %v6823_v51  ;;  %v2650_v56 = vmul.f32 %v2649_v62, %v6838_v3 }
 0x4d4   : > { %v2744_v44 = vadd.f32 0.112945676, %v2743_v41  ;;  %v2701_v22 = vmul.f32 %v2700_v30, %v6850_v7  ;;  %v2613_v5 = vadd.f32 0.05243302, %v2612_v42  ;;  %v2688_v58 = vmul.f32 2.1237322e-06, %v6850_v7 }
 0x4d5   : > { %v2625_v60 = vmul.f32 %v2624_v11, %v6818_v61  ;;  %v2662_v12 = vadd.f32 0.014752088, %v2661_v9  ;;  %v6885_v57 = vmul.f32 0.70710677, %v6873_v14  ;;  %v2733_v41 = vadd.f32 0.05243302, %v2732_v15 }
 0x4d6   : > { %v2745_v35 = vmul.f32 %v2744_v44, %v6823_v51  ;;  %v2702_v13 = vadd.f32 0.014752088, %v2701_v22  ;;  %v2651_v27 = vadd.f32 0.0036580483, %v2650_v56  ;;  %v2779_v9 = vmul.f32 3.8918573e-05, %v6878_v23 }
 0x4d7   : > { %v2626_v10 = vadd.f32 0.4994258, %v2625_v60  ;;  %v2663_v1 = vmul.f32 %v2662_v12, %v6838_v3  ;;  %v2614_v33 = vmul.f32 %v2613_v5, %v6818_v61  ;;  %v2689_v32 = vadd.f32 0.00028619796, %v2688_v58  ;;  %v2439_v12 = vpop.f32.mrf.mxu2 }
 0x4d8   : > { %v2746_v48 = vadd.f32 0.4994258, %v2745_v35  ;;  %v2703_v24 = vmul.f32 %v2702_v13, %v6850_v7  ;;  %v2886_v0 = vmul.f32 %v6885_v57, %v6885_v57  ;;  %v2734_v4 = vmul.f32 %v2733_v41, %v6823_v51 }
 0x4d9   : > { %v2627_v37 = vmul.f32 %v2626_v10, %v6818_v61  ;;  %v2664_v47 = vadd.f32 0.112945676, %v2663_v1  ;;  %v2652_v30 = vmul.f32 %v2651_v27, %v6838_v3  ;;  %v2780_v35 = vadd.f32 0.001143296, %v2779_v9  ;;  %v2480_v9 = vpop.f32.mrf.mxu3 }
 0x4da   : > { %v2747_v40 = vmul.f32 %v2746_v48, %v6823_v51  ;;  %v2704_v60 = vadd.f32 0.112945676, %v2703_v24  ;;  %v2615_v2 = vadd.f32 0.18741608, %v2614_v33  ;;  %v2690_v45 = vmul.f32 %v2689_v32, %v6850_v7 }
 0x4db   : > { %v6880_v17 = vadd.f32 1.0, %v2627_v37  ;;  %v2665_v6 = vmul.f32 %v2664_v47, %v6838_v3  ;;  %v6900_v1 = vmin.f32 %v2886_v0, 16.0  ;;  %v6903_v63 = vadd.f32 %v2439_v12, %v6809_v50 }
 0x4dc   : > { %v6888_v11 = vadd.f32 1.0, %v2747_v40  ;;  %v2705_v55 = vmul.f32 %v2704_v60, %v6850_v7  ;;  %v2735_v48 = vadd.f32 0.18741608, %v2734_v4  ;;  %v2653_v62 = vadd.f32 0.05243302, %v2652_v30 }
 0x4dd   : > { %4611 = vrcp.f32 %v6880_v17  ;;  %v2666_v44 = vadd.f32 0.4994258, %v2665_v6  ;;  %v2781_v49 = vmul.f32 %v2780_v35, %v6878_v23  ;;  %v2616_v42 = vmul.f32 %v2615_v2, %v6818_v61 }
 0x4de   : > { %4613 = vrcp.f32 %v6888_v11  ;;  %v2691_v37 = vadd.f32 0.0036580483, %v2690_v45  ;;  %v2899_v40 = vmul.f32 3.8918573e-05, %v6900_v1  ;;  %v6918_v56 = vmul.f32 0.70710677, %v6903_v63 }
 0x4df   : > { %v2667_v10 = vmul.f32 %v2666_v44, %v6838_v3  ;;  %v6921_v5 = vmul.f32 0.5, %v6801_v18  ;;  %v6924_v58 = vmul.f32 0.5, %v6804_v54  ;;  %v2706_v61 = vadd.f32 0.4994258, %v2705_v55 }
 0x4e0   : > { %v2736_v6 = vmul.f32 %v2735_v48, %v6823_v51  ;;  %v6928_v41 = vmul.f32 0.5, %v6821_v19  ;;  %v2654_v24 = vmul.f32 %v2653_v62, %v6838_v3  ;;  %v2782_v27 = vadd.f32 0.014752088, %v2781_v49 }
 0x4e1   : > { %v6914_v13 = vadd.f32 1.0, %v2667_v10  ;;  %v2617_v33 = vadd.f32 1.1283791, %v2616_v42  ;;  %v2692_v18 = vmul.f32 %v2691_v37, %v6850_v7  ;;  %v2768_v44 = vmul.f32 2.1237322e-06, %v6878_v23  ;;  %v2401_v10 = vpop.f32.mrf.mxu1 }
 0x4e2   : > { %v2900_v0 = vadd.f32 0.001143296, %v2899_v40  ;;  %v2806_v19 = vmul.f32 %v6918_v56, %v6918_v56  ;;  %v6939_v51 = vmul.f32 0.5, %v6835_v25  ;;  %v2707_v60 = vmul.f32 %v2706_v61, %v6850_v7 }
 0x4e3   : > { %v6905_v22 = vpop.eup %4611  ;;  %4615 = vrcp.f32 %v6914_v13  ;;  %v6943_v12 = vmul.f32 0.5, %v6856_v36  ;;  %v6946_v4 = vadd.f32 %v2480_v9, %v6826_v20  ;;  %v2737_v30 = vadd.f32 1.1283791, %v2736_v6 }
 0x4e4   : > { %v6910_v47 = vpop.eup %4613  ;;  %v2630_v15 = vmul.f32 %v6905_v22, %v6880_v17  ;;  %v2655_v35 = vadd.f32 0.18741608, %v2654_v24  ;;  %v2783_v2 = vmul.f32 %v2782_v27, %v6878_v23  ;;  %v6950_v45 = vmul.f32 0.5, %v6873_v14 }
 0x4e5   : > { %v2750_v32 = vmul.f32 %v6910_v47, %v6888_v11  ;;  %v6953_v55 = vmul.f32 %v2617_v33, %v6807_v59  ;;  %v2638_v25 = vand.u32 2147483647, %v6880_v17  ;;  %v2693_v48 = vadd.f32 0.05243302, %v2692_v18 }
 0x4e6   : > { %v2631_v54 = vsub.f32 1.0, %v2630_v15  ;;  %v2769_v62 = vadd.f32 0.00028619796, %v2768_v44  ;;  %v2901_v42 = vmul.f32 %v2900_v0, %v6900_v1  ;;  %v6958_v37 = vmin.f32 %v2806_v19, 16.0 }
 0x4e7   : > { %v2751_v49 = vsub.f32 1.0, %v2750_v32  ;;  %vm2634_vm8 = vweird.f32 %v6880_v17  ;;  %v6961_v15 = vadd.f32 1.0, %v2707_v60  ;;  %v6964_v14 = vmul.f32 0.70710677, %v6946_v4 }
 0x4e8   : > { %v2632_v36 = vmul.f32 %v6905_v22, %v2631_v54  ;;  %v6967_v59 = vadd.f32 %v2401_v10, %v6796_v21  ;;  %v2640_v61 = vand.u32 2147483648, %v6880_v17  ;;  %v6973_v6 = vmul.f32 %v2737_v30, %v6812_v46 }
 0x4e9   : > { %v6969_v40 = vpop.eup %4615  ;;  %v2656_v24 = vmul.f32 %v2655_v35, %v6838_v3  ;;  %v2784_v27 = vadd.f32 0.112945676, %v2783_v2  ;;  %vm2635_vm9 = vweird.f32 %v6905_v22  ;;  %vm6977_vm10 = vcmp.eq.f32.partialorder %v2638_v25, 8.507059e+37 }
 0x4ea   : > { %v2694_v33 = vmul.f32 %v2693_v48, %v6850_v7  ;;  %v2770_v32 = vmul.f32 %v2769_v62, %v6878_v23  ;;  %v2888_v18 = vmul.f32 2.1237322e-06, %v6900_v1  ;;  %v2633_v44 = vadd.f32 %v6905_v22, %v2632_v36  ;;  %vm7002_vm11 = vmor %vm2634_vm8, %vm2635_vm9 }
 0x4eb   : > { %v2752_v46 = vmul.f32 %v6910_v47, %v2751_v49  ;;  %v2902_v54 = vadd.f32 0.014752088, %v2901_v42  ;;  %v2819_v3 = vmul.f32 3.8918573e-05, %v6958_v37  ;;  %v2670_v0 = vmul.f32 %v6969_v40, %v6914_v13 }
 0x4ec   : > { %4617 = vrcp.f32 %v6961_v15  ;;  %v2846_v19 = vmul.f32 %v6964_v14, %v6964_v14  ;;  %v6993_v60 = vmul.f32 0.70710677, %v6967_v59  ;;  %v2641_v30 = vor.u32 1.1754944e-38, %v2640_v61 }
 0x4ed   : > { %v2758_v35 = vand.u32 2147483647, %v6888_v11  ;;  %v2760_v2 = vand.u32 2147483648, %v6888_v11  ;;  %v2785_v10 = vmul.f32 %v2784_v27, %v6878_v23  ;;  %vm2755_vm12 = vweird.f32 %v6910_v47 }
 0x4ee   : > { %v2657_v48 = vadd.f32 1.1283791, %v2656_v24  ;;  %v2695_v62 = vadd.f32 0.18741608, %v2694_v33  ;;  %v2771_v36 = vadd.f32 0.0036580483, %v2770_v32  ;;  %v2637_v49 = vsel %vm7002_vm11, %v6905_v22, %v2633_v44 }
 0x4ef   : > { %v2753_v42 = vadd.f32 %v6910_v47, %v2752_v46  ;;  %v2903_v61 = vmul.f32 %v2902_v54, %v6900_v1  ;;  %v2820_v27 = vadd.f32 0.001143296, %v2819_v3  ;;  %v2671_v38 = vsub.f32 1.0, %v2670_v0  ;;  %v3965_v32 = vld [vmem:[#allocation5 + $0x78] sm:$0xff] }
 0x4f0   : > { %v2889_v17 = vadd.f32 0.00028619796, %v2888_v18  ;;  %v7012_v8 = vmin.f32 %v2846_v19, 16.0  ;;  %v2926_v16 = vmul.f32 %v6993_v60, %v6993_v60  ;;  %vm2754_vm13 = vweird.f32 %v6888_v11  ;;  %v4013_v44 = vld [vmem:[#allocation5 + $0x1f8] sm:$0xff]  ;;  %4018 = vmatpush.msrb.mxu1 %v3965_v32 }
 0x4f1   : > { %vm7017_vm14 = vcmp.eq.f32.partialorder %v2758_v35, 8.507059e+37  ;;  %v2761_v33 = vor.u32 1.1754944e-38, %v2760_v2  ;;  %v2786_v22 = vadd.f32 0.4994258, %v2785_v10  ;;  %vm7025_vm15 = vmor %vm2754_vm13, %vm2755_vm12  ;;  %v7030_v54 = vmul.f32 %v2657_v48, %v6830_v53  ;;  %4141 = vmatpush.msrb.mxu0 %v4013_v44 }
 0x4f2   : > { %v7021_v46 = vpop.eup %4617  ;;  %v2696_v11 = vmul.f32 %v2695_v62, %v6850_v7  ;;  %v2772_v3 = vmul.f32 %v2771_v36, %v6878_v23  ;;  %v7035_v0 = vmul.f32 0.5, %v6903_v63  ;;  %v2642_v19 = vsel %vm6977_vm10, %v2641_v30, %v2637_v49 }
 0x4f3   : > { %v2757_v35 = vsel %vm7025_vm15, %v6910_v47, %v2753_v42  ;;  %v2904_v2 = vadd.f32 0.112945676, %v2903_v61  ;;  %v2821_v53 = vmul.f32 %v2820_v27, %v6958_v37  ;;  %v2672_v10 = vmul.f32 %v6969_v40, %v2671_v38  ;;  %v2524_v61 = vpop.f32.mrf.mxu0 }
 0x4f4   : > { %8916 = vst [vmem:[#allocation25_spill] sm:$0xff] %v7035_v0  ;;  %v2890_v7 = vmul.f32 %v2889_v17, %v6900_v1  ;;  %v2859_v25 = vmul.f32 3.8918573e-05, %v7012_v8  ;;  %v7046_v63 = vmin.f32 %v2926_v16, 16.0  ;;  %vm2674_vm1 = vweird.f32 %v6914_v13 }
 0x4f5   : > { %v2678_v9 = vand.u32 2147483647, %v6914_v13  ;;  %v2710_v30 = vmul.f32 %v7021_v46, %v6961_v15  ;;  %v2787_v47 = vmul.f32 %v2786_v22, %v6878_v23  ;;  %v2643_v48 = vmul.f32 %v2642_v19, %v6953_v55 }
 0x4f6   : > { %v2762_v38 = vsel %vm7017_vm14, %v2761_v33, %v2757_v35  ;;  %v2680_v62 = vand.u32 2147483648, %v6914_v13  ;;  %v2697_v36 = vadd.f32 1.1283791, %v2696_v11  ;;  %vm2675_vm2 = vweird.f32 %v6969_v40 }
 0x4f7   : > { %v2773_v16 = vadd.f32 0.05243302, %v2772_v3  ;;  %v2905_v49 = vmul.f32 %v2904_v2, %v6900_v1  ;;  %v2822_v42 = vadd.f32 0.014752088, %v2821_v53  ;;  %v2673_v27 = vadd.f32 %v6969_v40, %v2672_v10  ;;  %vm7076_vm4 = vmor %vm2674_vm1, %vm2675_vm2 }
 0x4f8   : > { %v2891_v17 = vadd.f32 0.0036580483, %v2890_v7  ;;  %v2860_v32 = vadd.f32 0.001143296, %v2859_v25  ;;  %v2939_v22 = vmul.f32 3.8918573e-05, %v7046_v63  ;;  %v2763_v11 = vmul.f32 %v2762_v38, %v6973_v6  ;;  %v2442_v38 = vpop.f32.mrf.mxu2 }
 0x4f9   : > { %vm7061_vm3 = vcmp.eq.f32.partialorder %v2678_v9, 8.507059e+37  ;;  %v2711_v24 = vsub.f32 1.0, %v2710_v30  ;;  %v7065_v33 = vadd.f32 1.0, %v2787_v47  ;;  %v2808_v44 = vmul.f32 2.1237322e-06, %v6958_v37 }
 0x4fa   : > { %v4385_v18 = vclamps-f32 %v2643_v48, 1.0  ;;  %v2681_v3 = vor.u32 1.1754944e-38, %v2680_v62  ;;  %v7070_v19 = vadd.f32 %v2524_v61, %v6798_v28  ;;  %v2718_v2 = vand.u32 2147483647, %v6961_v15 }
 0x4fb   : > { %v2774_v53 = vmul.f32 %v2773_v16, %v6878_v23  ;;  %v2906_v10 = vadd.f32 0.4994258, %v2905_v49  ;;  %v2823_v7 = vmul.f32 %v2822_v42, %v6958_v37  ;;  %v2677_v6 = vsel %vm7076_vm4, %v6969_v40, %v2673_v27 }
 0x4fc   : > { %v2892_v25 = vmul.f32 %v2891_v17, %v6900_v1  ;;  %v2861_v9 = vmul.f32 %v2860_v32, %v7012_v8  ;;  %v2940_v13 = vadd.f32 0.001143296, %v2939_v22  ;;  %v2712_v30 = vmul.f32 %v7021_v46, %v2711_v24 }
 0x4fd   : > { %v2720_v47 = vand.u32 2147483648, %v6961_v15  ;;  %4619 = vrcp.f32 %v7065_v33  ;;  %v2809_v48 = vadd.f32 0.00028619796, %v2808_v44  ;;  %v3886_v62 = vadd.f32 1.0, %v4385_v18  ;;  %v4012_v18 = vld [vmem:[#allocation5 + $0x1f0] sm:$0xff] }
 0x4fe   : > { %v4388_v16 = vclamps-f32 %v2763_v11, 1.0  ;;  %v7092_v49 = vmul.f32 %v2697_v36, %v6841_v43  ;;  %v7095_v40 = vmul.f32 0.70710677, %v7070_v19  ;;  %v2682_v42 = vsel %vm7061_vm3, %v2681_v3, %v2677_v6  ;;  %v3964_v36 = vld [vmem:[#allocation5 + $0x70] sm:$0xff]  ;;  %4142 = vmatpush.msrb.mxu0 %v4012_v18  ;;  %v4010_v18 = vld [vmem:[#allocation5 + $0x1e0] sm:$0xff] }
 0x4ff   : > { %v2775_v61 = vadd.f32 0.18741608, %v2774_v53  ;;  %v2907_v27 = vmul.f32 %v2906_v10, %v6900_v1  ;;  %v2824_v17 = vadd.f32 0.112945676, %v2823_v7  ;;  %vm7100_vm5 = vcmp.eq.f32.partialorder %v2718_v2, 8.507059e+37  ;;  %4019 = vmatpush.msrb.mxu1 %v3964_v36  ;;  %v3963_v10 = vld [vmem:[#allocation5 + $0x68] sm:$0xff] }
 0x500   : > { %v2893_v22 = vadd.f32 0.05243302, %v2892_v25  ;;  %v2862_v24 = vadd.f32 0.014752088, %v2861_v9  ;;  %v2941_v44 = vmul.f32 %v2940_v13, %v7046_v63  ;;  %v7106_v43 = vadd.f32 %v2442_v38, %v6809_v50  ;;  %v4011_v7 = vld [vmem:[#allocation5 + $0x1e8] sm:$0xff] }
 0x501   : > { %v2713_v55 = vadd.f32 %v7021_v46, %v2712_v30  ;;  %vm2715_vm6 = vweird.f32 %v7021_v46  ;;  %v2721_v11 = vor.u32 1.1754944e-38, %v2720_v47  ;;  %v2810_v3 = vmul.f32 %v2809_v48, %v6958_v37  ;;  %4020 = vmatpush.msrb.mxu1 %v3963_v10  ;;  %4143 = vmatpush.msrb.mxu0 %v4011_v7 }
 0x502   : > { %vm2714_vm7 = vweird.f32 %v6961_v15  ;;  %v2848_v35 = vmul.f32 2.1237322e-06, %v7012_v8  ;;  %v2928_v2 = vmul.f32 2.1237322e-06, %v7046_v63  ;;  %v3046_v53 = vmul.f32 %v7095_v40, %v7095_v40 }
 0x503   : > { %v7116_v6 = vpop.eup %4619  ;;  %v2683_v25 = vmul.f32 %v2682_v42, %v7030_v54  ;;  %v2776_v9 = vmul.f32 %v2775_v61, %v6878_v23  ;;  %v7120_v13 = vadd.f32 1.0, %v2907_v27  ;;  %v2825_v30 = vmul.f32 %v2824_v17, %v6958_v37  ;;  %vm7125_vm0 = vmor %vm2714_vm7, %vm2715_vm6  ;;  %v3962_v23 = vld [vmem:[#allocation5 + $0x60] sm:$0xff]  ;;  %v3981_v42 = vld [vmem:[#allocation5 + $0xf8] sm:$0xff]  ;;  %4144 = vmatpush.msrb.mxu0 %v4010_v18 }
 0x504   : > { %v2894_v47 = vmul.f32 %v2893_v22, %v6900_v1  ;;  %v2863_v48 = vmul.f32 %v2862_v24, %v7012_v8  ;;  %v2942_v38 = vadd.f32 0.014752088, %v2941_v44  ;;  %v7132_v54 = vmul.f32 0.70710677, %v7106_v43  ;;  %4021 = vmatpush.msrb.mxu1 %v3962_v23  ;;  %4059 = vmatpush.msra.mxu2 %v3981_v42  ;;  %v3997_v22 = vld [vmem:[#allocation5 + $0x178] sm:$0xff] }
 0x505   : > { %v7135_v61 = vmul.f32 %v3886_v62, %v6921_v5  ;;  %v3889_v27 = vadd.f32 1.0, %v4388_v16  ;;  %v2717_v17 = vsel %vm7125_vm0, %v7021_v46, %v2713_v55  ;;  %v2811_v36 = vadd.f32 0.0036580483, %v2810_v3  ;;  %4100 = vmatpush.msrb.mxu3 %v3997_v22 }
 0x506   : > { %v2790_v24 = vmul.f32 %v7116_v6, %v7065_v33  ;;  %v2849_v44 = vadd.f32 0.00028619796, %v2848_v35  ;;  %v2929_v10 = vadd.f32 0.00028619796, %v2928_v2  ;;  %v7142_v7 = vmin.f32 %v3046_v53, 16.0  ;;  %4022 = vmatpush.msrb.mxu1 %v3961_v39  ;;  %4060 = vmatpush.msra.mxu2 %v3980_v52 }
 0x507   : > { %v4386_v5 = vclamps-f32 %v2683_v25, 1.0  ;;  %v2777_v62 = vadd.f32 1.1283791, %v2776_v9  ;;  %v2826_v16 = vadd.f32 0.4994258, %v2825_v30  ;;  %v2966_v46 = vmul.f32 %v7132_v54, %v7132_v54  ;;  %4101 = vmatpush.msrb.mxu3 %v3996_v34 }
 0x508   : > { %v2895_v55 = vadd.f32 0.18741608, %v2894_v47  ;;  %4621 = vrcp.f32 %v7120_v13  ;;  %v2864_v3 = vadd.f32 0.112945676, %v2863_v48  ;;  %v2943_v15 = vmul.f32 %v2942_v38, %v7046_v63 }
 0x509   : > { %v7149_v23 = vmul.f32 %v3889_v27, %v6924_v58  ;;  %v2722_v35 = vsel %vm7100_vm5, %v2721_v11, %v2717_v17  ;;  %v2800_v2 = vand.u32 2147483648, %v7065_v33  ;;  %v2812_v53 = vmul.f32 %v2811_v36, %v6958_v37  ;;  %v2483_v36 = vpop.f32.mrf.mxu3 }
 0x50a   : > { %v2791_v25 = vsub.f32 1.0, %v2790_v24  ;;  %v2850_v9 = vmul.f32 %v2849_v44, %v7012_v8  ;;  %v2930_v30 = vmul.f32 %v2929_v10, %v7046_v63  ;;  %v3059_v47 = vmul.f32 3.8918573e-05, %v7142_v7 }
 0x50b   : > { %v3887_v48 = vadd.f32 1.0, %v4386_v5  ;;  %v7159_v38 = vmul.f32 %v2777_v62, %v6864_v29  ;;  %v2827_v58 = vmul.f32 %v2826_v16, %v6958_v37  ;;  %v7162_v42 = vmin.f32 %v2966_v46, 16.0 }
 0x50c   : > { %v2723_v32 = vmul.f32 %v2722_v35, %v7092_v49  ;;  %v2896_v11 = vmul.f32 %v2895_v55, %v6900_v1  ;;  %v2865_v27 = vmul.f32 %v2864_v3, %v7012_v8  ;;  %v2944_v17 = vadd.f32 0.112945676, %v2943_v15 }
 0x50d   : > { %vm2794_vm8 = vweird.f32 %v7065_v33  ;;  %v2798_v22 = vand.u32 2147483647, %v7065_v33  ;;  %v7169_v18 = vor.u32 1.1754944e-38, %v2800_v2  ;;  %v2813_v29 = vadd.f32 0.05243302, %v2812_v53  ;;  %v2404_v2 = vpop.f32.mrf.mxu1 }
 0x50e   : > { %v7171_v24 = vpop.eup %4621  ;;  %v2792_v44 = vmul.f32 %v7116_v6, %v2791_v25  ;;  %v2851_v10 = vadd.f32 0.0036580483, %v2850_v9  ;;  %v2931_v5 = vadd.f32 0.0036580483, %v2930_v30  ;;  %v3060_v49 = vadd.f32 0.001143296, %v3059_v47 }
 0x50f   : > { %v7175_v1 = vmul.f32 %v3887_v48, %v6928_v41  ;;  %v7177_v62 = vadd.f32 1.0, %v2827_v58  ;;  %v2979_v16 = vmul.f32 3.8918573e-05, %v7162_v42  ;;  %v7181_v46 = vadd.f32 %v2483_v36, %v6826_v20 }
 0x510   : > { %v4387_v55 = vclamps-f32 %v2723_v32, 1.0  ;;  %v2897_v3 = vadd.f32 1.1283791, %v2896_v11  ;;  %v2866_v15 = vadd.f32 0.4994258, %v2865_v27  ;;  %v2945_v35 = vmul.f32 %v2944_v17, %v7046_v63 }
 0x511   : > { %vm2795_vm9 = vweird.f32 %v7116_v6  ;;  %vm7185_vm10 = vcmp.eq.f32.partialorder %v2798_v22, 8.507059e+37  ;;  %v2910_v41 = vmul.f32 %v7171_v24, %v7120_v13  ;;  %v2814_v25 = vmul.f32 %v2813_v29, %v6958_v37  ;;  %v2486_v0 = vpop.f32.mrf.mxu3 }
 0x512   : > { %v7193_v9 = vmul.f32 0.5, %v6946_v4  ;;  %v2793_v30 = vadd.f32 %v7116_v6, %v2792_v44  ;;  %v2852_v47 = vmul.f32 %v2851_v10, %v7012_v8  ;;  %v2932_v48 = vmul.f32 %v2931_v5, %v7046_v63  ;;  %vm7214_vm11 = vmor %vm2794_vm8, %vm2795_vm9 }
 0x513   : > { %v3061_v58 = vmul.f32 %v3060_v49, %v7142_v7  ;;  %4623 = vrcp.f32 %v7177_v62  ;;  %v2980_v32 = vadd.f32 0.001143296, %v2979_v16  ;;  %v7201_v11 = vmul.f32 0.70710677, %v7181_v46 }
 0x514   : > { %8927 = vst [vmem:[#allocation26_spill] sm:$0xff] %v7193_v9  ;;  %v7204_v27 = vadd.f32 %v2404_v2, %v6796_v21  ;;  %v3888_v17 = vadd.f32 1.0, %v4387_v55  ;;  %v2918_v4 = vand.u32 2147483647, %v7120_v13  ;;  %v2867_v36 = vmul.f32 %v2866_v15, %v7012_v8 }
 0x515   : > { %v2946_v22 = vadd.f32 0.4994258, %v2945_v35  ;;  %v2911_v29 = vsub.f32 1.0, %v2910_v41  ;;  %v2920_v44 = vand.u32 2147483648, %v7120_v13  ;;  %v2815_v10 = vadd.f32 0.18741608, %v2814_v25 }
 0x516   : > { %v3048_v5 = vmul.f32 2.1237322e-06, %v7142_v7  ;;  %v7219_v16 = vmul.f32 %v2897_v3, %v6885_v57  ;;  %v2853_v55 = vadd.f32 0.05243302, %v2852_v47  ;;  %v2933_v15 = vadd.f32 0.05243302, %v2932_v48 }
 0x517   : > { %v3062_v35 = vadd.f32 0.014752088, %v3061_v58  ;;  %v2797_v2 = vsel %vm7214_vm11, %v7116_v6, %v2793_v30  ;;  %v2981_v41 = vmul.f32 %v2980_v32, %v7162_v42  ;;  %v3006_v25 = vmul.f32 %v7201_v11, %v7201_v11  ;;  %v4009_v30 = vld [vmem:[#allocation5 + $0x1d8] sm:$0xff] }
 0x518   : > { %v7228_v33 = vmul.f32 0.70710677, %v7204_v27  ;;  %v7231_v57 = vmul.f32 %v3888_v17, %v6939_v51  ;;  %v7233_v3 = vadd.f32 1.0, %v2867_v36  ;;  %v7236_v47 = vmul.f32 0.5, %v6967_v59  ;;  %4145 = vmatpush.msrb.mxu0 %v4009_v30  ;;  %v2527_v36 = vpop.f32.mrf.mxu0 }
 0x519   : > { %v2947_v6 = vmul.f32 %v2946_v22, %v7046_v63  ;;  %v7239_v48 = vpop.eup %4623  ;;  %v2912_v58 = vmul.f32 %v7171_v24, %v2911_v29  ;;  %vm2914_vm12 = vweird.f32 %v7120_v13  ;;  %v2816_v32 = vmul.f32 %v2815_v10, %v6958_v37 }
 0x51a   : > { %8930 = vst [vmem:[#allocation27_spill] sm:$0xff] %v7236_v47  ;;  %v3049_v51 = vadd.f32 0.00028619796, %v3048_v5  ;;  %v2802_v59 = vsel %vm7185_vm10, %v7169_v18, %v2797_v2  ;;  %v2921_v17 = vor.u32 1.1754944e-38, %v2920_v44  ;;  %v2854_v39 = vmul.f32 %v2853_v55, %v7012_v8 }
 0x51b   : > { %v3063_v52 = vmul.f32 %v3062_v35, %v7142_v7  ;;  %vm7249_vm13 = vcmp.eq.f32.partialorder %v2918_v4, 8.507059e+37  ;;  %v2934_v29 = vmul.f32 %v2933_v15, %v7046_v63  ;;  %v2982_v37 = vadd.f32 0.014752088, %v2981_v41 }
 0x51c   : > { %v7254_v10 = vmin.f32 %v3006_v25, 16.0  ;;  %v3086_v34 = vmul.f32 %v7228_v33, %v7228_v33  ;;  %vm2915_vm14 = vweird.f32 %v7171_v24  ;;  %v2830_v18 = vmul.f32 %v7239_v48, %v7177_v62 }
 0x51d   : > { %4625 = vrcp.f32 %v7233_v3  ;;  %v7262_v53 = vadd.f32 1.0, %v2947_v6  ;;  %v2913_v4 = vadd.f32 %v7171_v24, %v2912_v58  ;;  %v2817_v44 = vadd.f32 1.1283791, %v2816_v32  ;;  %vm7283_vm15 = vmor %vm2914_vm12, %vm2915_vm14 }
 0x51e   : > { %v3050_v5 = vmul.f32 %v3049_v51, %v7142_v7  ;;  %v7267_v49 = vadd.f32 %v2527_v36, %v6798_v28  ;;  %v7270_v55 = vmul.f32 %v2802_v59, %v7159_v38  ;;  %v2855_v15 = vadd.f32 0.18741608, %v2854_v39 }
 0x51f   : > { %v7273_v35 = vmul.f32 0.5, %v7070_v19  ;;  %v3064_v2 = vadd.f32 0.112945676, %v3063_v52  ;;  %v2935_v41 = vadd.f32 0.18741608, %v2934_v29  ;;  %v2983_v25 = vmul.f32 %v2982_v37, %v7162_v42 }
 0x520   : > { %v3019_v6 = vmul.f32 3.8918573e-05, %v7254_v10  ;;  %v7277_v30 = vmin.f32 %v3086_v34, 16.0  ;;  %v2831_v38 = vsub.f32 1.0, %v2830_v18  ;;  %v2840_v19 = vand.u32 2147483648, %v7177_v62 }
 0x521   : > { %8933 = vst [vmem:[#allocation28_spill] sm:$0xff] %v7273_v35  ;;  %4627 = vrcp.f32 %v7262_v53  ;;  %v2968_v32 = vmul.f32 2.1237322e-06, %v7162_v42  ;;  %v2917_v51 = vsel %vm7283_vm15, %v7171_v24, %v2913_v4  ;;  %v7294_v59 = vmul.f32 %v2817_v44, %v6918_v56  ;;  %v2445_v4 = vpop.f32.mrf.mxu2  ;;  %v3979_v35 = vld [vmem:[#allocation5 + $0xe8] sm:$0xff] }
 0x522   : > { %v3051_v39 = vadd.f32 0.0036580483, %v3050_v5  ;;  %v7297_v13 = vmul.f32 0.70710677, %v7267_v49  ;;  %vm2834_vm1 = vweird.f32 %v7177_v62  ;;  %v2838_v36 = vand.u32 2147483647, %v7177_v62  ;;  %4061 = vmatpush.msra.mxu2 %v3979_v35 }
 0x523   : > { %v7299_v52 = vpop.eup %4625  ;;  %v2856_v29 = vmul.f32 %v2855_v15, %v7012_v8  ;;  %v3065_v37 = vmul.f32 %v3064_v2, %v7142_v7  ;;  %v2936_v34 = vmul.f32 %v2935_v41, %v7046_v63  ;;  %v2984_v24 = vadd.f32 0.112945676, %v2983_v25 }
 0x524   : > { %v3020_v18 = vadd.f32 0.001143296, %v3019_v6  ;;  %v3099_v56 = vmul.f32 3.8918573e-05, %v7277_v30  ;;  %v2922_v44 = vsel %vm7249_vm13, %v2921_v17, %v2917_v51  ;;  %v2832_v5 = vmul.f32 %v7239_v48, %v2831_v38 }
 0x525   : > { %v7310_v58 = vor.u32 1.1754944e-38, %v2840_v19  ;;  %v2969_v26 = vadd.f32 0.00028619796, %v2968_v32  ;;  %vm2835_vm2 = vweird.f32 %v7239_v48  ;;  %v2870_v8 = vmul.f32 %v7299_v52, %v7233_v3 }
 0x526   : > { %v3052_v63 = vmul.f32 %v3051_v39, %v7142_v7  ;;  %v3206_v15 = vmul.f32 %v7297_v13, %v7297_v13  ;;  %v2857_v41 = vadd.f32 1.1283791, %v2856_v29  ;;  %v3066_v22 = vadd.f32 0.4994258, %v3065_v37  ;;  %vm7352_vm4 = vmor %vm2834_vm1, %vm2835_vm2 }
 0x527   : > { %v7318_v2 = vpop.eup %4627  ;;  %v7321_v17 = vmul.f32 0.5, %v7106_v43  ;;  %v7324_v25 = vadd.f32 %v2445_v4, %v6809_v50  ;;  %vm7326_vm3 = vcmp.eq.f32.partialorder %v2838_v36, 8.507059e+37  ;;  %v2937_v38 = vadd.f32 1.1283791, %v2936_v34 }
 0x528   : > { %v2985_v19 = vmul.f32 %v2984_v24, %v7162_v42  ;;  %v3021_v32 = vmul.f32 %v3020_v18, %v7254_v10  ;;  %v3100_v51 = vadd.f32 0.001143296, %v3099_v56  ;;  %v2833_v39 = vadd.f32 %v7239_v48, %v2832_v5  ;;  %v3960_v5 = vld [vmem:[#allocation5 + $0x50] sm:$0xff] }
 0x529   : > { %8936 = vst [vmem:[#allocation29_spill] sm:$0xff] %v7321_v17  ;;  %v2878_v29 = vand.u32 2147483647, %v7233_v3  ;;  %v2880_v43 = vand.u32 2147483648, %v7233_v3  ;;  %v2970_v37 = vmul.f32 %v2969_v26, %v7162_v42  ;;  %v2871_v4 = vsub.f32 1.0, %v2870_v8  ;;  %4023 = vmatpush.msrb.mxu1 %v3960_v5  ;;  %v3958_v26 = vld [vmem:[#allocation5 + $0x40] sm:$0xff] }
 0x52a   : > { %v2950_v36 = vmul.f32 %v7318_v2, %v7262_v53  ;;  %v3053_v31 = vadd.f32 0.05243302, %v3052_v63  ;;  %v7338_v17 = vmin.f32 %v3206_v15, 16.0  ;;  %v7341_v34 = vmul.f32 %v2922_v44, %v7219_v16  ;;  %v3995_v15 = vld [vmem:[#allocation5 + $0x168] sm:$0xff] }
 0x52b   : > { %v3067_v24 = vmul.f32 %v3066_v22, %v7142_v7  ;;  %v3008_v18 = vmul.f32 2.1237322e-06, %v7254_v10  ;;  %v7346_v56 = vmul.f32 0.70710677, %v7324_v25  ;;  %v7357_v16 = vmul.f32 %v2857_v41, %v6964_v14  ;;  %v4008_v22 = vld [vmem:[#allocation5 + $0x1d0] sm:$0xff]  ;;  %4102 = vmatpush.msrb.mxu3 %v3995_v15  ;;  %v3959_v14 = vld [vmem:[#allocation5 + $0x48] sm:$0xff] }
 0x52c   : > { %v2986_v44 = vadd.f32 0.4994258, %v2985_v19  ;;  %v3022_v8 = vadd.f32 0.014752088, %v3021_v32  ;;  %v3101_v63 = vmul.f32 %v3100_v51, %v7277_v30  ;;  %vm2874_vm5 = vweird.f32 %v7233_v3  ;;  %4146 = vmatpush.msrb.mxu0 %v4008_v22  ;;  %v3978_v41 = vld [vmem:[#allocation5 + $0xe0] sm:$0xff]  ;;  %4024 = vmatpush.msrb.mxu1 %v3959_v14 }
 0x52d   : > { %v7361_v47 = vor.u32 1.1754944e-38, %v2880_v43  ;;  %v7364_v62 = vmul.f32 %v2937_v38, %v6993_v60  ;;  %v2971_v9 = vadd.f32 0.0036580483, %v2970_v37  ;;  %v3994_v19 = vld [vmem:[#allocation5 + $0x160] sm:$0xff]  ;;  %v2837_v35 = vsel %vm7352_vm4, %v7239_v48, %v2833_v39  ;;  %4062 = vmatpush.msra.mxu2 %v3978_v41  ;;  %v4007_v60 = vld [vmem:[#allocation5 + $0x1c8] sm:$0xff]  ;;  %v3977_v48 = vld [vmem:[#allocation5 + $0xd8] sm:$0xff] }
 0x52e   : > { %v2951_v32 = vsub.f32 1.0, %v2950_v36  ;;  %v3054_v51 = vmul.f32 %v3053_v31, %v7142_v7  ;;  %v3219_v43 = vmul.f32 3.8918573e-05, %v7338_v17  ;;  %v2872_v38 = vmul.f32 %v7299_v52, %v2871_v4  ;;  %4103 = vmatpush.msrb.mxu3 %v3994_v19  ;;  %4147 = vmatpush.msrb.mxu0 %v4007_v60  ;;  %v3993_v39 = vld [vmem:[#allocation5 + $0x158] sm:$0xff] }
 0x52f   : > { %v7372_v37 = vadd.f32 1.0, %v3067_v24  ;;  %v3009_v5 = vadd.f32 0.00028619796, %v3008_v18  ;;  %v3126_v15 = vmul.f32 %v7346_v56, %v7346_v56  ;;  %vm2954_vm6 = vweird.f32 %v7262_v53  ;;  %4025 = vmatpush.msrb.mxu1 %v3958_v26  ;;  %4063 = vmatpush.msra.mxu2 %v3977_v48  ;;  %v4006_v24 = vld [vmem:[#allocation5 + $0x1c0] sm:$0xff] }
 0x530   : > { %v2987_v31 = vmul.f32 %v2986_v44, %v7162_v42  ;;  %v3023_v36 = vmul.f32 %v3022_v8, %v7254_v10  ;;  %v3102_v22 = vadd.f32 0.014752088, %v3101_v63  ;;  %v7380_v4 = vadd.f32 %v2486_v0, %v6826_v20  ;;  %4104 = vmatpush.msrb.mxu3 %v3993_v39  ;;  %4148 = vmatpush.msrb.mxu0 %v4006_v24 }
 0x531   : > { %v2842_v18 = vsel %vm7326_vm3, %v7310_v58, %v2837_v35  ;;  %vm2875_vm7 = vweird.f32 %v7299_v52  ;;  %v2958_v14 = vand.u32 2147483647, %v7262_v53  ;;  %v2972_v41 = vmul.f32 %v2971_v9, %v7162_v42 }
 0x532   : > { %vm7388_vm0 = vcmp.eq.f32.partialorder %v2878_v29, 8.507059e+37  ;;  %v2952_v0 = vmul.f32 %v7318_v2, %v2951_v32  ;;  %v3055_v8 = vadd.f32 0.18741608, %v3054_v51  ;;  %v3088_v63 = vmul.f32 2.1237322e-06, %v7277_v30  ;;  %vm7414_vm9 = vmor %vm2874_vm5, %vm2875_vm7 }
 0x533   : > { %v3220_v19 = vadd.f32 0.001143296, %v3219_v43  ;;  %v2873_v58 = vadd.f32 %v7299_v52, %v2872_v38  ;;  %4629 = vrcp.f32 %v7372_v37  ;;  %v3010_v6 = vmul.f32 %v3009_v5, %v7254_v10 }
 0x534   : > { %v7397_v35 = vmin.f32 %v3126_v15, 16.0  ;;  %v7399_v9 = vadd.f32 1.0, %v2987_v31  ;;  %v3024_v29 = vadd.f32 0.112945676, %v3023_v36  ;;  %v3103_v60 = vmul.f32 %v3102_v22, %v7277_v30 }
 0x535   : > { %v7403_v26 = vmul.f32 0.70710677, %v7380_v4  ;;  %v7406_v32 = vmul.f32 %v2842_v18, %v7294_v59  ;;  %vm2955_vm8 = vweird.f32 %v7318_v2  ;;  %v2960_v51 = vand.u32 2147483648, %v7262_v53 }
 0x536   : > { %v2973_v43 = vadd.f32 0.05243302, %v2972_v41  ;;  %v2953_v5 = vadd.f32 %v7318_v2, %v2952_v0  ;;  %v3089_v15 = vadd.f32 0.00028619796, %v3088_v63  ;;  %v3208_v48 = vmul.f32 2.1237322e-06, %v7338_v17  ;;  %vm7436_vm10 = vmor %vm2954_vm6, %vm2955_vm8 }
 0x537   : > { %8943 = vst [vmem:[#allocation30_spill] sm:$0xff] %v7406_v32  ;;  %v3221_v59 = vmul.f32 %v3220_v19, %v7338_v17  ;;  %v2877_v39 = vsel %vm7414_vm9, %v7299_v52, %v2873_v58  ;;  %v3056_v31 = vmul.f32 %v3055_v8, %v7142_v7  ;;  %v3011_v36 = vadd.f32 0.0036580483, %v3010_v6  ;;  %v3976_v7 = vld [vmem:[#allocation5 + $0xd0] sm:$0xff] }
 0x538   : > { %v3139_v3 = vmul.f32 3.8918573e-05, %v7397_v35  ;;  %4631 = vrcp.f32 %v7399_v9  ;;  %v3025_v22 = vmul.f32 %v3024_v29, %v7254_v10  ;;  %v3104_v24 = vadd.f32 0.112945676, %v3103_v60  ;;  %4064 = vmatpush.msra.mxu2 %v3976_v7 }
 0x539   : > { %v3166_v18 = vmul.f32 %v7403_v26, %v7403_v26  ;;  %v7430_v41 = vpop.eup %4629  ;;  %vm7440_vm11 = vcmp.eq.f32.partialorder %v2958_v14, 8.507059e+37  ;;  %v2961_v0 = vor.u32 1.1754944e-38, %v2960_v51  ;;  %v2974_v8 = vmul.f32 %v2973_v43, %v7162_v42  ;;  %v2407_v43 = vpop.f32.mrf.mxu1 }
 0x53a   : > { %v7446_v63 = vmul.f32 0.5, %v7181_v46  ;;  %v2957_v19 = vsel %vm7436_vm10, %v7318_v2, %v2953_v5  ;;  %v3090_v53 = vmul.f32 %v3089_v15, %v7277_v30  ;;  %v3209_v58 = vadd.f32 0.00028619796, %v3208_v48 }
 0x53b   : > { %v3222_v6 = vadd.f32 0.014752088, %v3221_v59  ;;  %v2882_v14 = vsel %vm7388_vm0, %v7361_v47, %v2877_v39  ;;  %v3057_v29 = vadd.f32 1.1283791, %v3056_v31  ;;  %v3012_v60 = vmul.f32 %v3011_v36, %v7254_v10 }
 0x53c   : > { %8950 = vst [vmem:[#allocation31_spill] sm:$0xff] %v7446_v63  ;;  %v3140_v51 = vadd.f32 0.001143296, %v3139_v3  ;;  %v3078_v46 = vand.u32 2147483647, %v7372_v37  ;;  %v3105_v63 = vmul.f32 %v3104_v24, %v7277_v30  ;;  %v7458_v52 = vmin.f32 %v3166_v18, 16.0 }
 0x53d   : > { %v3026_v38 = vadd.f32 0.4994258, %v3025_v22  ;;  %v2962_v2 = vsel %vm7440_vm11, %v2961_v0, %v2957_v19  ;;  %v3070_v5 = vmul.f32 %v7430_v41, %v7372_v37  ;;  %v3080_v47 = vand.u32 2147483648, %v7372_v37  ;;  %v3957_v18 = vld [vmem:[#allocation5 + $0x38] sm:$0xff]  ;;  %v3992_v0 = vld [vmem:[#allocation5 + $0x150] sm:$0xff] }
 0x53e   : > { %v2975_v44 = vadd.f32 0.18741608, %v2974_v8  ;;  %v7465_v15 = vpop.eup %4631  ;;  %v3091_v48 = vadd.f32 0.0036580483, %v3090_v53  ;;  %v3210_v59 = vmul.f32 %v3209_v58, %v7338_v17  ;;  %v3223_v39 = vmul.f32 %v3222_v6, %v7338_v17  ;;  %v2530_v6 = vpop.f32.mrf.mxu0  ;;  %4026 = vmatpush.msrb.mxu1 %v3957_v18  ;;  %4105 = vmatpush.msrb.mxu3 %v3992_v0 }
 0x53f   : > { %v7470_v31 = vadd.f32 %v2407_v43, %v6796_v21  ;;  %v7473_v36 = vmul.f32 %v3057_v29, %v7095_v40  ;;  %v3013_v3 = vadd.f32 0.05243302, %v3012_v60  ;;  %v7476_v22 = vmul.f32 0.5, %v7204_v27  ;;  %v4005_v40 = vld [vmem:[#allocation5 + $0x1b8] sm:$0xff] }
 0x540   : > { %v3141_v24 = vmul.f32 %v3140_v51, %v7397_v35  ;;  %v7480_v8 = vmul.f32 %v2882_v14, %v7357_v16  ;;  %v3027_v19 = vmul.f32 %v3026_v38, %v7254_v10  ;;  %v3106_v53 = vadd.f32 0.4994258, %v3105_v63  ;;  %4149 = vmatpush.msrb.mxu0 %v4005_v40 }
 0x541   : > { %8951 = vst [vmem:[#allocation32_spill] sm:$0xff] %v7476_v22  ;;  %v3179_v58 = vmul.f32 3.8918573e-05, %v7458_v52  ;;  %v7485_v27 = vmul.f32 %v2962_v2, %v7364_v62  ;;  %v3071_v29 = vsub.f32 1.0, %v3070_v5  ;;  %v7487_v60 = vor.u32 1.1754944e-38, %v3080_v47 }
 0x542   : > { %8952 = vst [vmem:[#allocation33_spill] sm:$0xff] %v7480_v8  ;;  %v2990_v51 = vmul.f32 %v7465_v15, %v7399_v9  ;;  %v3092_v16 = vmul.f32 %v3091_v48, %v7277_v30  ;;  %v3211_v63 = vadd.f32 0.0036580483, %v3210_v59  ;;  %v3224_v14 = vadd.f32 0.112945676, %v3223_v39 }
 0x543   : > { %8953 = vst [vmem:[#allocation34_spill] sm:$0xff] %v7485_v27  ;;  %v7493_v43 = vmul.f32 0.70710677, %v7470_v31  ;;  %vm3074_vm12 = vweird.f32 %v7372_v37  ;;  %v2976_v62 = vmul.f32 %v2975_v44, %v7162_v42  ;;  %v3014_v38 = vmul.f32 %v3013_v3, %v7254_v10 }
 0x544   : > { %v3142_v2 = vadd.f32 0.014752088, %v3141_v24  ;;  %v7499_v5 = vadd.f32 %v2530_v6, %v6798_v28  ;;  %v7501_v47 = vadd.f32 1.0, %v3027_v19  ;;  %v3107_v18 = vmul.f32 %v3106_v53, %v7277_v30 }
 0x545   : > { %v3180_v48 = vadd.f32 0.001143296, %v3179_v58  ;;  %v3246_v59 = vmul.f32 %v7493_v43, %v7493_v43  ;;  %v3072_v39 = vmul.f32 %v7430_v41, %v3071_v29  ;;  %vm3075_vm13 = vweird.f32 %v7430_v41 }
 0x546   : > { %v2991_v7 = vsub.f32 1.0, %v2990_v51  ;;  %v7509_v42 = vmul.f32 0.5, %v7267_v49  ;;  %v3093_v44 = vadd.f32 0.05243302, %v3092_v16  ;;  %v3212_v3 = vmul.f32 %v3211_v63, %v7338_v17  ;;  %vm7543_vm15 = vmor %vm3074_vm12, %vm3075_vm13 }
 0x547   : > { %v3225_v24 = vmul.f32 %v3224_v14, %v7338_v17  ;;  %v3128_v0 = vmul.f32 2.1237322e-06, %v7397_v35  ;;  %vm7514_vm14 = vcmp.eq.f32.partialorder %v3078_v46, 8.507059e+37  ;;  %v2977_v53 = vadd.f32 1.1283791, %v2976_v62 }
 0x548   : > { %8954 = vst [vmem:[#allocation35_spill] sm:$0xff] %v7509_v42  ;;  %v3143_v58 = vmul.f32 %v3142_v2, %v7397_v35  ;;  %v7519_v6 = vmin.f32 %v3246_v59, 16.0  ;;  %v7522_v40 = vmul.f32 0.70710677, %v7499_v5  ;;  %v3015_v49 = vadd.f32 0.18741608, %v3014_v38 }
 0x549   : > { %4633 = vrcp.f32 %v7501_v47  ;;  %v7525_v29 = vadd.f32 1.0, %v3107_v18  ;;  %v3181_v51 = vmul.f32 %v3180_v48, %v7458_v52  ;;  %v3073_v46 = vadd.f32 %v7430_v41, %v3072_v39 }
 0x54a   : > { %v2992_v16 = vmul.f32 %v7465_v15, %v2991_v7  ;;  %v2998_v63 = vand.u32 2147483647, %v7399_v9  ;;  %v3000_v14 = vand.u32 2147483648, %v7399_v9  ;;  %v3094_v62 = vmul.f32 %v3093_v44, %v7277_v30 }
 0x54b   : > { %v3213_v2 = vadd.f32 0.05243302, %v3212_v3  ;;  %v3226_v59 = vadd.f32 0.4994258, %v3225_v24  ;;  %v3129_v42 = vadd.f32 0.00028619796, %v3128_v0  ;;  %v7534_v38 = vmul.f32 %v2977_v53, %v7132_v54 }
 0x54c   : > { %v3144_v18 = vadd.f32 0.112945676, %v3143_v58  ;;  %v3259_v22 = vmul.f32 3.8918573e-05, %v7519_v6  ;;  %v3366_v48 = vmul.f32 %v7522_v40, %v7522_v40  ;;  %vm2994_vm1 = vweird.f32 %v7399_v9 }
 0x54d   : > { %v3016_v7 = vmul.f32 %v3015_v49, %v7254_v10  ;;  %4635 = vrcp.f32 %v7525_v29  ;;  %v3182_v54 = vadd.f32 0.014752088, %v3181_v51  ;;  %v3077_v44 = vsel %vm7543_vm15, %v7430_v41, %v3073_v46 }
 0x54e   : > { %v2993_v3 = vadd.f32 %v7465_v15, %v2992_v16  ;;  %vm2995_vm2 = vweird.f32 %v7465_v15  ;;  %vm7555_vm3 = vcmp.eq.f32.partialorder %v2998_v63, 8.507059e+37  ;;  %v3001_v24 = vor.u32 1.1754944e-38, %v3000_v14  ;;  %v2448_v63 = vpop.f32.mrf.mxu2 }
 0x54f   : > { %v7559_v0 = vpop.eup %4633  ;;  %v3095_v53 = vadd.f32 0.18741608, %v3094_v62  ;;  %v3214_v10 = vmul.f32 %v3213_v2, %v7338_v17  ;;  %v3227_v58 = vmul.f32 %v3226_v59, %v7338_v17  ;;  %v3130_v49 = vmul.f32 %v3129_v42, %v7397_v35  ;;  %vm7573_vm4 = vmor %vm2994_vm1, %vm2995_vm2 }
 0x550   : > { %v3145_v41 = vmul.f32 %v3144_v18, %v7397_v35  ;;  %v3168_v51 = vmul.f32 2.1237322e-06, %v7458_v52  ;;  %v3260_v46 = vadd.f32 0.001143296, %v3259_v22  ;;  %v7566_v16 = vmin.f32 %v3366_v48, 16.0 }
 0x551   : > { %v3082_v14 = vsel %vm7514_vm14, %v7487_v60, %v3077_v44  ;;  %v3017_v2 = vadd.f32 1.1283791, %v3016_v7  ;;  %v7578_v42 = vmul.f32 0.5, %v7324_v25  ;;  %v3183_v59 = vmul.f32 %v3182_v54, %v7458_v52  ;;  %v3956_v54 = vld [vmem:[#allocation5 + $0x30] sm:$0xff]  ;;  %v3975_v44 = vld [vmem:[#allocation5 + $0xc8] sm:$0xff] }
 0x552   : > { %v2997_v22 = vsel %vm7573_vm4, %v7465_v15, %v2993_v3  ;;  %v3030_v19 = vmul.f32 %v7559_v0, %v7501_v47  ;;  %v3379_v9 = vmul.f32 3.8918573e-05, %v7566_v16  ;;  %v3096_v48 = vmul.f32 %v3095_v53, %v7277_v30  ;;  %v3991_v15 = vld [vmem:[#allocation5 + $0x148] sm:$0xff]  ;;  %4027 = vmatpush.msrb.mxu1 %v3956_v54  ;;  %4065 = vmatpush.msra.mxu2 %v3975_v44  ;;  %v3973_v44 = vld [vmem:[#allocation5 + $0xb8] sm:$0xff] }
 0x553   : > { %8963 = vst [vmem:[#allocation36_spill] sm:$0xff] %v7578_v42  ;;  %v7588_v18 = vpop.eup %4635  ;;  %v7591_v39 = vadd.f32 1.0, %v3227_v58  ;;  %v3131_v25 = vadd.f32 0.0036580483, %v3130_v49  ;;  %v7594_v7 = vadd.f32 %v2448_v63, %v6809_v50  ;;  %v3215_v3 = vadd.f32 0.18741608, %v3214_v10  ;;  %4106 = vmatpush.msrb.mxu3 %v3991_v15 }
 0x554   : > { %v3146_v62 = vadd.f32 0.4994258, %v3145_v41  ;;  %v3169_v42 = vadd.f32 0.00028619796, %v3168_v51  ;;  %v3261_v60 = vmul.f32 %v3260_v46, %v7519_v6  ;;  %v7598_v27 = vmul.f32 %v3082_v14, %v7473_v36  ;;  %v4004_v49 = vld [vmem:[#allocation5 + $0x1b0] sm:$0xff]  ;;  %v3955_v63 = vld [vmem:[#allocation5 + $0x28] sm:$0xff]  ;;  %v2489_v36 = vpop.f32.mrf.mxu3 }
 0x555   : > { %v7601_v30 = vmul.f32 %v3017_v2, %v7201_v11  ;;  %v7604_v53 = vmul.f32 0.5, %v7380_v4  ;;  %v3184_v58 = vadd.f32 0.112945676, %v3183_v59  ;;  %v3974_v10 = vld [vmem:[#allocation5 + $0xc0] sm:$0xff]  ;;  %v3031_v41 = vsub.f32 1.0, %v3030_v19  ;;  %4150 = vmatpush.msrb.mxu0 %v4004_v49  ;;  %4028 = vmatpush.msrb.mxu1 %v3955_v63  ;;  %v4003_v14 = vld [vmem:[#allocation5 + $0x1a8] sm:$0xff] }
 0x556   : > { %8964 = vst [vmem:[#allocation37_spill] sm:$0xff] %v7598_v27  ;;  %v3040_v51 = vand.u32 2147483648, %v7501_v47  ;;  %v3110_v46 = vmul.f32 %v7588_v18, %v7525_v29  ;;  %v3380_v54 = vadd.f32 0.001143296, %v3379_v9  ;;  %v3990_v11 = vld [vmem:[#allocation5 + $0x140] sm:$0xff]  ;;  %v3002_v4 = vsel %vm7555_vm3, %v3001_v24, %v2997_v22  ;;  %4066 = vmatpush.msra.mxu2 %v3974_v10  ;;  %v3989_v9 = vld [vmem:[#allocation5 + $0x138] sm:$0xff] }
 0x557   : > { %8965 = vst [vmem:[#allocation38_spill] sm:$0xff] %v7604_v53  ;;  %4637 = vrcp.f32 %v7591_v39  ;;  %v3132_v2 = vmul.f32 %v3131_v25, %v7397_v35  ;;  %v7614_v59 = vmul.f32 0.70710677, %v7594_v7  ;;  %4107 = vmatpush.msrb.mxu3 %v3990_v11  ;;  %v3954_v19 = vld [vmem:[#allocation5 + $0x20] sm:$0xff]  ;;  %vm3034_vm5 = vweird.f32 %v7501_v47  ;;  %4151 = vmatpush.msrb.mxu0 %v4003_v14 }
 0x558   : > { %v3097_v15 = vadd.f32 1.1283791, %v3096_v48  ;;  %v3147_v49 = vmul.f32 %v3146_v62, %v7397_v35  ;;  %v3170_v37 = vmul.f32 %v3169_v42, %v7458_v52  ;;  %v3262_v24 = vadd.f32 0.014752088, %v3261_v60  ;;  %4029 = vmatpush.msrb.mxu1 %v3954_v19  ;;  %4067 = vmatpush.msra.mxu2 %v3973_v44  ;;  %v4002_v48 = vld [vmem:[#allocation5 + $0x1a0] sm:$0xff] }
 0x559   : > { %v3185_v22 = vmul.f32 %v3184_v58, %v7458_v52  ;;  %v3248_v25 = vmul.f32 2.1237322e-06, %v7519_v6  ;;  %v3286_v63 = vmul.f32 %v7614_v59, %v7614_v59  ;;  %v7624_v10 = vadd.f32 %v2489_v36, %v6826_v20  ;;  %4108 = vmatpush.msrb.mxu3 %v3989_v9  ;;  %4152 = vmatpush.msrb.mxu0 %v4002_v48 }
 0x55a   : > { %v7627_v62 = vmul.f32 %v3002_v4, %v7534_v38  ;;  %v3032_v42 = vmul.f32 %v7559_v0, %v3031_v41  ;;  %v3041_v60 = vor.u32 1.1754944e-38, %v3040_v51  ;;  %v3111_v11 = vsub.f32 1.0, %v3110_v46 }
 0x55b   : > { %v3118_v58 = vand.u32 2147483647, %v7525_v29  ;;  %v3216_v14 = vmul.f32 %v3215_v3, %v7338_v17  ;;  %v3133_v19 = vadd.f32 0.05243302, %v3132_v2  ;;  %v3381_v53 = vmul.f32 %v3380_v54, %v7566_v16 }
 0x55c   : > { %8966 = vst [vmem:[#allocation39_spill] sm:$0xff] %v7627_v62  ;;  %v7633_v36 = vadd.f32 1.0, %v3147_v49  ;;  %v3171_v44 = vadd.f32 0.0036580483, %v3170_v37  ;;  %v3263_v9 = vmul.f32 %v3262_v24, %v7519_v6  ;;  %v7636_v27 = vmin.f32 %v3286_v63, 16.0 }
 0x55d   : > { %v7638_v38 = vpop.eup %4637  ;;  %v8967_v41 = vand.u32 2147483647, %v7501_v47  ;;  %v7647_v17 = vmul.f32 %v3097_v15, %v7228_v33  ;;  %v3186_v3 = vadd.f32 0.4994258, %v3185_v22  ;;  %v3249_v46 = vadd.f32 0.00028619796, %v3248_v25 }
 0x55e   : > { %v7650_v54 = vmul.f32 0.70710677, %v7624_v10  ;;  %v3033_v4 = vadd.f32 %v7559_v0, %v3032_v42  ;;  %vm3035_vm7 = vweird.f32 %v7559_v0  ;;  %v3112_v2 = vmul.f32 %v7588_v18, %v3111_v11 }
 0x55f   : > { %vm7642_vm6 = vcmp.eq.f32.partialorder %v8967_v41, 8.507059e+37  ;;  %v3120_v49 = vand.u32 2147483648, %v7525_v29  ;;  %vm3114_vm0 = vweird.f32 %v7525_v29  ;;  %v3217_v37 = vadd.f32 1.1283791, %v3216_v14  ;;  %vm7664_vm8 = vmor %vm3034_vm5, %vm3035_vm7 }
 0x560   : > { %v3134_v24 = vmul.f32 %v3133_v19, %v7397_v35  ;;  %v3382_v33 = vadd.f32 0.014752088, %v3381_v53  ;;  %v3230_v15 = vmul.f32 %v7638_v38, %v7591_v39  ;;  %v3172_v22 = vmul.f32 %v3171_v44, %v7458_v52 }
 0x561   : > { %v3264_v25 = vadd.f32 0.112945676, %v3263_v9  ;;  %v3299_v63 = vmul.f32 3.8918573e-05, %v7636_v27  ;;  %vm7668_vm9 = vcmp.eq.f32.partialorder %v3118_v58, 8.507059e+37  ;;  %4639 = vrcp.f32 %v7633_v36 }
 0x562   : > { %v3187_v53 = vmul.f32 %v3186_v3, %v7458_v52  ;;  %v3250_v11 = vmul.f32 %v3249_v46, %v7519_v6  ;;  %v3326_v14 = vmul.f32 %v7650_v54, %v7650_v54  ;;  %v3037_v47 = vsel %vm7664_vm8, %v7559_v0, %v3033_v4  ;;  %v2410_v46 = vpop.f32.mrf.mxu1 }
 0x563   : > { %v3113_v19 = vadd.f32 %v7588_v18, %v3112_v2  ;;  %vm3115_vm10 = vweird.f32 %v7588_v18  ;;  %v3121_v58 = vor.u32 1.1754944e-38, %v3120_v49  ;;  %v3135_v44 = vadd.f32 0.18741608, %v3134_v24 }
 0x564   : > { %v3368_v9 = vmul.f32 2.1237322e-06, %v7566_v16  ;;  %v3383_v41 = vmul.f32 %v3382_v33, %v7566_v16  ;;  %v7684_v3 = vmin.f32 %v3326_v14, 16.0  ;;  %v7687_v62 = vmul.f32 %v3217_v37, %v7297_v13  ;;  %vm7692_vm11 = vmor %vm3114_vm0, %vm3115_vm10  ;;  %v3953_v14 = vld [vmem:[#allocation5 + $0x18] sm:$0xff] }
 0x565   : > { %v3231_v8 = vsub.f32 1.0, %v3230_v15  ;;  %v3265_v48 = vmul.f32 %v3264_v25, %v7519_v6  ;;  %v3300_v0 = vadd.f32 0.001143296, %v3299_v63  ;;  %v3173_v2 = vadd.f32 0.05243302, %v3172_v22  ;;  %4030 = vmatpush.msrb.mxu1 %v3953_v14 }
 0x566   : > { %v7696_v49 = vadd.f32 1.0, %v3187_v53  ;;  %v7699_v24 = vmul.f32 0.5, %v7470_v31  ;;  %v3251_v33 = vadd.f32 0.0036580483, %v3250_v11  ;;  %v3042_v13 = vsel %vm7642_vm6, %v3041_v60, %v3037_v47  ;;  %v3972_v47 = vld [vmem:[#allocation5 + $0xb0] sm:$0xff] }
 0x567   : > { %v3117_v37 = vsel %vm7692_vm11, %v7588_v18, %v3113_v19  ;;  %vm3234_vm12 = vweird.f32 %v7591_v39  ;;  %v3238_v29 = vand.u32 2147483647, %v7591_v39  ;;  %v7709_v15 = vadd.f32 %v2410_v46, %v6796_v21  ;;  %v7711_v22 = vpop.eup %4639  ;;  %v3988_v19 = vld [vmem:[#allocation5 + $0x130] sm:$0xff]  ;;  %4068 = vmatpush.msra.mxu2 %v3972_v47 }
 0x568   : > { %8976 = vst [vmem:[#allocation40_spill] sm:$0xff] %v7699_v24  ;;  %v3136_v31 = vmul.f32 %v3135_v44, %v7397_v35  ;;  %v3369_v25 = vadd.f32 0.00028619796, %v3368_v9  ;;  %v3384_v63 = vadd.f32 0.112945676, %v3383_v41  ;;  %v3232_v60 = vmul.f32 %v7638_v38, %v3231_v8  ;;  %v7724_v8 = vld [vmem:[#allocation5 + $0x198] sm:$0xff]  ;;  %4109 = vmatpush.msrb.mxu3 %v3988_v19 }
 0x569   : > { %v3339_v51 = vmul.f32 3.8918573e-05, %v7684_v3  ;;  %v3240_v53 = vand.u32 2147483648, %v7591_v39  ;;  %v3266_v18 = vadd.f32 0.4994258, %v3265_v48  ;;  %v3301_v11 = vmul.f32 %v3300_v0, %v7636_v27  ;;  %4153 = vmatpush.msrb.mxu0 %v7724_v8 }
 0x56a   : > { %v7719_v46 = vmul.f32 %v3042_v13, %v7601_v30  ;;  %v3174_v4 = vmul.f32 %v3173_v2, %v7458_v52  ;;  %4641 = vrcp.f32 %v7696_v49  ;;  %v3252_v35 = vmul.f32 %v3251_v33, %v7519_v6  ;;  %v2533_v2 = vpop.f32.mrf.mxu0 }
 0x56b   : > { %v3122_v44 = vsel %vm7668_vm9, %v3121_v58, %v3117_v37  ;;  %vm3235_vm13 = vweird.f32 %v7638_v38  ;;  %vm7729_vm14 = vcmp.eq.f32.partialorder %v3238_v29, 8.507059e+37  ;;  %v3150_v30 = vmul.f32 %v7711_v22, %v7633_v36 }
 0x56c   : > { %8977 = vst [vmem:[#allocation41_spill] sm:$0xff] %v7719_v46  ;;  %v7736_v41 = vmul.f32 0.70710677, %v7709_v15  ;;  %v3137_v48 = vadd.f32 1.1283791, %v3136_v31  ;;  %v3370_v0 = vmul.f32 %v3369_v25, %v7566_v16  ;;  %v3385_v42 = vmul.f32 %v3384_v63, %v7566_v16  ;;  %vm7761_vm15 = vmor %vm3234_vm12, %vm3235_vm13 }
 0x56d   : > { %v3340_v58 = vadd.f32 0.001143296, %v3339_v51  ;;  %v3233_v33 = vadd.f32 %v7638_v38, %v3232_v60  ;;  %v3267_v13 = vmul.f32 %v3266_v18, %v7519_v6  ;;  %v3288_v37 = vmul.f32 2.1237322e-06, %v7636_v27 }
 0x56e   : > { %v3302_v29 = vadd.f32 0.014752088, %v3301_v11  ;;  %v3241_v14 = vor.u32 1.1754944e-38, %v3240_v53  ;;  %v3175_v47 = vadd.f32 0.18741608, %v3174_v4  ;;  %v7745_v19 = vmul.f32 0.5, %v7499_v5 }
 0x56f   : > { %v3253_v24 = vadd.f32 0.05243302, %v3252_v35  ;;  %v7748_v31 = vmul.f32 %v3122_v44, %v7647_v17  ;;  %v3151_v25 = vsub.f32 1.0, %v3150_v30  ;;  %v3406_v63 = vmul.f32 %v7736_v41, %v7736_v41 }
 0x570   : > { %8980 = vst [vmem:[#allocation42_spill] sm:$0xff] %v7745_v19  ;;  %v7753_v51 = vadd.f32 %v2533_v2, %v6798_v28  ;;  %v7755_v60 = vpop.eup %4641  ;;  %v7766_v5 = vmul.f32 %v3137_v48, %v7346_v56  ;;  %v3371_v17 = vadd.f32 0.0036580483, %v3370_v0  ;;  %v3386_v18 = vadd.f32 0.4994258, %v3385_v42 }
 0x571   : > { %8981 = vst [vmem:[#allocation43_spill] sm:$0xff] %v7748_v31  ;;  %v3341_v11 = vmul.f32 %v3340_v58, %v7684_v3  ;;  %v3237_v4 = vsel %vm7761_vm15, %v7638_v38, %v3233_v33  ;;  %vm3154_vm1 = vweird.f32 %v7633_v36  ;;  %v7773_v35 = vadd.f32 1.0, %v3267_v13 }
 0x572   : > { %v3289_v39 = vadd.f32 0.00028619796, %v3288_v37  ;;  %v3303_v44 = vmul.f32 %v3302_v29, %v7636_v27  ;;  %v3158_v30 = vand.u32 2147483647, %v7633_v36  ;;  %v3160_v56 = vand.u32 2147483648, %v7633_v36 }
 0x573   : > { %v3176_v48 = vmul.f32 %v3175_v47, %v7458_v52  ;;  %v3254_v0 = vmul.f32 %v3253_v24, %v7519_v6  ;;  %v3152_v42 = vmul.f32 %v7711_v22, %v3151_v25  ;;  %v3190_v38 = vmul.f32 %v7755_v60, %v7696_v49  ;;  %v3951_v25 = vld [vmem:[#allocation5 + $0x8] sm:$0xff] }
 0x574   : > { %v7783_v58 = vmin.f32 %v3406_v63, 16.0  ;;  %v7786_v2 = vmul.f32 0.70710677, %v7753_v51  ;;  %v7790_v33 = vsel %vm7729_vm14, %v3241_v14, %v3237_v4  ;;  %v3372_v13 = vmul.f32 %v3371_v17, %v7566_v16 }
 0x575   : > { %v3387_v52 = vmul.f32 %v3386_v18, %v7566_v16  ;;  %v3342_v37 = vadd.f32 0.014752088, %v3341_v11  ;;  %4643 = vrcp.f32 %v7773_v35  ;;  %v3290_v24 = vmul.f32 %v3289_v39, %v7636_v27 }
 0x576   : > { %v3304_v29 = vadd.f32 0.112945676, %v3303_v44  ;;  %v3526_v47 = vmul.f32 %v7786_v2, %v7786_v2  ;;  %vm7798_vm2 = vcmp.eq.f32.partialorder %v3158_v30, 8.507059e+37  ;;  %v3161_v9 = vor.u32 1.1754944e-38, %v3160_v56 }
 0x577   : > { %v3200_v14 = vand.u32 2147483648, %v7696_v49  ;;  %v3255_v63 = vadd.f32 0.18741608, %v3254_v0  ;;  %v3328_v53 = vmul.f32 2.1237322e-06, %v7684_v3  ;;  %v3153_v17 = vadd.f32 %v7711_v22, %v3152_v42  ;;  %v2451_v42 = vpop.f32.mrf.mxu2 }
 0x578   : > { %vm3155_vm3 = vweird.f32 %v7711_v22  ;;  %v3191_v18 = vsub.f32 1.0, %v3190_v38  ;;  %v3419_v11 = vmul.f32 3.8918573e-05, %v7783_v58  ;;  %v3177_v4 = vadd.f32 1.1283791, %v3176_v48 }
 0x579   : > { %v3373_v39 = vadd.f32 0.05243302, %v3372_v13  ;;  %v7807_v44 = vadd.f32 1.0, %v3387_v52  ;;  %v3343_v30 = vmul.f32 %v3342_v37, %v7684_v3  ;;  %v7811_v56 = vmul.f32 0.5, %v7594_v7  ;;  %vm7818_vm4 = vmor %vm3154_vm1, %vm3155_vm3 }
 0x57a   : > { %v3291_v19 = vadd.f32 0.0036580483, %v3290_v24  ;;  %v3305_v0 = vmul.f32 %v3304_v29, %v7636_v27  ;;  %v7814_v31 = vmin.f32 %v3526_v47, 16.0  ;;  %v3198_v48 = vand.u32 2147483647, %v7696_v49 }
 0x57b   : > { %8986 = vst [vmem:[#allocation44_spill] sm:$0xff] %v7811_v56  ;;  %v7823_v13 = vor.u32 1.1754944e-38, %v3200_v14  ;;  %v3256_v52 = vmul.f32 %v3255_v63, %v7519_v6  ;;  %v3329_v7 = vadd.f32 0.00028619796, %v3328_v53  ;;  %v7826_v37 = vpop.eup %4643  ;;  %v3157_v24 = vsel %vm7818_vm4, %v7711_v22, %v3153_v17 }
 0x57c   : > { %v3192_v29 = vmul.f32 %v7755_v60, %v3191_v18  ;;  %v7833_v36 = vmul.f32 0.5, %v7624_v10  ;;  %v3420_v47 = vadd.f32 0.001143296, %v3419_v11  ;;  %v3374_v56 = vmul.f32 %v3373_v39, %v7566_v16 }
 0x57d   : > { %4645 = vrcp.f32 %v7807_v44  ;;  %v3344_v14 = vadd.f32 0.112945676, %v3343_v30  ;;  %v7838_v6 = vadd.f32 %v2451_v42, %v6809_v50  ;;  %v3292_v63 = vmul.f32 %v3291_v19, %v7636_v27  ;;  %v3952_v30 = vld [vmem:[#allocation5 + $0x10] sm:$0xff]  ;;  %v3971_v42 = vld [vmem:[#allocation5 + $0xa8] sm:$0xff] }
 0x57e   : > { %8989 = vst [vmem:[#allocation45_spill] sm:$0xff] %v7833_v36  ;;  %v3306_v53 = vadd.f32 0.4994258, %v3305_v0  ;;  %v7842_v38 = vmul.f32 0.5, %v7709_v15  ;;  %v3539_v22 = vmul.f32 3.8918573e-05, %v7814_v31  ;;  %v3270_v18 = vmul.f32 %v7826_v37, %v7773_v35  ;;  %4031 = vmatpush.msrb.mxu1 %v3952_v30  ;;  %4069 = vmatpush.msra.mxu2 %v3971_v42 }
 0x57f   : > { %vm7845_vm5 = vcmp.eq.f32.partialorder %v3198_v48, 8.507059e+37  ;;  %v3257_v17 = vadd.f32 1.1283791, %v3256_v52  ;;  %v3330_v39 = vmul.f32 %v3329_v7, %v7684_v3  ;;  %v3162_v19 = vsel %vm7798_vm2, %v3161_v9, %v3157_v24  ;;  %v3987_v48 = vld [vmem:[#allocation5 + $0x128] sm:$0xff]  ;;  %v7858_v52 = vld [vmem:[#allocation5 + $0x190] sm:$0xff]  ;;  %v3970_v9 = vld [vmem:[#allocation5 + $0xa0] sm:$0xff] }
 0x580   : > { %8990 = vst [vmem:[#allocation46_spill] sm:$0xff] %v7842_v38  ;;  %vm3195_vm6 = vweird.f32 %v7755_v60  ;;  %v3408_v15 = vmul.f32 2.1237322e-06, %v7783_v58  ;;  %v3421_v0 = vmul.f32 %v3420_v47, %v7783_v58  ;;  %v3193_v38 = vadd.f32 %v7755_v60, %v3192_v29  ;;  %4110 = vmatpush.msrb.mxu3 %v3987_v48  ;;  %4154 = vmatpush.msrb.mxu0 %v7858_v52  ;;  %v7871_v29 = vld [vmem:[#allocation5 + $0x188] sm:$0xff] }
 0x581   : > { %v3375_v11 = vadd.f32 0.18741608, %v3374_v56  ;;  %v3345_v7 = vmul.f32 %v3344_v14, %v7684_v3  ;;  %v7863_v36 = vmul.f32 0.70710677, %v7838_v6  ;;  %v7867_v24 = vmul.f32 %v7790_v33, %v7687_v62  ;;  %4032 = vmatpush.msrb.mxu1 %v3951_v25  ;;  %v3986_v56 = vld [vmem:[#allocation5 + $0x120] sm:$0xff]  ;;  %v2492_v62 = vpop.f32.mrf.mxu3  ;;  %4070 = vmatpush.msra.mxu2 %v3970_v9 }
 0x582   : > { %v3293_v47 = vadd.f32 0.05243302, %v3292_v63  ;;  %v3307_v30 = vmul.f32 %v3306_v53, %v7636_v27  ;;  %v3540_v46 = vadd.f32 0.001143296, %v3539_v22  ;;  %v3178_v42 = vmul.f32 %v3177_v4, %v7403_v26  ;;  %4111 = vmatpush.msrb.mxu3 %v3986_v56  ;;  %v3950_v33 = vld [vmem:[#allocation5] sm:$0xff]  ;;  %v3969_v63 = vld [vmem:[#allocation5 + $0x98] sm:$0xff]  ;;  %4155 = vmatpush.msrb.mxu0 %v7871_v29  ;;  %v2413_v56 = vpop.f32.mrf.mxu1 }
 0x583   : > { %v7873_v14 = vpop.eup %4645  ;;  %vm3194_vm7 = vweird.f32 %v7696_v49  ;;  %v3271_v48 = vsub.f32 1.0, %v3270_v18  ;;  %v3331_v32 = vadd.f32 0.0036580483, %v3330_v39  ;;  %v3985_v53 = vld [vmem:[#allocation5 + $0x118] sm:$0xff]  ;;  %v7878_v22 = vmul.f32 %v3162_v19, %v7766_v5  ;;  %4033 = vmatpush.msrb.mxu1 %v3950_v33  ;;  %v7890_v18 = vld [vmem:[#allocation5 + $0x180] sm:$0xff]  ;;  %4071 = vmatpush.msra.mxu2 %v3969_v63 }
 0x584   : > { %vm7882_vm0 = vmor %vm3194_vm7, %vm3195_vm6  ;;  %v7887_v26 = vmul.f32 %v3257_v17, %v7493_v43  ;;  %v3409_v49 = vadd.f32 0.00028619796, %v3408_v15  ;;  %v3422_v4 = vadd.f32 0.014752088, %v3421_v0  ;;  %v3280_v39 = vand.u32 2147483648, %v7773_v35  ;;  %4112 = vmatpush.msrb.mxu3 %v3985_v53  ;;  %4156 = vmatpush.msrb.mxu0 %v7890_v18 }
 0x585   : > { %v3197_v5 = vsel %vm7882_vm0, %v7755_v60, %v3193_v38  ;;  %v3346_v19 = vadd.f32 0.4994258, %v3345_v7  ;;  %v3446_v9 = vmul.f32 %v7863_v36, %v7863_v36  ;;  %vm3274_vm8 = vweird.f32 %v7773_v35  ;;  %4034 = vmatmul.f32.vlgmr.msrb.gmra.mxu1 %v7135_v61  ;;  %4157 = vmatmul.f32.vlgmr.msrb.gmra.mxu0 %v7149_v23 }
 0x586   : > { %v3390_v43 = vmul.f32 %v7873_v14, %v7807_v44  ;;  %v7901_v17 = vadd.f32 1.0, %v3307_v30  ;;  %v3541_v15 = vmul.f32 %v3540_v46, %v7814_v31  ;;  %v7905_v60 = vadd.f32 %v2492_v62, %v6826_v20 }
 0x587   : > { %v3272_v38 = vmul.f32 %v7826_v37, %v3271_v48  ;;  %v3376_v0 = vmul.f32 %v3375_v11, %v7566_v16  ;;  %v3294_v7 = vmul.f32 %v3293_v47, %v7636_v27  ;;  %v3332_v33 = vmul.f32 %v3331_v32, %v7684_v3 }
 0x588   : > { %v3202_v46 = vsel %vm7845_vm5, %v7823_v13, %v3197_v5  ;;  %v3410_v30 = vmul.f32 %v3409_v49, %v7783_v58  ;;  %v3423_v62 = vmul.f32 %v3422_v4, %v7783_v58  ;;  %v7920_v61 = vadd.f32 %v2413_v56, %v6796_v21 }
 0x589   : > { %vm3275_vm9 = vweird.f32 %v7826_v37  ;;  %v3347_v16 = vmul.f32 %v3346_v19, %v7684_v3  ;;  %v3528_v11 = vmul.f32 2.1237322e-06, %v7814_v31  ;;  %v7925_v32 = vmin.f32 %v3446_v9, 16.0 }
 0x58a   : > { %v3391_v23 = vsub.f32 1.0, %v3390_v43  ;;  %4647 = vrcp.f32 %v7901_v17  ;;  %v3542_v10 = vadd.f32 0.014752088, %v3541_v15  ;;  %v7929_v13 = vmul.f32 0.70710677, %v7905_v60  ;;  %vm7957_vm11 = vmor %vm3274_vm8, %vm3275_vm9 }
 0x58b   : > { %v3273_v47 = vadd.f32 %v7826_v37, %v3272_v38  ;;  %v8995_v48 = vand.u32 2147483647, %v7773_v35  ;;  %v3377_v53 = vadd.f32 1.1283791, %v3376_v0  ;;  %v3295_v25 = vadd.f32 0.18741608, %v3294_v7 }
 0x58c   : > { %v3333_v49 = vadd.f32 0.05243302, %v3332_v33  ;;  %v3411_v4 = vadd.f32 0.0036580483, %v3410_v30  ;;  %v3424_v5 = vadd.f32 0.112945676, %v3423_v62  ;;  %v3486_v19 = vmul.f32 %v7929_v13, %v7929_v13 }
 0x58d   : > { %vm7934_vm10 = vcmp.eq.f32.partialorder %v8995_v48, 8.507059e+37  ;;  %v7941_v9 = vmul.f32 0.70710677, %v7920_v61  ;;  %v3281_v56 = vor.u32 1.1754944e-38, %v3280_v39  ;;  %v7943_v43 = vadd.f32 1.0, %v3347_v16 }
 0x58e   : > { %v3529_v15 = vadd.f32 0.00028619796, %v3528_v11  ;;  %v3459_v38 = vmul.f32 3.8918573e-05, %v7925_v32  ;;  %v7946_v48 = vmul.f32 %v3202_v46, %v3178_v42  ;;  %v3392_v0 = vmul.f32 %v7873_v14, %v3391_v23 }
 0x58f   : > { %v7950_v7 = vmul.f32 0.5, %v7753_v51  ;;  %v3543_v33 = vmul.f32 %v3542_v10, %v7814_v31  ;;  %v3378_v30 = vmul.f32 %v3377_v53, %v7522_v40  ;;  %v3398_v42 = vand.u32 2147483647, %v7807_v44 }
 0x590   : > { %v3296_v46 = vmul.f32 %v3295_v25, %v7636_v27  ;;  %v7964_v62 = vmin.f32 %v3486_v19, 16.0  ;;  %v7966_v51 = vpop.eup %4647  ;;  %v3277_v16 = vsel %vm7957_vm11, %v7826_v37, %v3273_v47  ;;  %v3334_v35 = vmul.f32 %v3333_v49, %v7684_v3  ;;  %v3968_v19 = vld [vmem:[#allocation5 + $0x90] sm:$0xff] }
 0x591   : > { %8998 = vst [vmem:[#allocation47_spill] sm:$0xff] %v7950_v7  ;;  %v3425_v11 = vmul.f32 %v3424_v5, %v7783_v58  ;;  %v3566_v23 = vmul.f32 %v7941_v9, %v7941_v9  ;;  %4649 = vrcp.f32 %v7943_v43  ;;  %v3412_v40 = vmul.f32 %v3411_v4, %v7783_v58  ;;  %v3984_v4 = vld [vmem:[#allocation5 + $0x110] sm:$0xff]  ;;  %4072 = vmatpush.msra.mxu2 %v3968_v19 }
 0x592   : > { %v3530_v27 = vmul.f32 %v3529_v15, %v7814_v31  ;;  %v3460_v10 = vadd.f32 0.001143296, %v3459_v38  ;;  %v3393_v53 = vadd.f32 %v7873_v14, %v3392_v0  ;;  %vm3395_vm12 = vweird.f32 %v7873_v14  ;;  %4113 = vmatpush.msrb.mxu3 %v3984_v4 }
 0x593   : > { %v3400_v37 = vand.u32 2147483648, %v7807_v44  ;;  %v3544_v47 = vadd.f32 0.112945676, %v3543_v33  ;;  %vm3394_vm13 = vweird.f32 %v7807_v44  ;;  %v3297_v25 = vadd.f32 1.1283791, %v3296_v46 }
 0x594   : > { %v3310_v49 = vmul.f32 %v7966_v51, %v7901_v17  ;;  %v3499_v5 = vmul.f32 3.8918573e-05, %v7964_v62  ;;  %v3282_v15 = vsel %vm7934_vm10, %v3281_v56, %v3277_v16  ;;  %v3335_v38 = vadd.f32 0.18741608, %v3334_v35  ;;  %vm7991_vm14 = vmor %vm3394_vm13, %vm3395_vm12 }
 0x595   : > { %v3426_v0 = vadd.f32 0.4994258, %v3425_v11  ;;  %v7987_v39 = vmin.f32 %v3566_v23, 16.0  ;;  %vm7995_vm15 = vcmp.eq.f32.partialorder %v3398_v42, 8.507059e+37  ;;  %v3413_v46 = vadd.f32 0.05243302, %v3412_v40 }
 0x596   : > { %v3531_v7 = vadd.f32 0.0036580483, %v3530_v27  ;;  %v3461_v63 = vmul.f32 %v3460_v10, %v7925_v32  ;;  %v3397_v56 = vsel %vm7991_vm14, %v7873_v14, %v3393_v53  ;;  %v3401_v16 = vor.u32 1.1754944e-38, %v3400_v37  ;;  %v2536_v37 = vpop.f32.mrf.mxu0 }
 0x597   : > { %v3545_v35 = vmul.f32 %v3544_v47, %v7814_v31  ;;  %v3579_v11 = vmul.f32 3.8918573e-05, %v7987_v39  ;;  %v8005_v23 = vpop.eup %4649  ;;  %v8008_v42 = vmul.f32 %v3282_v15, %v7887_v26  ;;  %v8011_v19 = vmul.f32 %v3297_v25, %v7614_v59 }
 0x598   : > { %v3311_v40 = vsub.f32 1.0, %v3310_v49  ;;  %v3500_v27 = vadd.f32 0.001143296, %v3499_v5  ;;  %v3320_v10 = vand.u32 2147483648, %v7901_v17  ;;  %v3336_v4 = vmul.f32 %v3335_v38, %v7684_v3 }
 0x599   : > { %9005 = vst [vmem:[#allocation48_spill] sm:$0xff] %v8008_v42  ;;  %v3427_v14 = vmul.f32 %v3426_v0, %v7783_v58  ;;  %v3448_v53 = vmul.f32 2.1237322e-06, %v7925_v32  ;;  %v3402_v47 = vsel %vm7995_vm15, %v3401_v16, %v3397_v56  ;;  %v3414_v26 = vmul.f32 %v3413_v46, %v7783_v58 }
 0x59a   : > { %v3532_v15 = vmul.f32 %v3531_v7, %v7814_v31  ;;  %v3462_v59 = vadd.f32 0.014752088, %v3461_v63  ;;  %v3318_v25 = vand.u32 2147483647, %v7901_v17  ;;  %v3350_v49 = vmul.f32 %v8005_v23, %v7943_v43 }
 0x59b   : > { %v3546_v5 = vadd.f32 0.4994258, %v3545_v35  ;;  %v3580_v3 = vadd.f32 0.001143296, %v3579_v11  ;;  %v3312_v38 = vmul.f32 %v7966_v51, %v3311_v40  ;;  %vm3314_vm1 = vweird.f32 %v7901_v17  ;;  %v2454_v11 = vpop.f32.mrf.mxu2 }
 0x59c   : > { %v3501_v0 = vmul.f32 %v3500_v27, %v7964_v62  ;;  %v8028_v44 = vadd.f32 %v2536_v37, %v6798_v28  ;;  %v8030_v33 = vmul.f32 %v3402_v47, %v3378_v30  ;;  %v3321_v7 = vor.u32 1.1754944e-38, %v3320_v10 }
 0x59d   : > { %v8032_v46 = vadd.f32 1.0, %v3427_v14  ;;  %v3449_v63 = vadd.f32 0.00028619796, %v3448_v53  ;;  %v3337_v56 = vadd.f32 1.1283791, %v3336_v4  ;;  %v3463_v35 = vmul.f32 %v3462_v59, %v7925_v32 }
 0x59e   : > { %9006 = vst [vmem:[#allocation49_spill] sm:$0xff] %v8028_v44  ;;  %v3415_v16 = vadd.f32 0.18741608, %v3414_v26  ;;  %v3533_v42 = vadd.f32 0.05243302, %v3532_v15  ;;  %vm8035_vm2 = vcmp.eq.f32.partialorder %v3318_v25, 8.507059e+37  ;;  %v3547_v37 = vmul.f32 %v3546_v5, %v7814_v31 }
 0x59f   : > { %v3351_v27 = vsub.f32 1.0, %v3350_v49  ;;  %v8041_v30 = vmul.f32 0.5, %v7838_v6  ;;  %v3581_v10 = vmul.f32 %v3580_v3, %v7987_v39  ;;  %v3313_v14 = vadd.f32 %v7966_v51, %v3312_v38 }
 0x5a0   : > { %vm3315_vm3 = vweird.f32 %v7966_v51  ;;  %v3502_v4 = vadd.f32 0.014752088, %v3501_v0  ;;  %v8047_v53 = vmul.f32 0.70710677, %v8028_v44  ;;  %4651 = vrcp.f32 %v8032_v46 }
 0x5a1   : > { %9009 = vst [vmem:[#allocation50_spill] sm:$0xff] %v8041_v30  ;;  %v3450_v47 = vmul.f32 %v3449_v63, %v7925_v32  ;;  %v3488_v26 = vmul.f32 2.1237322e-06, %v7964_v62  ;;  %v8053_v15 = vadd.f32 %v2454_v11, %v6809_v50  ;;  %v3358_v6 = vand.u32 2147483647, %v7943_v43  ;;  %vm8068_vm4 = vmor %vm3314_vm1, %vm3315_vm3  ;;  %v3967_v63 = vld [vmem:[#allocation5 + $0x88] sm:$0xff] }
 0x5a2   : > { %9010 = vst [vmem:[#allocation51_spill] sm:$0xff] %v8047_v53  ;;  %v3416_v59 = vmul.f32 %v3415_v16, %v7783_v58  ;;  %v3534_v25 = vmul.f32 %v3533_v42, %v7814_v31  ;;  %v3464_v49 = vadd.f32 0.112945676, %v3463_v35  ;;  %v8059_v5 = vmul.f32 %v3337_v56, %v7650_v54  ;;  %4073 = vmatpush.msra.mxu2 %v3967_v63  ;;  %v2495_v63 = vpop.f32.mrf.mxu3 }
 0x5a3   : > { %9011 = vst [vmem:[#allocation52_spill] sm:$0xff] %v8053_v15  ;;  %v3352_v3 = vmul.f32 %v8005_v23, %v3351_v27  ;;  %v8062_v38 = vadd.f32 1.0, %v3547_v37  ;;  %v3582_v0 = vadd.f32 0.014752088, %v3581_v10  ;;  %vm3354_vm5 = vweird.f32 %v7943_v43 }
 0x5a4   : > { %v3360_v58 = vand.u32 2147483648, %v7943_v43  ;;  %v3503_v54 = vmul.f32 %v3502_v4, %v7964_v62  ;;  %v3686_v42 = vmul.f32 %v8047_v53, %v8047_v53  ;;  %v3317_v56 = vsel %vm8068_vm4, %v7966_v51, %v3313_v14  ;;  %v3966_v53 = vld [vmem:[#allocation5 + $0x80] sm:$0xff] }
 0x5a5   : > { %v3451_v16 = vadd.f32 0.0036580483, %v3450_v47  ;;  %v3489_v35 = vadd.f32 0.00028619796, %v3488_v26  ;;  %v8081_v17 = vmul.f32 0.70710677, %v8053_v15  ;;  %v3465_v10 = vmul.f32 %v3464_v49, %v7925_v32  ;;  %4074 = vmatpush.msra.mxu2 %v3966_v53 }
 0x5a6   : > { %vm8083_vm6 = vcmp.eq.f32.partialorder %v3358_v6, 8.507059e+37  ;;  %v3417_v27 = vadd.f32 1.1283791, %v3416_v59  ;;  %v3535_v37 = vadd.f32 0.18741608, %v3534_v25  ;;  %v8088_v4 = vpop.eup %4651  ;;  %v3353_v44 = vadd.f32 %v8005_v23, %v3352_v3  ;;  %v3982_v15 = vld [vmem:[#allocation5 + $0x100] sm:$0xff]  ;;  %4075 = vmatmul.f32.vlgmr.msra.gmra.mxu2 %v7175_v1 }
 0x5a7   : > { %vm3355_vm7 = vweird.f32 %v8005_v23  ;;  %4653 = vrcp.f32 %v8062_v38  ;;  %v3583_v51 = vmul.f32 %v3582_v0, %v7987_v39  ;;  %v3322_v14 = vsel %vm8035_vm2, %v3321_v7, %v3317_v56  ;;  %v2416_v0 = vpop.f32.mrf.mxu1  ;;  %v4677_v53 = vld [vmem:[#allocation5 + $0x1f8] sm:$0xff] }
 0x5a8   : > { %v3361_v47 = vor.u32 1.1754944e-38, %v3360_v58  ;;  %v3504_v26 = vadd.f32 0.112945676, %v3503_v54  ;;  %v8096_v6 = vmin.f32 %v3686_v42, 16.0  ;;  %v3440_v59 = vand.u32 2147483648, %v8032_v46  ;;  %vm8105_vm0 = vmor %vm3354_vm5, %vm3355_vm7  ;;  %4448 = vmatpush.msrb.mxu2 %v4677_v53 }
 0x5a9   : > { %v3452_v25 = vmul.f32 %v3451_v16, %v7925_v32  ;;  %v3490_v49 = vmul.f32 %v3489_v35, %v7964_v62  ;;  %v3606_v3 = vmul.f32 %v8081_v17, %v8081_v17  ;;  %v3430_v7 = vmul.f32 %v8088_v4, %v8032_v46  ;;  %v3983_v35 = vld [vmem:[#allocation5 + $0x108] sm:$0xff] }
 0x5aa   : > { %v3536_v40 = vmul.f32 %v3535_v37, %v7814_v31  ;;  %v3466_v58 = vadd.f32 0.4994258, %v3465_v10  ;;  %v3568_v54 = vmul.f32 2.1237322e-06, %v7987_v39  ;;  %v3357_v42 = vsel %vm8105_vm0, %v8005_v23, %v3353_v44  ;;  %4114 = vmatpush.msrb.mxu3 %v3983_v35 }
 0x5ab   : > { %v8117_v56 = vmul.f32 %v3417_v27, %v7736_v41  ;;  %v3584_v43 = vadd.f32 0.112945676, %v3583_v51  ;;  %v8119_v16 = vmin.f32 %v3606_v3, 16.0  ;;  %v8122_v30 = vmul.f32 %v3322_v14, %v8011_v19 }
 0x5ac   : > { %v3438_v31 = vand.u32 2147483647, %v8032_v46  ;;  %v3505_v37 = vmul.f32 %v3504_v26, %v7964_v62  ;;  %v3699_v10 = vmul.f32 3.8918573e-05, %v8096_v6  ;;  %v8129_v41 = vor.u32 1.1754944e-38, %v3440_v59  ;;  %4115 = vmatpush.msrb.mxu3 %v3982_v15 }
 0x5ad   : > { %v8127_v23 = vpop.eup %4653  ;;  %v3453_v44 = vadd.f32 0.05243302, %v3452_v25  ;;  %v8132_v27 = vmul.f32 0.5, %v7905_v60  ;;  %v3491_v51 = vadd.f32 0.0036580483, %v3490_v49  ;;  %v3362_v19 = vsel %vm8083_vm6, %v3361_v47, %v3357_v42  ;;  %4116 = vmatmul.f32.vlgmr.msrb.gmra.mxu3 %v7231_v57 }
 0x5ae   : > { %v3431_v14 = vsub.f32 1.0, %v3430_v7  ;;  %v3537_v3 = vadd.f32 1.1283791, %v3536_v40  ;;  %v3619_v26 = vmul.f32 3.8918573e-05, %v8119_v16  ;;  %v3467_v59 = vmul.f32 %v3466_v58, %v7925_v32  ;;  %v4678_v40 = vld [vmem:[#allocation5 + $0x1f0] sm:$0xff] }
 0x5af   : > { %v3569_v35 = vadd.f32 0.00028619796, %v3568_v54  ;;  %v3585_v25 = vmul.f32 %v3584_v43, %v7987_v39  ;;  %v8141_v60 = vadd.f32 %v2495_v63, %v6826_v20  ;;  %vm3434_vm8 = vweird.f32 %v8032_v46  ;;  %4449 = vmatpush.msrb.mxu2 %v4678_v40 }
 0x5b0   : > { %v3550_v11 = vmul.f32 %v8127_v23, %v8062_v38  ;;  %v3506_v15 = vadd.f32 0.4994258, %v3505_v37  ;;  %v8148_v1 = vmul.f32 0.5, %v7920_v61  ;;  %v3700_v47 = vadd.f32 0.001143296, %v3699_v10 }
 0x5b1   : > { %9018 = vst [vmem:[#allocation53_spill] sm:$0xff] %v8141_v60  ;;  %vm3435_vm9 = vweird.f32 %v8088_v4  ;;  %v3454_v49 = vmul.f32 %v3453_v44, %v7925_v32  ;;  %v3492_v7 = vmul.f32 %v3491_v51, %v7964_v62  ;;  %v8154_v57 = vadd.f32 %v2416_v0, %v6796_v21  ;;  %v4679_v21 = vld [vmem:[#allocation5 + $0x1e8] sm:$0xff] }
 0x5b2   : > { %v8157_v58 = vmul.f32 %v3362_v19, %v8059_v5  ;;  %v3432_v54 = vmul.f32 %v8088_v4, %v3431_v14  ;;  %v8161_v61 = vmul.f32 %v3537_v3, %v7786_v2  ;;  %v3620_v42 = vadd.f32 0.001143296, %v3619_v26  ;;  %4450 = vmatpush.msrb.mxu2 %v4679_v21  ;;  %vm8197_vm12 = vmor %vm3434_vm8, %vm3435_vm9  ;;  %v4685_v2 = vld [vmem:[#allocation5 + $0x1b8] sm:$0xff] }
 0x5b3   : > { %9019 = vst [vmem:[#allocation54_spill] sm:$0xff] %v8154_v57  ;;  %v8163_v43 = vadd.f32 1.0, %v3467_v59  ;;  %v3570_v37 = vmul.f32 %v3569_v35, %v7987_v39  ;;  %v3586_v10 = vadd.f32 0.4994258, %v3585_v25  ;;  %v8167_v63 = vmul.f32 0.70710677, %v8141_v60 }
 0x5b4   : > { %v3551_v44 = vsub.f32 1.0, %v3550_v11  ;;  %v3507_v5 = vmul.f32 %v3506_v15, %v7964_v62  ;;  %v3701_v51 = vmul.f32 %v3700_v47, %v8096_v6  ;;  %v3621_v19 = vmul.f32 %v3620_v42, %v8119_v16  ;;  %v4680_v59 = vld [vmem:[#allocation5 + $0x1e0] sm:$0xff] }
 0x5b5   : > { %vm8172_vm10 = vcmp.eq.f32.partialorder %v3438_v31, 8.507059e+37  ;;  %v3455_v14 = vadd.f32 0.18741608, %v3454_v49  ;;  %v3493_v3 = vadd.f32 0.05243302, %v3492_v7  ;;  %v3646_v26 = vmul.f32 %v8167_v63, %v8167_v63  ;;  %4451 = vmatpush.msrb.mxu2 %v4680_v59  ;;  %v4681_v49 = vld [vmem:[#allocation5 + $0x1d8] sm:$0xff] }
 0x5b6   : > { %v8179_v0 = vmul.f32 0.70710677, %v8154_v57  ;;  %v3433_v35 = vadd.f32 %v8088_v4, %v3432_v54  ;;  %vm3554_vm11 = vweird.f32 %v8062_v38  ;;  %v3558_v25 = vand.u32 2147483647, %v8062_v38 }
 0x5b7   : > { %v3560_v31 = vand.u32 2147483648, %v8062_v38  ;;  %v3608_v53 = vmul.f32 2.1237322e-06, %v8119_v16  ;;  %4655 = vrcp.f32 %v8163_v43  ;;  %v3571_v11 = vadd.f32 0.0036580483, %v3570_v37  ;;  %4452 = vmatpush.msrb.mxu2 %v4681_v49 }
 0x5b8   : > { %v3587_v15 = vmul.f32 %v3586_v10, %v7987_v39  ;;  %v3622_v47 = vadd.f32 0.014752088, %v3621_v19  ;;  %v3552_v7 = vmul.f32 %v8127_v23, %v3551_v44  ;;  %v8189_v40 = vadd.f32 1.0, %v3507_v5  ;;  %v4682_v5 = vld [vmem:[#allocation5 + $0x1d0] sm:$0xff] }
 0x5b9   : > { %v3702_v54 = vadd.f32 0.014752088, %v3701_v51  ;;  %v8191_v42 = vmin.f32 %v3646_v26, 16.0  ;;  %v3456_v37 = vmul.f32 %v3455_v14, %v7925_v32  ;;  %v3494_v10 = vmul.f32 %v3493_v3, %v7964_v62  ;;  %4453 = vmatpush.msrb.mxu2 %v4682_v5 }
 0x5ba   : > { %v3623_v19 = vmul.f32 %v3622_v47, %v8119_v16  ;;  %v3726_v44 = vmul.f32 %v8179_v0, %v8179_v0  ;;  %v3437_v51 = vsel %vm8197_vm12, %v8088_v4, %v3433_v35  ;;  %vm8209_vm13 = vcmp.eq.f32.partialorder %v3558_v25, 8.507059e+37  ;;  %v4683_v47 = vld [vmem:[#allocation5 + $0x1c8] sm:$0xff] }
 0x5bb   : > { %v3609_v26 = vadd.f32 0.00028619796, %v3608_v53  ;;  %v3659_v32 = vmul.f32 3.8918573e-05, %v8191_v42  ;;  %vm3555_vm14 = vweird.f32 %v8127_v23  ;;  %v3572_v14 = vmul.f32 %v3571_v11, %v7987_v39  ;;  %4454 = vmatpush.msrb.mxu2 %v4683_v47  ;;  %v4684_v11 = vld [vmem:[#allocation5 + $0x1c0] sm:$0xff] }
 0x5bc   : > { %v8216_v3 = vadd.f32 1.0, %v3587_v15  ;;  %v3624_v59 = vadd.f32 0.112945676, %v3623_v19  ;;  %v3553_v49 = vadd.f32 %v8127_v23, %v3552_v7  ;;  %4657 = vrcp.f32 %v8189_v40  ;;  %vm8235_vm15 = vmor %vm3554_vm11, %vm3555_vm14 }
 0x5bd   : > { %v3688_v4 = vmul.f32 2.1237322e-06, %v8096_v6  ;;  %v3703_v35 = vmul.f32 %v3702_v54, %v8096_v6  ;;  %v8222_v25 = vpop.eup %4655  ;;  %v3561_v53 = vor.u32 1.1754944e-38, %v3560_v31  ;;  %v3457_v21 = vadd.f32 1.1283791, %v3456_v37  ;;  %4455 = vmatpush.msrb.mxu2 %v4684_v11  ;;  %v4686_v11 = vld [vmem:[#allocation5 + $0x1b0] sm:$0xff] }
 0x5be   : > { %v3495_v5 = vadd.f32 0.18741608, %v3494_v10  ;;  %v8224_v57 = vmin.f32 %v3726_v44, 16.0  ;;  %v3442_v15 = vsel %vm8172_vm10, %v8129_v41, %v3437_v51  ;;  %v3610_v7 = vmul.f32 %v3609_v26, %v8119_v16 }
 0x5bf   : > { %v3625_v19 = vmul.f32 %v3624_v59, %v8119_v16  ;;  %v3660_v47 = vadd.f32 0.001143296, %v3659_v32  ;;  %v3480_v54 = vand.u32 2147483648, %v8163_v43  ;;  %v3573_v37 = vadd.f32 0.05243302, %v3572_v14  ;;  %4456 = vmatpush.msrb.mxu2 %v4685_v2 }
 0x5c0   : > { %4659 = vrcp.f32 %v8216_v3  ;;  %v3648_v41 = vmul.f32 2.1237322e-06, %v8191_v42  ;;  %v3557_v10 = vsel %vm8235_vm15, %v8127_v23, %v3553_v49  ;;  %v3470_v38 = vmul.f32 %v8222_v25, %v8163_v43 }
 0x5c1   : > { %v3689_v44 = vadd.f32 0.00028619796, %v3688_v4  ;;  %v3704_v51 = vadd.f32 0.112945676, %v3703_v35  ;;  %v8248_v26 = vmul.f32 %v3442_v15, %v8117_v56  ;;  %v8251_v32 = vmul.f32 %v3457_v21, %v7863_v36  ;;  %4457 = vmatpush.msrb.mxu2 %v4686_v11  ;;  %v2539_v35 = vpop.f32.mrf.mxu0 }
 0x5c2   : > { %v3496_v14 = vmul.f32 %v3495_v5, %v7964_v62  ;;  %v3739_v59 = vmul.f32 3.8918573e-05, %v8224_v57  ;;  %v8255_v2 = vpop.eup %4657  ;;  %v3478_v23 = vand.u32 2147483647, %v8163_v43  ;;  %v3611_v49 = vadd.f32 0.0036580483, %v3610_v7 }
 0x5c3   : > { %v3626_v31 = vadd.f32 0.4994258, %v3625_v19  ;;  %v3661_v4 = vmul.f32 %v3660_v47, %v8191_v42  ;;  %v3562_v56 = vsel %vm8209_vm13, %v3561_v53, %v3557_v10  ;;  %v3574_v36 = vmul.f32 %v3573_v37, %v7987_v39  ;;  %v4687_v5 = vld [vmem:[#allocation5 + $0x1a8] sm:$0xff] }
 0x5c4   : > { %v3649_v21 = vadd.f32 0.00028619796, %v3648_v41  ;;  %v3740_v62 = vadd.f32 0.001143296, %v3739_v59  ;;  %4458 = vmatpush.msrb.mxu2 %v4687_v5  ;;  %v3471_v15 = vsub.f32 1.0, %v3470_v38  ;;  %v8262_v11 = vor.u32 1.1754944e-38, %v3480_v54 }
 0x5c5   : > { %v3690_v60 = vmul.f32 %v3689_v44, %v8096_v6  ;;  %v3705_v7 = vmul.f32 %v3704_v51, %v8096_v6  ;;  %v3497_v47 = vadd.f32 1.1283791, %v3496_v14  ;;  %v3510_v46 = vmul.f32 %v8255_v2, %v8189_v40  ;;  %v4688_v41 = vld [vmem:[#allocation5 + $0x1a0] sm:$0xff] }
 0x5c6   : > { %v8266_v19 = vpop.eup %4659  ;;  %v3741_v53 = vmul.f32 %v3740_v62, %v8224_v57  ;;  %v8272_v37 = vadd.f32 %v2539_v35, %v6798_v28  ;;  %4459 = vmatpush.msrb.mxu2 %v4688_v41  ;;  %v8275_v54 = vmul.f32 %v3562_v56, %v8161_v61  ;;  %vm3474_vm1 = vweird.f32 %v8163_v43 }
 0x5c7   : > { %v3612_v10 = vmul.f32 %v3611_v49, %v8119_v16  ;;  %v3627_v38 = vmul.f32 %v3626_v31, %v8119_v16  ;;  %v3662_v44 = vadd.f32 0.014752088, %v3661_v4  ;;  %vm3475_vm2 = vweird.f32 %v8222_v25 }
 0x5c8   : > { %v3575_v51 = vadd.f32 0.18741608, %v3574_v36  ;;  %v3650_v14 = vmul.f32 %v3649_v21, %v8191_v42  ;;  %v3728_v28 = vmul.f32 2.1237322e-06, %v8224_v57  ;;  %4460 = vmatpush.msrb.mxu2 %v7724_v8  ;;  %v3472_v59 = vmul.f32 %v8222_v25, %v3471_v15  ;;  %v2457_v21 = vpop.f32.mrf.mxu2  ;;  %vm8323_vm5 = vmor %vm3474_vm1, %vm3475_vm2 }
 0x5c9   : > { %v3590_v61 = vmul.f32 %v8266_v19, %v8216_v3  ;;  %v3691_v35 = vadd.f32 0.0036580483, %v3690_v60  ;;  %v3706_v56 = vadd.f32 0.4994258, %v3705_v7  ;;  %v8288_v49 = vmul.f32 %v3497_v47, %v7929_v13 }
 0x5ca   : > { %v3511_v31 = vsub.f32 1.0, %v3510_v46  ;;  %v3742_v4 = vadd.f32 0.014752088, %v3741_v53  ;;  %v8291_v36 = vmul.f32 0.70710677, %v8272_v37  ;;  %4461 = vmatpush.msrb.mxu2 %v7858_v52  ;;  %vm8294_vm3 = vcmp.eq.f32.partialorder %v3478_v23, 8.507059e+37 }
 0x5cb   : > { %v3520_v62 = vand.u32 2147483648, %v8189_v40  ;;  %v3613_v5 = vadd.f32 0.05243302, %v3612_v10  ;;  %v8299_v60 = vadd.f32 1.0, %v3627_v38  ;;  %v3663_v13 = vmul.f32 %v3662_v44, %v8191_v42 }
 0x5cc   : > { %vm3514_vm4 = vweird.f32 %v8189_v40  ;;  %v3518_v15 = vand.u32 2147483647, %v8189_v40  ;;  %v3576_v7 = vmul.f32 %v3575_v51, %v7987_v39  ;;  %v3651_v47 = vadd.f32 0.0036580483, %v3650_v14  ;;  %4462 = vmatpush.msrb.mxu2 %v7871_v29 }
 0x5cd   : > { %v3729_v46 = vadd.f32 0.00028619796, %v3728_v28  ;;  %v3473_v52 = vadd.f32 %v8222_v25, %v3472_v59  ;;  %v3591_v23 = vsub.f32 1.0, %v3590_v61  ;;  %v3707_v53 = vmul.f32 %v3706_v56, %v8096_v6 }
 0x5ce   : > { %v8309_v41 = vadd.f32 %v2457_v21, %v6809_v50  ;;  %v3512_v10 = vmul.f32 %v8255_v2, %v3511_v31  ;;  %v3692_v38 = vmul.f32 %v3691_v35, %v8096_v6  ;;  %v3743_v44 = vmul.f32 %v3742_v4, %v8224_v57  ;;  %4463 = vmatpush.msrb.mxu2 %v7890_v18 }
 0x5cf   : > { %v3846_v39 = vmul.f32 %v8291_v36, %v8291_v36  ;;  %v3521_v29 = vor.u32 1.1754944e-38, %v3520_v62  ;;  %v3614_v51 = vmul.f32 %v3613_v5, %v8119_v16  ;;  %4661 = vrcp.f32 %v8299_v60 }
 0x5d0   : > { %v3664_v14 = vadd.f32 0.112945676, %v3663_v13  ;;  %vm3515_vm6 = vweird.f32 %v8255_v2  ;;  %v3577_v28 = vadd.f32 1.1283791, %v3576_v7  ;;  %v3652_v59 = vmul.f32 %v3651_v47, %v8191_v42 }
 0x5d1   : > { %v3730_v18 = vmul.f32 %v3729_v46, %v8224_v57  ;;  %v3477_v61 = vsel %vm8323_vm5, %v8222_v25, %v3473_v52  ;;  %vm8333_vm7 = vcmp.eq.f32.partialorder %v3518_v15, 8.507059e+37  ;;  %v3592_v43 = vmul.f32 %v8266_v19, %v3591_v23  ;;  %v2498_v23 = vpop.f32.mrf.mxu3  ;;  %vm8359_vm8 = vmor %vm3514_vm4, %vm3515_vm6 }
 0x5d2   : > { %v8338_v56 = vadd.f32 1.0, %v3707_v53  ;;  %v8341_v31 = vmul.f32 0.70710677, %v8309_v41  ;;  %v3513_v4 = vadd.f32 %v8255_v2, %v3512_v10  ;;  %v3693_v21 = vadd.f32 0.05243302, %v3692_v38 }
 0x5d3   : > { %v3744_v62 = vadd.f32 0.112945676, %v3743_v44  ;;  %v8344_v5 = vmin.f32 %v3846_v39, 16.0  ;;  %vm3594_vm0 = vweird.f32 %v8216_v3  ;;  %v3598_v25 = vand.u32 2147483647, %v8216_v3 }
 0x5d4   : > { %v3615_v13 = vadd.f32 0.18741608, %v3614_v51  ;;  %v3665_v15 = vmul.f32 %v3664_v14, %v8191_v42  ;;  %v3482_v7 = vsel %vm8294_vm3, %v8262_v11, %v3477_v61  ;;  %v3600_v47 = vand.u32 2147483648, %v8216_v3 }
 0x5d5   : > { %v3653_v46 = vadd.f32 0.05243302, %v3652_v59  ;;  %v3731_v52 = vadd.f32 0.0036580483, %v3730_v18  ;;  %v8353_v53 = vpop.eup %4661  ;;  %v3593_v38 = vadd.f32 %v8266_v19, %v3592_v43  ;;  %vm3595_vm9 = vweird.f32 %v8266_v19 }
 0x5d6   : > { %4663 = vrcp.f32 %v8338_v56  ;;  %v3766_v11 = vmul.f32 %v8341_v31, %v8341_v31  ;;  %v3517_v8 = vsel %vm8359_vm8, %v8255_v2, %v3513_v4  ;;  %v3694_v44 = vmul.f32 %v3693_v21, %v8096_v6  ;;  %vm8383_vm10 = vmor %vm3594_vm0, %vm3595_vm9 }
 0x5d7   : > { %v3745_v40 = vmul.f32 %v3744_v62, %v8224_v57  ;;  %v3859_v39 = vmul.f32 3.8918573e-05, %v8344_v5  ;;  %v3616_v51 = vmul.f32 %v3615_v13, %v8119_v16  ;;  %v3666_v14 = vadd.f32 0.4994258, %v3665_v15 }
 0x5d8   : > { %v8375_v50 = vmin.f32 %v3766_v11, 16.0  ;;  %v8378_v59 = vadd.f32 %v2498_v23, %v6826_v20  ;;  %v3578_v18 = vmul.f32 %v3577_v28, %v7941_v9  ;;  %v3630_v61 = vmul.f32 %v8353_v53, %v8299_v60 }
 0x5d9   : > { %v3654_v43 = vmul.f32 %v3653_v46, %v8191_v42  ;;  %v3732_v16 = vmul.f32 %v3731_v52, %v8224_v57  ;;  %v8392_v4 = vmul.f32 %v3482_v7, %v8251_v32  ;;  %v3597_v20 = vsel %vm8383_vm10, %v8266_v19, %v3593_v38 }
 0x5da   : > { %vm3599_vm11 = vcmp.eq.f32.partialorder %v3598_v25, 8.507059e+37  ;;  %v3601_v9 = vor.u32 1.1754944e-38, %v3600_v47  ;;  %v3522_v3 = vsel %vm8333_vm7, %v3521_v29, %v3517_v8  ;;  %v8399_v28 = vadd.f32 0.18741608, %v3694_v44 }
 0x5db   : > { %v3746_v21 = vadd.f32 0.4994258, %v3745_v40  ;;  %v3860_v62 = vadd.f32 0.001143296, %v3859_v39  ;;  %v3617_v15 = vadd.f32 1.1283791, %v3616_v51  ;;  %v3667_v46 = vmul.f32 %v3666_v14, %v8191_v42 }
 0x5dc   : > { %v8401_v13 = vpop.eup %4663  ;;  %v3779_v32 = vmul.f32 3.8918573e-05, %v8375_v50  ;;  %v8406_v7 = vmul.f32 0.70710677, %v8378_v59  ;;  %v3602_v19 = vsel %vm3599_vm11, %v3601_v9, %v3597_v20  ;;  %v3631_v25 = vsub.f32 1.0, %v3630_v61 }
 0x5dd   : > { %v3655_v47 = vadd.f32 0.18741608, %v3654_v43  ;;  %v3733_v52 = vadd.f32 0.05243302, %v3732_v16  ;;  %v4389_v23 = vclamps-f32 %v7270_v55, 1.0  ;;  %v4392_v10 = vclamps-f32 %v7341_v34, 1.0 }
 0x5de   : > { %v3780_v35 = vadd.f32 0.001143296, %v3779_v32  ;;  %v3806_v29 = vmul.f32 %v8406_v7, %v8406_v7  ;;  %v8413_v38 = vmul.f32 %v3522_v3, %v8288_v49  ;;  %v3710_v11 = vmul.f32 %v8401_v13, %v8338_v56 }
 0x5df   : > { %v3747_v8 = vmul.f32 %v3746_v21, %v8224_v57  ;;  %v3861_v44 = vmul.f32 %v3860_v62, %v8344_v5  ;;  %v8419_v40 = vmul.f32 %v3602_v19, %v3578_v18  ;;  %v8421_v39 = vadd.f32 1.0, %v3667_v46 }
 0x5e0   : > { %v3781_v51 = vmul.f32 %v3780_v35, %v8375_v50  ;;  %v8424_v14 = vmin.f32 %v3806_v29, 16.0  ;;  %v8427_v55 = vmul.f32 %v3617_v15, %v8081_v17  ;;  %v3656_v34 = vmul.f32 %v3655_v47, %v8191_v42 }
 0x5e1   : > { %v3734_v49 = vmul.f32 %v3733_v52, %v8224_v57  ;;  %v3890_v2 = vadd.f32 1.0, %v4389_v23  ;;  %v3632_v61 = vmul.f32 %v8353_v53, %v3631_v25  ;;  %v3638_v43 = vand.u32 2147483647, %v8299_v60 }
 0x5e2   : > { %v3782_v18 = vadd.f32 0.014752088, %v3781_v51  ;;  %v3893_v16 = vadd.f32 1.0, %v4392_v10  ;;  %v3711_v20 = vsub.f32 1.0, %v3710_v11  ;;  %v8433_v9 = vadd.f32 1.0, %v3747_v8 }
 0x5e3   : > { %v3848_v3 = vmul.f32 2.1237322e-06, %v8344_v5  ;;  %v3862_v21 = vadd.f32 0.014752088, %v3861_v44  ;;  %v3640_v17 = vand.u32 2147483648, %v8299_v60  ;;  %4665 = vrcp.f32 %v8421_v39 }
 0x5e4   : > { %v3783_v42 = vmul.f32 %v3782_v18, %v8375_v50  ;;  %v3819_v62 = vmul.f32 3.8918573e-05, %v8424_v14  ;;  %vm3635_vm12 = vweird.f32 %v8353_v53  ;;  %v3657_v15 = vadd.f32 1.1283791, %v3656_v34 }
 0x5e5   : > { %v3735_v46 = vadd.f32 0.18741608, %v3734_v49  ;;  %v3922_v32 = vmul.f32 %v3890_v2, %v6943_v12  ;;  %v3633_v19 = vadd.f32 %v8353_v53, %v3632_v61  ;;  %v3768_v25 = vmul.f32 2.1237322e-06, %v8375_v50 }
 0x5e6   : > { %v3784_v47 = vadd.f32 0.112945676, %v3783_v42  ;;  %v3925_v52 = vmul.f32 %v3893_v16, %v6950_v45  ;;  %4667 = vrcp.f32 %v8433_v9  ;;  %v3849_v35 = vadd.f32 0.00028619796, %v3848_v3  ;;  %v9043_v42 = vld [vmem:[#allocation33_spill] sm:$0xff] }
 0x5e7   : > { %v3863_v29 = vmul.f32 %v3862_v21, %v8344_v5  ;;  %v3820_v23 = vadd.f32 0.001143296, %v3819_v62  ;;  %4037 = vmatmul.f32.gmra.mxu1 %v3922_v32  ;;  %v8448_v10 = vmul.f32 %v8401_v13, %v3711_v20  ;;  %vm3634_vm13 = vweird.f32 %v8299_v60  ;;  %v9042_v21 = vld [vmem:[#allocation30_spill] sm:$0xff] }
 0x5e8   : > { %vm8451_vm14 = vcmp.eq.f32.partialorder %v3638_v43, 8.507059e+37  ;;  %v3641_v11 = vor.u32 1.1754944e-38, %v3640_v17  ;;  %4160 = vmatmul.f32.gmra.mxu0 %v3925_v52  ;;  %vm8457_vm15 = vmor %vm3634_vm13, %vm3635_vm12  ;;  %v8462_v8 = vmul.f32 %v3657_v15, %v8167_v63  ;;  %v3678_v44 = vand.u32 2147483647, %v8421_v39  ;;  %v9044_v15 = vld [vmem:[#allocation34_spill] sm:$0xff] }
 0x5e9   : > { %v3785_v51 = vmul.f32 %v3784_v47, %v8375_v50  ;;  %v3808_v60 = vmul.f32 2.1237322e-06, %v8424_v14  ;;  %v8467_v34 = vpop.eup %4665  ;;  %v3637_v49 = vsel %vm8457_vm15, %v8353_v53, %v3633_v19  ;;  %v3680_v2 = vand.u32 2147483648, %v8421_v39 }
 0x5ea   : > { %v3769_v61 = vadd.f32 0.00028619796, %v3768_v25  ;;  %v3821_v43 = vmul.f32 %v3820_v23, %v8424_v14  ;;  %v3736_v63 = vmul.f32 %v3735_v46, %v8224_v57  ;;  %v3850_v18 = vmul.f32 %v3849_v35, %v8344_v5 }
 0x5eb   : > { %v3864_v16 = vadd.f32 0.112945676, %v3863_v29  ;;  %v3786_v20 = vadd.f32 0.4994258, %v3785_v51  ;;  %v4390_v17 = vclamps-f32 %v9042_v21, 1.0  ;;  %v4391_v62 = vclamps-f32 %v9043_v42, 1.0 }
 0x5ec   : > { %v3822_v3 = vadd.f32 0.014752088, %v3821_v43  ;;  %v4393_v32 = vclamps-f32 %v9044_v15, 1.0  ;;  %v8479_v47 = vpop.eup %4667  ;;  %v3642_v53 = vsel %vm8451_vm14, %v3641_v11, %v3637_v49  ;;  %v3670_v19 = vmul.f32 %v8467_v34, %v8421_v39  ;;  %v9045_v43 = vld [vmem:[#allocation37_spill] sm:$0xff] }
 0x5ed   : > { %v3787_v57 = vmul.f32 %v3786_v20, %v8375_v50  ;;  %v3809_v46 = vadd.f32 0.00028619796, %v3808_v60  ;;  %v3770_v25 = vmul.f32 %v3769_v61, %v8375_v50  ;;  %v3891_v35 = vadd.f32 1.0, %v4390_v17  ;;  %v9046_v21 = vld [vmem:[#allocation25_spill] sm:$0xff]  ;;  %v9047_v60 = vld [vmem:[#allocation26_spill] sm:$0xff] }
 0x5ee   : > { %v3823_v52 = vmul.f32 %v3822_v3, %v8424_v14  ;;  %v3892_v29 = vadd.f32 1.0, %v4391_v62  ;;  %v3865_v23 = vmul.f32 %v3864_v16, %v8344_v5  ;;  %v3894_v51 = vadd.f32 1.0, %v4393_v32 }
 0x5ef   : > { %v8489_v45 = vadd.f32 1.0, %v3787_v57  ;;  %v4396_v12 = vclamps-f32 %v9045_v43, 1.0  ;;  %v3750_v11 = vmul.f32 %v8479_v47, %v8433_v9  ;;  %v3923_v20 = vmul.f32 %v3891_v35, %v9046_v21 }
 0x5f0   : > { %v3824_v49 = vadd.f32 0.112945676, %v3823_v52  ;;  %v3924_v42 = vmul.f32 %v3892_v29, %v9047_v60  ;;  %v8496_v61 = vor.u32 1.1754944e-38, %v3680_v2  ;;  %v8498_v3 = vadd.f32 1.1283791, %v3736_v63  ;;  %v9048_v52 = vld [vmem:[#allocation27_spill] sm:$0xff] }
 0x5f1   : > { %v8500_v17 = vadd.f32 0.0036580483, %v3850_v18  ;;  %v3810_v16 = vmul.f32 %v3809_v46, %v8424_v14  ;;  %v8504_v62 = vmul.f32 %v3642_v53, %v8427_v55  ;;  %v3671_v15 = vsub.f32 1.0, %v3670_v19  ;;  %4078 = vmatmul.f32.gmra.mxu2 %v3923_v20  ;;  %v9049_v63 = vld [vmem:[#allocation39_spill] sm:$0xff]  ;;  %v9050_v46 = vld [vmem:[#allocation28_spill] sm:$0xff] }
 0x5f2   : > { %v3771_v32 = vadd.f32 0.0036580483, %v3770_v25  ;;  %v3825_v57 = vmul.f32 %v3824_v49, %v8424_v14  ;;  %4119 = vmatmul.f32.gmra.mxu3 %v3924_v42  ;;  %4669 = vrcp.f32 %v8489_v45  ;;  %v3926_v2 = vmul.f32 %v3894_v51, %v9048_v52  ;;  %v9051_v49 = vld [vmem:[#allocation41_spill] sm:$0xff] }
 0x5f3   : > { %v3897_v35 = vadd.f32 1.0, %v4396_v12  ;;  %v4394_v29 = vclamps-f32 %v9049_v63, 1.0  ;;  %vm3674_vm1 = vweird.f32 %v8421_v39  ;;  %vm3675_vm2 = vweird.f32 %v8467_v34  ;;  %v9052_v12 = vld [vmem:[#allocation43_spill] sm:$0xff] }
 0x5f4   : > { %v3751_v18 = vsub.f32 1.0, %v3750_v11  ;;  %v3866_v55 = vadd.f32 0.4994258, %v3865_v23  ;;  %v3826_v53 = vadd.f32 0.4994258, %v3825_v57  ;;  %4040 = vmatmul.f32.gmra.mxu1 %v3926_v2  ;;  %v4395_v21 = vclamps-f32 %v9051_v49, 1.0  ;;  %vm8552_vm6 = vmor %vm3674_vm1, %vm3675_vm2 }
 0x5f5   : > { %v3811_v19 = vadd.f32 0.0036580483, %v3810_v16  ;;  %v3929_v25 = vmul.f32 %v3897_v35, %v9050_v46  ;;  %v3895_v43 = vadd.f32 1.0, %v4394_v29  ;;  %v3672_v20 = vmul.f32 %v8467_v34, %v3671_v15  ;;  %v9053_v23 = vld [vmem:[#allocation29_spill] sm:$0xff] }
 0x5f6   : > { %v3827_v51 = vmul.f32 %v3826_v53, %v8424_v14  ;;  %v4397_v60 = vclamps-f32 %v9052_v12, 1.0  ;;  %v4400_v42 = vclamps-f32 %v7867_v24, 1.0  ;;  %v3772_v52 = vmul.f32 %v3771_v32, %v8375_v50  ;;  %v9058_v12 = vld [vmem:[#allocation35_spill] sm:$0xff] }
 0x5f7   : > { %4163 = vmatmul.f32.gmra.mxu0 %v3929_v25  ;;  %v3927_v11 = vmul.f32 %v3895_v43, %v9053_v23  ;;  %v3896_v16 = vadd.f32 1.0, %v4395_v21  ;;  %v4398_v57 = vclamps-f32 %v7878_v22, 1.0  ;;  %vm8523_vm3 = vcmp.eq.f32.partialorder %v3678_v44, 8.507059e+37  ;;  %v9056_v22 = vld [vmem:[#allocation31_spill] sm:$0xff] }
 0x5f8   : > { %v3752_v15 = vmul.f32 %v8479_v47, %v3751_v18  ;;  %vm3754_vm4 = vweird.f32 %v8433_v9  ;;  %v3758_v24 = vand.u32 2147483647, %v8433_v9  ;;  %v3867_v32 = vmul.f32 %v3866_v55, %v8344_v5  ;;  %v8531_v35 = vpop.eup %4669 }
 0x5f9   : > { %v3812_v63 = vmul.f32 %v3811_v19, %v8424_v14  ;;  %v8534_v29 = vadd.f32 1.0, %v3827_v51  ;;  %v3928_v53 = vmul.f32 %v3896_v16, %v9056_v22  ;;  %v3898_v44 = vadd.f32 1.0, %v4397_v60  ;;  %4081 = vmatmul.f32.gmra.mxu2 %v3927_v11  ;;  %v9057_v51 = vld [vmem:[#allocation32_spill] sm:$0xff] }
 0x5fa   : > { %v3673_v46 = vadd.f32 %v8467_v34, %v3672_v20  ;;  %v3901_v25 = vadd.f32 1.0, %v4400_v42  ;;  %v3899_v18 = vadd.f32 1.0, %v4398_v57  ;;  %v4399_v43 = vclamps-f32 %v7946_v48, 1.0  ;;  %v9061_v11 = vld [vmem:[#allocation48_spill] sm:$0xff] }
 0x5fb   : > { %vm3755_vm5 = vweird.f32 %v8479_v47  ;;  %v3760_v55 = vand.u32 2147483648, %v8433_v9  ;;  %v3773_v49 = vadd.f32 0.05243302, %v3772_v52  ;;  %4671 = vrcp.f32 %v8534_v29  ;;  %4122 = vmatmul.f32.gmra.mxu3 %v3928_v53 }
 0x5fc   : > { %v8542_v19 = vadd.f32 1.0, %v3867_v32  ;;  %v3790_v21 = vmul.f32 %v8531_v35, %v8489_v45  ;;  %v3930_v20 = vmul.f32 %v3898_v44, %v9057_v51  ;;  %v3933_v60 = vmul.f32 %v3901_v25, %v9058_v12  ;;  %v9062_v32 = vld [vmem:[#allocation36_spill] sm:$0xff]  ;;  %v9063_v25 = vld [vmem:[#allocation38_spill] sm:$0xff]  ;;  %vm8571_vm7 = vmor %vm3754_vm4, %vm3755_vm5 }
 0x5fd   : > { %v3753_v42 = vadd.f32 %v8479_v47, %v3752_v15  ;;  %v3813_v52 = vadd.f32 0.05243302, %v3812_v63  ;;  %v3900_v23 = vadd.f32 1.0, %v4399_v43  ;;  %v4401_v16 = vclamps-f32 %v9061_v11, 1.0 }
 0x5fe   : > { %v3677_v57 = vsel %vm8552_vm6, %v8467_v34, %v3673_v46  ;;  %4043 = vmatmul.f32.gmra.mxu1 %v3930_v20  ;;  %v3931_v22 = vmul.f32 %v3899_v18, %v9062_v32  ;;  %v4404_v53 = vclamps-f32 %v8030_v33, 1.0  ;;  %v4402_v39 = vclamps-f32 %v8122_v30, 1.0 }
 0x5ff   : > { %v3774_v44 = vmul.f32 %v3773_v49, %v8375_v50  ;;  %4166 = vmatmul.f32.gmra.mxu0 %v3933_v60  ;;  %v3932_v15 = vmul.f32 %v3900_v23, %v9063_v25  ;;  %v3902_v63 = vadd.f32 1.0, %v4401_v16  ;;  %v4403_v43 = vclamps-f32 %v8157_v58, 1.0 }
 0x600   : > { %v3761_v46 = vor.u32 1.1754944e-38, %v3760_v55  ;;  %v3852_v33 = vmul.f32 %v8500_v17, %v8344_v5  ;;  %v3791_v30 = vsub.f32 1.0, %v3790_v21  ;;  %v3905_v18 = vadd.f32 1.0, %v4404_v53  ;;  %v9066_v17 = vld [vmem:[#allocation40_spill] sm:$0xff] }
 0x601   : > { %v8577_v49 = vpop.eup %4671  ;;  %v3682_v58 = vsel %vm8523_vm3, %v8496_v61, %v3677_v57  ;;  %v3757_v9 = vsel %vm8571_vm7, %v8479_v47, %v3753_v42  ;;  %4673 = vrcp.f32 %v8542_v19  ;;  %v3814_v51 = vmul.f32 %v3813_v52, %v8424_v14  ;;  %4084 = vmatmul.f32.gmra.mxu2 %v3931_v22  ;;  %v9067_v61 = vld [vmem:[#allocation42_spill] sm:$0xff]  ;;  %v9068_v22 = vld [vmem:[#allocation44_spill] sm:$0xff] }
 0x602   : > { %v3830_v55 = vmul.f32 %v8577_v49, %v8534_v29  ;;  %v3934_v21 = vmul.f32 %v3902_v63, %v9066_v17  ;;  %v3903_v20 = vadd.f32 1.0, %v4402_v39  ;;  %v4405_v12 = vclamps-f32 %v8248_v26, 1.0 }
 0x603   : > { %v3775_v60 = vadd.f32 0.18741608, %v3774_v44  ;;  %4125 = vmatmul.f32.gmra.mxu3 %v3932_v15  ;;  %v3937_v2 = vmul.f32 %v3905_v18, %v9067_v61  ;;  %v3904_v48 = vadd.f32 1.0, %v4403_v43  ;;  %v4408_v47 = vclamps-f32 %v8275_v54, 1.0  ;;  %v9076_v61 = vld [vmem:[#allocation50_spill] sm:$0xff] }
 0x604   : > { %v3738_v42 = vmul.f32 %v8498_v3, %v8179_v0  ;;  %vm3759_vm0 = vcmp.eq.f32.partialorder %v3758_v24, 8.507059e+37  ;;  %v3792_v52 = vmul.f32 %v8531_v35, %v3791_v30  ;;  %v3831_v23 = vsub.f32 1.0, %v3830_v55  ;;  %v9069_v3 = vld [vmem:[#allocation45_spill] sm:$0xff] }
 0x605   : > { %v8597_v11 = vmul.f32 %v3682_v58, %v8462_v8  ;;  %v3762_v16 = vsel %vm3759_vm0, %v3761_v46, %v3757_v9  ;;  %v3853_v57 = vadd.f32 0.05243302, %v3852_v33  ;;  %v3815_v26 = vadd.f32 0.18741608, %v3814_v51 }
 0x606   : > { %v3832_v32 = vmul.f32 %v8577_v49, %v3831_v23  ;;  %4046 = vmatmul.f32.gmra.mxu1 %v3934_v21  ;;  %v3935_v53 = vmul.f32 %v3903_v20, %v9068_v22  ;;  %v3906_v39 = vadd.f32 1.0, %v4405_v12  ;;  %v4406_v54 = vclamps-f32 %v8392_v4, 1.0 }
 0x607   : > { %v8602_v44 = vpop.eup %4673  ;;  %v3776_v0 = vmul.f32 %v3775_v60, %v8375_v50  ;;  %4169 = vmatmul.f32.gmra.mxu0 %v3937_v2  ;;  %v3936_v24 = vmul.f32 %v3904_v48, %v9069_v3  ;;  %v3909_v8 = vadd.f32 1.0, %v4408_v47  ;;  %v4407_v25 = vclamps-f32 %v8413_v38, 1.0  ;;  %v9070_v38 = vld [vmem:[#allocation46_spill] sm:$0xff]  ;;  %v9080_v3 = vld [vmem:[#allocation53_spill] sm:$0xff] }
 0x608   : > { %v3793_v15 = vadd.f32 %v8531_v35, %v3792_v52  ;;  %vm3794_vm8 = vweird.f32 %v8489_v45  ;;  %vm3795_vm9 = vweird.f32 %v8531_v35  ;;  %v3798_v63 = vand.u32 2147483647, %v8489_v45 }
 0x609   : > { %v3800_v4 = vand.u32 2147483648, %v8489_v45  ;;  %v3816_v43 = vmul.f32 %v3815_v26, %v8424_v14  ;;  %v3833_v50 = vadd.f32 %v8577_v49, %v3832_v32  ;;  %vm3835_vm10 = vweird.f32 %v8577_v49  ;;  %4087 = vmatmul.f32.gmra.mxu2 %v3935_v53  ;;  %vm8618_vm11 = vmor %vm3794_vm8, %vm3795_vm9  ;;  %v9073_v45 = vld [vmem:[#allocation47_spill] sm:$0xff] }
 0x60a   : > { %v3840_v34 = vand.u32 2147483648, %v8534_v29  ;;  %v3938_v46 = vmul.f32 %v3906_v39, %v9070_v38  ;;  %v3907_v33 = vadd.f32 1.0, %v4406_v54  ;;  %v4409_v30 = vclamps-f32 %v8419_v40, 1.0 }
 0x60b   : > { %vm3834_vm12 = vweird.f32 %v8534_v29  ;;  %v3838_v14 = vand.u32 2147483647, %v8534_v29  ;;  %4128 = vmatmul.f32.gmra.mxu3 %v3936_v24  ;;  %v3941_v58 = vmul.f32 %v3909_v8, %v9073_v45  ;;  %v3908_v9 = vadd.f32 1.0, %v4407_v25 }
 0x60c   : > { %v3763_v51 = vmul.f32 %v3762_v16, %v3738_v42  ;;  %v3870_v55 = vmul.f32 %v8602_v44, %v8542_v19  ;;  %v3777_v17 = vadd.f32 1.1283791, %v3776_v0  ;;  %v3797_v40 = vsel %vm8618_vm11, %v8531_v35, %v3793_v15  ;;  %vm8632_vm13 = vmor %vm3834_vm12, %vm3835_vm10 }
 0x60d   : > { %vm3799_vm14 = vcmp.eq.f32.partialorder %v3798_v63, 8.507059e+37  ;;  %v3801_v29 = vor.u32 1.1754944e-38, %v3800_v4  ;;  %v3817_v20 = vadd.f32 1.1283791, %v3816_v43  ;;  %v3837_v12 = vsel %vm8632_vm13, %v8577_v49, %v3833_v50 }
 0x60e   : > { %v3841_v60 = vor.u32 1.1754944e-38, %v3840_v34  ;;  %4049 = vmatmul.f32.gmra.mxu1 %v3938_v46  ;;  %v3939_v2 = vmul.f32 %v3907_v33, %v9076_v61  ;;  %v3910_v48 = vadd.f32 1.0, %v4409_v30  ;;  %v4410_v35 = vclamps-f32 %v8504_v62, 1.0  ;;  %v9082_v46 = vld [vmem:[#allocation51_spill] sm:$0xff] }
 0x60f   : > { %v3802_v47 = vsel %vm3799_vm14, %v3801_v29, %v3797_v40  ;;  %vm3839_vm15 = vcmp.eq.f32.partialorder %v3838_v14, 8.507059e+37  ;;  %4172 = vmatmul.f32.gmra.mxu0 %v3941_v58  ;;  %v3940_v42 = vmul.f32 %v3908_v9, %v8132_v27  ;;  %v4411_v52 = vclamps-f32 %v8597_v11, 1.0 }
 0x610   : > { %v3696_v23 = vmul.f32 %v8399_v28, %v8096_v6  ;;  %vm3715_vm1 = vweird.f32 %v8401_v13  ;;  %v3778_v49 = vmul.f32 %v3777_v17, %v8341_v31  ;;  %v3842_v16 = vsel %vm3839_vm15, %v3841_v60, %v3837_v12 }
 0x611   : > { %v3713_v26 = vadd.f32 %v8401_v13, %v8448_v10  ;;  %v3854_v62 = vmul.f32 %v3853_v57, %v8344_v5  ;;  %v3871_v32 = vsub.f32 1.0, %v3870_v55  ;;  %v3818_v22 = vmul.f32 %v3817_v20, %v8406_v7  ;;  %4090 = vmatmul.f32.gmra.mxu2 %v3939_v2  ;;  %v9079_v57 = vld [vmem:[#allocation52_spill] sm:$0xff] }
 0x612   : > { %v3803_v53 = vmul.f32 %v3802_v47, %v3778_v49  ;;  %v3942_v27 = vmul.f32 %v3910_v48, %v8148_v1  ;;  %v3911_v11 = vadd.f32 1.0, %v4410_v35  ;;  %v4413_v39 = vclamps-f32 %v3763_v51, 1.0 }
 0x613   : > { %vm3714_vm2 = vweird.f32 %v8338_v56  ;;  %v3720_v6 = vand.u32 2147483648, %v8338_v56  ;;  %v3843_v31 = vmul.f32 %v3842_v16, %v3818_v22  ;;  %4131 = vmatmul.f32.gmra.mxu3 %v3940_v42  ;;  %v3912_v28 = vadd.f32 1.0, %v4411_v52  ;;  %v8690_v22 = vld [vmem:[%s8791_s16] ss:$0 sm:$0xff] }
 0x614   : > { %vm8656_vm3 = vmor %vm3714_vm2, %vm3715_vm1  ;;  %v3718_v7 = vand.u32 2147483647, %v8338_v56  ;;  %v2567_v54 = vmul.f32 0.5, %v9079_v57  ;;  %v3697_v1 = vadd.f32 1.1283791, %v3696_v23  ;;  %v2568_v24 = vmul.f32 0.5, %v9080_v3  ;;  %v4035_v23 = vpop.f32.mrf.mxu1 }
 0x615   : > { %v3717_v0 = vsel %vm8656_vm3, %v8401_v13, %v3713_v26  ;;  %v3855_v8 = vadd.f32 0.18741608, %v3854_v62  ;;  %v3872_v25 = vmul.f32 %v8602_v44, %v3871_v32  ;;  %v3914_v63 = vadd.f32 1.0, %v4413_v39  ;;  %v9081_v56 = vld [vmem:[#allocation54_spill] sm:$0xff] }
 0x616   : > { %4052 = vmatmul.f32.gmra.mxu1 %v3942_v27  ;;  %v3943_v15 = vmul.f32 %v3911_v11, %v2567_v54  ;;  %v4414_v4 = vclamps-f32 %v3803_v53, 1.0  ;;  %v3721_v43 = vor.u32 1.1754944e-38, %v3720_v6  ;;  %v3944_v50 = vmul.f32 %v3912_v28, %v2568_v24  ;;  %v8696_v27 = vld [vmem:[%s8792_s17] ss:$0 sm:$0xff] }
 0x617   : > { %v4415_v34 = vclamps-f32 %v3843_v31, 1.0  ;;  %vm3719_vm4 = vcmp.eq.f32.partialorder %v3718_v7, 8.507059e+37  ;;  %v2570_v38 = vmul.f32 0.5, %v9081_v56  ;;  %v3698_v33 = vmul.f32 %v3697_v1, %v9082_v46  ;;  %v9084_v6 = vld [vmem:[#allocation17_spill] sm:$0xff]  ;;  %v9085_v56 = vld [vmem:[#allocation18_spill] sm:$0xff] }
 0x618   : > { %v3722_v30 = vsel %vm3719_vm4, %v3721_v43, %v3717_v0  ;;  %v3856_v13 = vmul.f32 %v3855_v8, %v8344_v5  ;;  %v3873_v18 = vadd.f32 %v8602_v44, %v3872_v25  ;;  %vm3875_vm5 = vweird.f32 %v8602_v44 }
 0x619   : > { %4093 = vmatmul.f32.gmra.mxu2 %v3943_v15  ;;  %v3946_v14 = vmul.f32 %v3914_v63, %v2570_v38  ;;  %v3915_v45 = vadd.f32 1.0, %v4414_v4  ;;  %v3880_v58 = vand.u32 2147483648, %v8542_v19  ;;  %v3916_v9 = vadd.f32 1.0, %v4415_v34 }
 0x61a   : > { %v3723_v51 = vmul.f32 %v3722_v30, %v3698_v33  ;;  %vm3874_vm6 = vweird.f32 %v8542_v19  ;;  %v3878_v55 = vand.u32 2147483647, %v8542_v19  ;;  %v2571_v17 = vmul.f32 0.5, %v8309_v41  ;;  %v9083_v41 = vld [vmem:[#allocation49_spill] sm:$0xff] }
 0x61b   : > { %4134 = vmatmul.f32.gmra.mxu3 %v3944_v50  ;;  %vm3876_vm7 = vmor %vm3874_vm6, %vm3875_vm5  ;;  %v2572_v5 = vmul.f32 0.5, %v8378_v59  ;;  %v3857_v40 = vadd.f32 1.1283791, %v3856_v13  ;;  %v3881_v20 = vor.u32 1.1754944e-38, %v3880_v58  ;;  %v2569_v35 = vmul.f32 0.5, %v9083_v41 }
 0x61c   : > { %v3877_v21 = vsel %vm3876_vm7, %v8602_v44, %v3873_v18  ;;  %v3947_v29 = vmul.f32 %v3915_v45, %v2571_v17  ;;  %v4412_v60 = vclamps-f32 %v3723_v51, 1.0  ;;  %vm3879_vm0 = vcmp.eq.f32.partialorder %v3878_v55, 8.507059e+37  ;;  %v9086_v55 = vld [vmem:[#allocation19_spill] sm:$0xff] }
 0x61d   : > { %v3948_v12 = vmul.f32 %v3916_v9, %v2572_v5  ;;  %v3882_v61 = vsel %vm3879_vm0, %v3881_v20, %v3877_v21  ;;  %v3858_v2 = vmul.f32 %v3857_v40, %v8291_v36  ;;  %v2573_v42 = vmul.f32 0.5, %v8272_v37  ;;  %v8684_v36 = vld [vmem:[%s8790_s15] ss:$0 sm:$0xff]  ;;  %v4158_v37 = vpop.f32.mrf.mxu0 }
 0x61e   : > { %4055 = vmatmul.f32.gmra.mxu1 %v3946_v14  ;;  %v3913_v19 = vadd.f32 1.0, %v4412_v60  ;;  %v4036_v49 = vadd.f32 %v8684_v36, %v4035_v23 }
 0x61f   : > { %v3883_v48 = vmul.f32 %v3882_v61, %v3858_v2 }
 0x620   : > { %v3945_v47 = vmul.f32 %v3913_v19, %v2569_v35  ;;  %v9087_v19 = vld [vmem:[#allocation20_spill] sm:$0xff] }
 0x621   : > { %4096 = vmatmul.f32.gmra.mxu2 %v3947_v29  ;;  %v4416_v59 = vclamps-f32 %v3883_v48, 1.0 }
 0x623   : > { %4137 = vmatmul.f32.gmra.mxu3 %v3948_v12  ;;  %v3917_v44 = vadd.f32 1.0, %v4416_v59 }
 0x625   : > { %v3949_v52 = vmul.f32 %v3917_v44, %v2573_v42 }
 0x629   : > { %4175 = vmatmul.f32.vlgmr.msrb.gmra.mxu2 %v3945_v47  ;;  %v4076_v16 = vpop.f32.mrf.mxu2 }
 0x62a   : > { %v4077_v26 = vadd.f32 %v4076_v16, %v4036_v49  ;;  %v9088_v16 = vld [vmem:[#allocation21_spill] sm:$0xff] }
 0x630   : > { %v4117_v62 = vpop.f32.mrf.mxu3 }
 0x631   : > { %4178 = vmatmul.f32.gmra.mxu2 %v3949_v52  ;;  %v4118_v32 = vadd.f32 %v4117_v62, %v4077_v26 }
 0x633   : > { %v4159_v53 = vadd.f32 %v4158_v37, %v4118_v32 }
 0x635   : > { %v4186_v11 = vmul.f32 %v8690_v22, %v4159_v53 }
 0x637   : > { %v4198_v39 = vadd.f32 %v8696_v27, %v4186_v11 }
 0x639   : > { %v4206_v31 = vadd.f32 %v4198_v39, %v9084_v6  ;;  %v9089_v6 = vld [vmem:[#allocation22_spill] sm:$0xff] }
 0x63b   : > { %4214 = vst [vmem:[%s8703_s23] sm:$0xff] %v4206_v31 }
 0x664   : > { %v4038_v28 = vpop.f32.mrf.mxu1 }
 0x665   : > { %v4161_v10 = vpop.f32.mrf.mxu0  ;;  %v4039_v57 = vadd.f32 %v8684_v36, %v4038_v28 }
 0x671   : > { %v4041_v7 = vpop.f32.mrf.mxu1 }
 0x672   : > { %v4042_v25 = vadd.f32 %v8684_v36, %v4041_v7 }
 0x674   : > { %v4079_v54 = vpop.f32.mrf.mxu2  ;;  %v4164_v8 = vpop.f32.mrf.mxu0 }
 0x675   : > { %v4120_v1 = vpop.f32.mrf.mxu3  ;;  %v4080_v0 = vadd.f32 %v4079_v54, %v4039_v57 }
 0x677   : > { %v4121_v3 = vadd.f32 %v4120_v1, %v4080_v0 }
 0x679   : > { %v4162_v24 = vadd.f32 %v4161_v10, %v4121_v3 }
 0x67b   : > { %v4187_v15 = vmul.f32 %v8690_v22, %v4162_v24  ;;  %v4044_v63 = vpop.f32.mrf.mxu1 }
 0x67c   : > { %v4082_v4 = vpop.f32.mrf.mxu2  ;;  %v4045_v30 = vadd.f32 %v8684_v36, %v4044_v63  ;;  %v4167_v18 = vpop.f32.mrf.mxu0 }
 0x67d   : > { %v4199_v43 = vadd.f32 %v8696_v27, %v4187_v15  ;;  %v4083_v50 = vadd.f32 %v4082_v4, %v4042_v25 }
 0x67e   : > { %v4123_v34 = vpop.f32.mrf.mxu3 }
 0x67f   : > { %v4207_v38 = vadd.f32 %v4199_v43, %v9085_v56  ;;  %v4124_v46 = vadd.f32 %v4123_v34, %v4083_v50  ;;  %v9090_v50 = vld [vmem:[#allocation23_spill] sm:$0xff] }
 0x681   : > { %4215 = vst [vmem:[%s8703_s23 + $0x8] sm:$0xff] %v4207_v38  ;;  %v4165_v33 = vadd.f32 %v4164_v8, %v4124_v46 }
 0x683   : > { %v4188_v13 = vmul.f32 %v8690_v22, %v4165_v33  ;;  %v4047_v51 = vpop.f32.mrf.mxu1  ;;  %v9091_v33 = vld [vmem:[#allocation24_spill] sm:$0xff] }
 0x684   : > { %v4085_v14 = vpop.f32.mrf.mxu2  ;;  %v4048_v21 = vadd.f32 %v8684_v36, %v4047_v51  ;;  %v4170_v2 = vpop.f32.mrf.mxu0 }
 0x685   : > { %v4200_v45 = vadd.f32 %v8696_v27, %v4188_v13  ;;  %v4086_v58 = vadd.f32 %v4085_v14, %v4045_v30 }
 0x686   : > { %v4126_v9 = vpop.f32.mrf.mxu3 }
 0x687   : > { %v4208_v17 = vadd.f32 %v4200_v45, %v9086_v55  ;;  %v4127_v5 = vadd.f32 %v4126_v9, %v4086_v58 }
 0x689   : > { %4216 = vst [vmem:[%s8703_s23 + $0x10] sm:$0xff] %v4208_v17  ;;  %v4168_v40 = vadd.f32 %v4167_v18, %v4127_v5 }
 0x68b   : > { %v4189_v29 = vmul.f32 %v8690_v22, %v4168_v40  ;;  %v4050_v35 = vpop.f32.mrf.mxu1 }
 0x68c   : > { %v4088_v20 = vpop.f32.mrf.mxu2  ;;  %v4051_v59 = vadd.f32 %v8684_v36, %v4050_v35  ;;  %v4173_v32 = vpop.f32.mrf.mxu0 }
 0x68d   : > { %v4201_v12 = vadd.f32 %v8696_v27, %v4189_v29  ;;  %v4089_v60 = vadd.f32 %v4088_v20, %v4048_v21 }
 0x68e   : > { %v4129_v61 = vpop.f32.mrf.mxu3 }
 0x68f   : > { %v4209_v48 = vadd.f32 %v4201_v12, %v9087_v19  ;;  %v4130_v41 = vadd.f32 %v4129_v61, %v4089_v60 }
 0x691   : > { %4217 = vst [vmem:[%s8703_s23 + $0x18] sm:$0xff] %v4209_v48  ;;  %v4171_v47 = vadd.f32 %v4170_v2, %v4130_v41 }
 0x693   : > { %v4190_v44 = vmul.f32 %v8690_v22, %v4171_v47  ;;  %v4053_v28 = vpop.f32.mrf.mxu1 }
 0x694   : > { %v4091_v42 = vpop.f32.mrf.mxu2  ;;  %v4054_v7 = vadd.f32 %v8684_v36, %v4053_v28 }
 0x695   : > { %v4202_v52 = vadd.f32 %v8696_v27, %v4190_v44  ;;  %v4092_v23 = vadd.f32 %v4091_v42, %v4051_v59 }
 0x696   : > { %v4132_v49 = vpop.f32.mrf.mxu3 }
 0x697   : > { %v4210_v26 = vadd.f32 %v4202_v52, %v9088_v16  ;;  %v4133_v62 = vadd.f32 %v4132_v49, %v4092_v23 }
 0x699   : > { %4218 = vst [vmem:[%s8703_s23 + $0x20] sm:$0xff] %v4210_v26  ;;  %v4174_v37 = vadd.f32 %v4173_v32, %v4133_v62 }
 0x69b   : > { %v4191_v53 = vmul.f32 %v8690_v22, %v4174_v37  ;;  %v4056_v1 = vpop.f32.mrf.mxu1 }
 0x69c   : > { %v4094_v11 = vpop.f32.mrf.mxu2  ;;  %v4057_v24 = vadd.f32 %v8684_v36, %v4056_v1 }
 0x69d   : > { %v4203_v39 = vadd.f32 %v8696_v27, %v4191_v53  ;;  %v4095_v57 = vadd.f32 %v4094_v11, %v4054_v7 }
 0x69e   : > { %v4135_v54 = vpop.f32.mrf.mxu3 }
 0x69f   : > { %v4211_v31 = vadd.f32 %v4203_v39, %v9089_v6  ;;  %v4136_v0 = vadd.f32 %v4135_v54, %v4095_v57 }
 0x6a1   : > { %4219 = vst [vmem:[%s8703_s23 + $0x28] sm:$0xff] %v4211_v31 }
 0x6a4   : > { %v4097_v10 = vpop.f32.mrf.mxu2 }
 0x6a5   : > { %v4098_v25 = vadd.f32 %v4097_v10, %v4057_v24 }
 0x6a6   : > { %v4138_v4 = vpop.f32.mrf.mxu3 }
 0x6a7   : > { %v4139_v43 = vadd.f32 %v4138_v4, %v4098_v25 }
 0x6ac   : > { %v4176_v3 = vpop.f32.mrf.mxu2 }
 0x6ad   : > { %v4177_v8 = vadd.f32 %v4176_v3, %v4136_v0 }
 0x6af   : > { %v4192_v15 = vmul.f32 %v8690_v22, %v4177_v8 }
 0x6b1   : > { %v4204_v63 = vadd.f32 %v8696_v27, %v4192_v15 }
 0x6b3   : > { %v4212_v34 = vadd.f32 %v4204_v63, %v9090_v50 }
 0x6b4   : > { %v4179_v56 = vpop.f32.mrf.mxu2 }
 0x6b5   : > { %4220 = vst [vmem:[%s8703_s23 + $0x30] sm:$0xff] %v4212_v34  ;;  %v4180_v38 = vadd.f32 %v4179_v56, %v4139_v43 }
 0x6b7   : > { %v4193_v36 = vmul.f32 %v8690_v22, %v4180_v38 }
 0x6b9   : > { %v4205_v46 = vadd.f32 %v8696_v27, %v4193_v36 }
 0x6bb   : > { %v4213_v30 = vadd.f32 %v4205_v46, %v9091_v33 }
 0x6bd   : > { %4221 = vst [vmem:[%s8703_s23 + $0x38] sm:$0xff] %v4213_v30 }
 0x6be   : > { %4776 = shalt.err (!%p4773_p8)
}
 0x6bf   : > { %s4829_s29 = smov 128   ;;  %s4830_s23 = smov 8  }
 0x6c0   : > { %4472 = dma.vmem_to_hbm [thread:$0]  (%p4964_p5), %s4236_s27, 1024, %s4238_s3, %s4223_s0, %s4829_s29, %s4829_s29, %s4830_s23  }
 0x6c1 PF: > { %s9092_s4 = sld [smem:[#allocation13_spill]] }
 0x6c2   : > { %s9093_s5 = sld [smem:[#allocation11_spill]] }
 0x6c7   : > { %p4489_p9 = scmp.ge.s32.totalorder %s9092_s4, 2 }
 0x6c8   : > { %s4252_s22 = sand.u32 1, %s9093_s5  }
 0x6c9   : > { %p4482_p10 = pnand %p4489_p9, %p4968_p6  ;;  %s4253_s24 = scalar_lea.sflag [#allocation4], %s4252_s22 }
 0x6cb   : > { %p4483_p11 = pneg %p4482_p10 }
 0x6cd   : > { %4802 = dma.done.wait (%p4483_p11), %s4253_s24, 1024  }
 0x6ce   : > { %4804 = vsyncadd (%p4483_p11), %s4253_s24, 4294966272  ;;  %s9095_s30 = sld [smem:[#allocation14_spill]]  ;;  %s9098_s27 = smov %s4811_s28 }
 0x6cf   : > { %s9096_s1 = sld [smem:[#allocation12_spill]] }
 0x6d0   : > { %s9097_s29 = sld [smem:[#allocation15_spill]] }
 0x6d4   : > { %p30_p12 = scmp.ge.s32.totalorder %s9095_s30, 4  }
 0x6d5   : > { %s9099_s28 = smov %s9096_s1 }
 0x6d6   :  { %32 = sbr.rel (!%p30_p12) target bundleno = 13 (0xd), region = 142 }
 0x6db   :  { %4259 = vsyncpa [#allocation3], 1 }
 0x6dc   :  { %4261 = vsyncpa [#allocation3 + $0x1], 1 }
 0x6dd   :  { %4262 = vsyncpa [#allocation6], 1 }
 0x6de   :  { %4263 = vsyncpa [#allocation4], 1 }
 0x6df   :  { %4265 = vsyncpa [#allocation4 + $0x1], 1 }

</bundles_post_ra>
